<compile_context>
chip_gen: v7x
topology: tpu7x:2x2x1
jax: 0.10.0
libtpu: 0.0.40
codegen_flags: <defaults>
</compile_context>

<pallas_src>
import functools
import math

import jax
import jax.numpy as jnp
from jax.experimental import pallas as pl
from jax.experimental.pallas import tpu as pltpu

# Full-precision f32 GEMMs everywhere (kernels + reference) for exact parity.
jax.config.update("jax_default_matmul_precision", "highest")


# ---------------------------------------------------------------------------
# helpers
# ---------------------------------------------------------------------------
def _compiler_params(dims, block_bytes):
    # ~2x the working set for double buffering + headroom, clamped to 48 MiB so
    # it stays safely under v7x's 64 MiB VMEM per TensorCore.
    limit = int(min(max(2 * block_bytes + (8 << 20), 32 << 20), 48 << 20))
    return pltpu.CompilerParams(dimension_semantics=dims,
                                vmem_limit_bytes=limit)


def _pick_tile_rows(rows, in_cols, out_cols, weight_bytes, vmem_budget=44 << 20):
    """Largest row tile that keeps (double-buffered) f32 blocks in budget."""
    if rows <= 512:
        return rows                                  # full-extent block is legal
    per_row = 4 * (in_cols + out_cols) * 2           # f32, dbl-buffered in + out
    avail = max(vmem_budget - 2 * weight_bytes, 4 << 20)
    t = int(min(max(avail // per_row, 8), 2048, rows))
    return max(8, (t // 8) * 8)


def _layernorm_f32(x, alpha, bias, eps):
    """Custom LayerNormalization: scalar alpha/bias, unbiased std, eps on std."""
    d = x.shape[-1]
    mean = jnp.sum(x, axis=-1, keepdims=True) * jnp.float32(1.0 / d)
    diff = x - mean
    var = jnp.sum(diff * diff, axis=-1, keepdims=True) * jnp.float32(1.0 / (d - 1))
    std = jnp.sqrt(var)
    return alpha * diff / (std + jnp.float32(eps)) + bias


# ---------------------------------------------------------------------------
# Kernel 1: LayerNorm fused into the QKV projection
# ---------------------------------------------------------------------------
def _ln_qkv_kernel(alpha_ref, bias_ref, x_ref, w_ref, b_ref, o_ref, *, eps):
    x = x_ref[...].astype(jnp.float32)
    n = _layernorm_f32(x, alpha_ref[0], bias_ref[0], eps)
    y = jnp.dot(n, w_ref[...].astype(jnp.float32),
                preferred_element_type=jnp.float32)
    y = y + b_ref[...].astype(jnp.float32)
    o_ref[...] = y.astype(o_ref.dtype)


# ---------------------------------------------------------------------------
# Kernel 2: multi-head attention + w_o projection + residual (per batch)
# ---------------------------------------------------------------------------
def _attn_wo_kernel(qkv_ref, mask_ref, wo_ref, bo_ref, res_ref, o_ref,
                    *, n_heads, d_k, scale):
    d = n_heads * d_k
    qkv = qkv_ref[0].astype(jnp.float32)        # (S, 3D)
    m = mask_ref[0, 0]                          # (S, S)

    heads = []
    for hd in range(n_heads):                   # static loop: all heads per step
        lo = hd * d_k
        q_h = qkv[:, lo:lo + d_k]
        k_h = qkv[:, d + lo:d + lo + d_k]
        v_h = qkv[:, 2 * d + lo:2 * d + lo + d_k]
        s = jax.lax.dot_general(q_h, k_h, (((1,), (1,)), ((), ())),
                                preferred_element_type=jnp.float32)
        s = s * jnp.float32(scale)
        s = jnp.where(m == 0, jnp.float32(-1e9), s)     # masked_fill(mask==0,-1e9)
        s = s - jnp.max(s, axis=-1, keepdims=True)
        e = jnp.exp(s)
        p = e / jnp.sum(e, axis=-1, keepdims=True)      # exact division
        heads.append(jnp.dot(p, v_h, preferred_element_type=jnp.float32))

    attn = jnp.concatenate(heads, axis=-1)      # (S, D) lane-dense head merge
    y = jnp.dot(attn, wo_ref[...].astype(jnp.float32),
                preferred_element_type=jnp.float32)
    y = y + bo_ref[...].astype(jnp.float32) + res_ref[0].astype(jnp.float32)
    o_ref[0] = y.astype(o_ref.dtype)


# ---------------------------------------------------------------------------
# Kernel 3: LayerNorm + Linear -> ReLU -> Linear + residual (fused FFN)
# ---------------------------------------------------------------------------
def _ln_ffn_kernel(alpha_ref, bias_ref, x_ref, w1_ref, b1_ref, w2_ref, b2_ref,
                   o_ref, *, eps):
    x = x_ref[...].astype(jnp.float32)
    n = _layernorm_f32(x, alpha_ref[0], bias_ref[0], eps)
    h = jnp.dot(n, w1_ref[...].astype(jnp.float32),
                preferred_element_type=jnp.float32) + b1_ref[...].astype(jnp.float32)
    h = jnp.maximum(h, 0.0)                                   # ReLU
    y = jnp.dot(h, w2_ref[...].astype(jnp.float32),
                preferred_element_type=jnp.float32) + b2_ref[...].astype(jnp.float32)
    o_ref[...] = (y + x).astype(o_ref.dtype)                  # residual add


# ---------------------------------------------------------------------------
# One-time parameter preparation (hoisted out of the per-step forward)
# ---------------------------------------------------------------------------
def prepare_encoder_params(params):
    d = params["w_q"].shape[1]
    f32 = jnp.float32
    return {
        "ln0_alpha": params["ln0_alpha"].reshape(1).astype(f32),
        "ln0_bias": params["ln0_bias"].reshape(1).astype(f32),
        "ln1_alpha": params["ln1_alpha"].reshape(1).astype(f32),
        "ln1_bias": params["ln1_bias"].reshape(1).astype(f32),
        # torch Linear weight is (out, in); kernels use x @ W^T -> (in, out).
        "w_qkv": jnp.concatenate(
            [params["w_q"].T, params["w_k"].T, params["w_v"].T], axis=1).astype(f32),
        "b_qkv": jnp.concatenate(
            [params["b_q"], params["b_k"], params["b_v"]]).reshape(1, 3 * d).astype(f32),
        "w_o": params["w_o"].T.astype(f32),
        "b_o": params["b_o"].reshape(1, -1).astype(f32),
        "w_ff1": params["w_ff1"].T.astype(f32),
        "b_ff1": params["b_ff1"].reshape(1, -1).astype(f32),
        "w_ff2": params["w_ff2"].T.astype(f32),
        "b_ff2": params["b_ff2"].reshape(1, -1).astype(f32),
    }


# ---------------------------------------------------------------------------
# Full EncoderBlock forward (inference: dropout = identity)
# ---------------------------------------------------------------------------
def encoder_block_forward(x, src_mask, prep, *, h, eps=1e-6):
    """x: (B, S, D) f32; src_mask: (B, 1, S, S), positions with 0 are masked."""
    b, s, d = x.shape
    assert d % h == 0, "d_model is not divisible by h"
    d_k = d // h
    rows = b * s
    x2 = x.reshape(rows, d)

    # ---- residual connection 0: LN0 fused into the QKV projection ----------
    w_qkv, b_qkv = prep["w_qkv"], prep["b_qkv"]
    tile = _pick_tile_rows(rows, d, 3 * d, 4 * w_qkv.size)
    blk = 4 * (tile * d + tile * 3 * d + w_qkv.size + b_qkv.size)
    qkv = pl.pallas_call(
        functools.partial(_ln_qkv_kernel, eps=eps),
        out_shape=jax.ShapeDtypeStruct((rows, 3 * d), x.dtype),
        grid=(pl.cdiv(rows, tile),),
        in_specs=[
            pl.BlockSpec(memory_space=pltpu.MemorySpace.SMEM),     # ln0 alpha (1,)
            pl.BlockSpec(memory_space=pltpu.MemorySpace.SMEM),     # ln0 bias  (1,)
            pl.BlockSpec((tile, d), lambda i: (i, 0)),
            pl.BlockSpec((d, 3 * d), lambda i: (0, 0)),            # resident weight
            pl.BlockSpec((1, 3 * d), lambda i: (0, 0)),
        ],
        out_specs=pl.BlockSpec((tile, 3 * d), lambda i: (i, 0)),
        compiler_params=_compiler_params(("parallel",), blk),
    )(prep["ln0_alpha"], prep["ln0_bias"], x2, w_qkv, b_qkv)

    # ---- multi-head attention + w_o + residual, one grid step per batch ----
    # TODO(synk): for long sequences (S >~ 2k) switch to a KV-tiled online-
    # softmax (flash-style) variant to bound the (S, S) VMEM working set.
    qkv3 = qkv.reshape(b, s, 3 * d)
    blk = 4 * (s * 3 * d + s * s + d * d + d + 2 * s * d)
    x1 = pl.pallas_call(
        functools.partial(_attn_wo_kernel, n_heads=h, d_k=d_k,
                          scale=1.0 / math.sqrt(d_k)),
        out_shape=jax.ShapeDtypeStruct((b, s, d), x.dtype),
        grid=(b,),
        in_specs=[
            pl.BlockSpec((1, s, 3 * d), lambda bi: (bi, 0, 0)),    # fused QKV
            pl.BlockSpec((1, 1, s, s), lambda bi: (bi, 0, 0, 0)),  # mask
            pl.BlockSpec((d, d), lambda bi: (0, 0)),               # w_o resident
            pl.BlockSpec((1, d), lambda bi: (0, 0)),               # b_o
            pl.BlockSpec((1, s, d), lambda bi: (bi, 0, 0)),        # residual x
        ],
        out_specs=pl.BlockSpec((1, s, d), lambda bi: (bi, 0, 0)),
        compiler_params=_compiler_params(("parallel",), blk),
    )(qkv3, src_mask, prep["w_o"], prep["b_o"], x)

    # ---- residual connection 1: LN1 + Linear->ReLU->Linear + residual ------
    x1_2 = x1.reshape(rows, d)
    d_ff = prep["w_ff1"].shape[1]
    w_bytes = 4 * (prep["w_ff1"].size + prep["w_ff2"].size)
    tile = _pick_tile_rows(rows, d + d_ff, d, w_bytes)
    blk = 4 * (2 * tile * d + tile * d_ff + 2 * d * d_ff + d_ff + d)
    out = pl.pallas_call(
        functools.partial(_ln_ffn_kernel, eps=eps),
        out_shape=jax.ShapeDtypeStruct((rows, d), x.dtype),
        grid=(pl.cdiv(rows, tile),),
        in_specs=[
            pl.BlockSpec(memory_space=pltpu.MemorySpace.SMEM),     # ln1 alpha
            pl.BlockSpec(memory_space=pltpu.MemorySpace.SMEM),     # ln1 bias
            pl.BlockSpec((tile, d), lambda i: (i, 0)),
            pl.BlockSpec((d, d_ff), lambda i: (0, 0)),             # w_ff1 resident
            pl.BlockSpec((1, d_ff), lambda i: (0, 0)),
            pl.BlockSpec((d_ff, d), lambda i: (0, 0)),             # w_ff2 resident
            pl.BlockSpec((1, d), lambda i: (0, 0)),
        ],
        out_specs=pl.BlockSpec((tile, d), lambda i: (i, 0)),
        compiler_params=_compiler_params(("parallel",), blk),
    )(prep["ln1_alpha"], prep["ln1_bias"], x1_2,
      prep["w_ff1"], prep["b_ff1"], prep["w_ff2"], prep["b_ff2"])

    return out.reshape(b, s, d)


# ---------------------------------------------------------------------------
# Pure-JAX reference (mirrors the PyTorch module, eval mode)
# ---------------------------------------------------------------------------
def _reference_encoder_block(x, src_mask, params, *, h, eps=1e-6):
    b, s, d = x.shape
    d_k = d // h

    def ln(t, a, bb):
        mean = jnp.mean(t, axis=-1, keepdims=True)
        var = jnp.sum((t - mean) ** 2, axis=-1, keepdims=True) / (d - 1)
        return a * (t - mean) / (jnp.sqrt(var) + eps) + bb

    def lin(t, w, bb):
        return t @ w.T + bb

    n = ln(x, params["ln0_alpha"], params["ln0_bias"])
    q = lin(n, params["w_q"], params["b_q"]).reshape(b, s, h, d_k).transpose(0, 2, 1, 3)
    k = lin(n, params["w_k"], params["b_k"]).reshape(b, s, h, d_k).transpose(0, 2, 1, 3)
    v = lin(n, params["w_v"], params["b_v"]).reshape(b, s, h, d_k).transpose(0, 2, 1, 3)
    scores = (q @ jnp.swapaxes(k, -1, -2)) / math.sqrt(d_k)
    scores = jnp.where(src_mask == 0, -1e9, scores)
    p = jax.nn.softmax(scores, axis=-1)
    a = (p @ v).transpose(0, 2, 1, 3).reshape(b, s, d)
    x = x + lin(a, params["w_o"], params["b_o"])

    n = ln(x, params["ln1_alpha"], params["ln1_bias"])
    f = lin(jnp.maximum(lin(n, params["w_ff1"], params["b_ff1"]), 0.0),
            params["w_ff2"], params["b_ff2"])
    return x + f


if __name__ == "__main__":
    key = jax.random.PRNGKey(0)
    B, S, D, H, D_FF = 2, 16, 64, 4, 128
    keys = jax.random.split(key, 14)

    def w(kk, shape, scale=0.1):
        return scale * jax.random.normal(kk, shape, dtype=jnp.float32)

    # torch-layout weights: (out_features, in_features)
    params = {
        "ln0_alpha": jnp.ones((1,), jnp.float32),
        "ln0_bias": jnp.zeros((1,), jnp.float32),
        "ln1_alpha": jnp.ones((1,), jnp.float32),
        "ln1_bias": jnp.zeros((1,), jnp.float32),
        "w_q": w(keys[0], (D, D)), "b_q": w(keys[1], (D,)),
        "w_k": w(keys[2], (D, D)), "b_k": w(keys[3], (D,)),
        "w_v": w(keys[4], (D, D)), "b_v": w(keys[5], (D,)),
        "w_o": w(keys[6], (D, D)), "b_o": w(keys[7], (D,)),
        "w_ff1": w(keys[8], (D_FF, D)), "b_ff1": w(keys[9], (D_FF,)),
        "w_ff2": w(keys[10], (D, D_FF)), "b_ff2": w(keys[11], (D,)),
    }
    x = jax.random.normal(keys[12], (B, S, D), dtype=jnp.float32)
    causal = jnp.tril(jnp.ones((S, S), dtype=jnp.int32))
    src_mask = jnp.broadcast_to(causal, (B, 1, S, S))

    # TODO(synk): dropout layers are identity (eval/inference mode); the module's
    # `attention_scores` attribute side-effect is not part of the forward output.
    prep = prepare_encoder_params(params)
    fwd = jax.jit(functools.partial(encoder_block_forward, h=H, eps=1e-6))
    out = jax.block_until_ready(fwd(x, src_mask, prep))

    ref = _reference_encoder_block(x, src_mask, params, h=H)
    assert out.shape == (B, S, D)
    max_err = float(jnp.max(jnp.abs(out - ref)))
    assert jnp.allclose(out, ref, atol=2e-3, rtol=2e-3), (
        f"mismatch vs reference, max abs err={max_err}")

    print("KERNEL_OK")
</pallas_src>

<mosaic_0001>
module attributes {stable_mosaic.version = 11 : i64} {
  func.func @_ln_ffn_kernel(%arg0: i32, %arg1: memref<1xf32, #tpu.memory_space<smem>>, %arg2: memref<1xf32, #tpu.memory_space<smem>>, %arg3: memref<32x64xf32, #tpu.memory_space<vmem>>, %arg4: memref<64x128xf32, #tpu.memory_space<vmem>>, %arg5: memref<1x128xf32, #tpu.memory_space<vmem>>, %arg6: memref<128x64xf32, #tpu.memory_space<vmem>>, %arg7: memref<1x64xf32, #tpu.memory_space<vmem>>, %arg8: memref<32x64xf32, #tpu.memory_space<vmem>>) attributes {dimension_semantics = [#tpu.dimension_semantics<parallel>], iteration_bounds = array<i64: 1>, scalar_prefetch = 0 : i64, scratch_operands = 0 : i64, tpu.core_type = #tpu.core_type<tc>, window_params = [{transform_indices = @transform_0, window_bounds = array<i64: 1>}, {transform_indices = @transform_1, window_bounds = array<i64: 1>}, {transform_indices = @transform_2, window_bounds = array<i64: 32, 64>}, {pipeline_mode = #tpu.pipeline_mode<synchronous>, transform_indices = @transform_3, window_bounds = array<i64: 64, 128>}, {pipeline_mode = #tpu.pipeline_mode<synchronous>, transform_indices = @transform_4, window_bounds = array<i64: 1, 128>}, {pipeline_mode = #tpu.pipeline_mode<synchronous>, transform_indices = @transform_5, window_bounds = array<i64: 128, 64>}, {pipeline_mode = #tpu.pipeline_mode<synchronous>, transform_indices = @transform_6, window_bounds = array<i64: 1, 64>}, {transform_indices = @transform_7, window_bounds = array<i64: 32, 64>}]} {
    %c0 = arith.constant 0 : index
    %c0_0 = arith.constant 0 : index
    %0 = vector.load %arg3[%c0, %c0_0] : memref<32x64xf32, #tpu.memory_space<vmem>>, vector<32x64xf32>
    %c0_1 = arith.constant 0 : index
    %1 = memref.load %arg1[%c0_1] : memref<1xf32, #tpu.memory_space<smem>>
    %c0_2 = arith.constant 0 : index
    %2 = memref.load %arg2[%c0_2] : memref<1xf32, #tpu.memory_space<smem>>
    %cst = arith.constant dense<0.000000e+00> : vector<32xf32>
    %3 = vector.multi_reduction <add>, %0, %cst [1] : vector<32x64xf32> to vector<32xf32>
    %4 = vector.shape_cast %3 : vector<32xf32> to vector<32x1xf32>
    %cst_3 = arith.constant 1.562500e-02 : f32
    %5 = vector.broadcast %cst_3 : f32 to vector<32x1xf32>
    %6 = arith.mulf %4, %5 : vector<32x1xf32>
    %7 = vector.broadcast %6 : vector<32x1xf32> to vector<32x64xf32>
    %8 = arith.subf %0, %7 : vector<32x64xf32>
    %9 = arith.mulf %8, %8 : vector<32x64xf32>
    %cst_4 = arith.constant dense<0.000000e+00> : vector<32xf32>
    %10 = vector.multi_reduction <add>, %9, %cst_4 [1] : vector<32x64xf32> to vector<32xf32>
    %11 = vector.shape_cast %10 : vector<32xf32> to vector<32x1xf32>
    %cst_5 = arith.constant 0.0158730168 : f32
    %12 = vector.broadcast %cst_5 : f32 to vector<32x1xf32>
    %13 = arith.mulf %11, %12 : vector<32x1xf32>
    %14 = math.sqrt %13 : vector<32x1xf32>
    %15 = vector.broadcast %1 : f32 to vector<32x64xf32>
    %16 = arith.mulf %15, %8 : vector<32x64xf32>
    %cst_6 = arith.constant 9.99999997E-7 : f32
    %17 = vector.broadcast %cst_6 : f32 to vector<32x1xf32>
    %18 = arith.addf %14, %17 : vector<32x1xf32>
    %19 = vector.broadcast %18 : vector<32x1xf32> to vector<32x64xf32>
    %20 = arith.divf %16, %19 : vector<32x64xf32>
    %21 = vector.broadcast %2 : f32 to vector<32x64xf32>
    %22 = arith.addf %20, %21 : vector<32x64xf32>
    %c0_7 = arith.constant 0 : index
    %c0_8 = arith.constant 0 : index
    %23 = vector.load %arg4[%c0_7, %c0_8] : memref<64x128xf32, #tpu.memory_space<vmem>>, vector<64x128xf32>
    %cst_9 = arith.constant dense<0.000000e+00> : vector<32x128xf32>
    %24 = tpu.matmul %22, %23, %cst_9 {dimension_numbers = #tpu.dot_dimension_numbers<[1], [0], [0], [1], [0, 0, 1, 1], [], []>, precision = #tpu.contract_precision<fp32>} : vector<32x64xf32>, vector<64x128xf32>, vector<32x128xf32> -> vector<32x128xf32>
    %c0_10 = arith.constant 0 : index
    %c0_11 = arith.constant 0 : index
    %25 = vector.load %arg5[%c0_10, %c0_11] : memref<1x128xf32, #tpu.memory_space<vmem>>, vector<1x128xf32>
    %26 = vector.broadcast %25 : vector<1x128xf32> to vector<32x128xf32>
    %27 = arith.addf %24, %26 : vector<32x128xf32>
    %cst_12 = arith.constant 0.000000e+00 : f32
    %28 = vector.broadcast %cst_12 : f32 to vector<32x128xf32>
    %29 = arith.maximumf %27, %28 : vector<32x128xf32>
    %c0_13 = arith.constant 0 : index
    %c0_14 = arith.constant 0 : index
    %30 = vector.load %arg6[%c0_13, %c0_14] : memref<128x64xf32, #tpu.memory_space<vmem>>, vector<128x64xf32>
    %cst_15 = arith.constant dense<0.000000e+00> : vector<32x64xf32>
    %31 = tpu.matmul %29, %30, %cst_15 {dimension_numbers = #tpu.dot_dimension_numbers<[1], [0], [0], [1], [0, 0, 1, 1], [], []>, precision = #tpu.contract_precision<fp32>} : vector<32x128xf32>, vector<128x64xf32>, vector<32x64xf32> -> vector<32x64xf32>
    %c0_16 = arith.constant 0 : index
    %c0_17 = arith.constant 0 : index
    %32 = vector.load %arg7[%c0_16, %c0_17] : memref<1x64xf32, #tpu.memory_space<vmem>>, vector<1x64xf32>
    %33 = vector.broadcast %32 : vector<1x64xf32> to vector<32x64xf32>
    %34 = arith.addf %31, %33 : vector<32x64xf32>
    %35 = arith.addf %34, %0 : vector<32x64xf32>
    %c0_18 = arith.constant 0 : index
    %c0_19 = arith.constant 0 : index
    %36 = vector.load %arg8[%c0_18, %c0_19] : memref<32x64xf32, #tpu.memory_space<vmem>>, vector<32x64xf32>
    tpu.vector_store %arg8[%c0_18, %c0_19], %35 {strides = array<i32>} : memref<32x64xf32, #tpu.memory_space<vmem>>, vector<32x64xf32>,
    return
  }
  func.func @transform_0(%arg0: i32) -> i32 {
    %c0_i32 = arith.constant 0 : i32
    %c0_i32_0 = arith.constant 0 : i32
    return %c0_i32 : i32
  }
  func.func @transform_1(%arg0: i32) -> i32 {
    %c0_i32 = arith.constant 0 : i32
    %c0_i32_0 = arith.constant 0 : i32
    return %c0_i32 : i32
  }
  func.func @transform_2(%arg0: i32) -> (i32, i32) {
    %c0_i32 = arith.constant 0 : i32
    %c0_i32_0 = arith.constant 0 : i32
    return %arg0, %c0_i32 : i32, i32
  }
  func.func @transform_3(%arg0: i32) -> (i32, i32) {
    %c0_i32 = arith.constant 0 : i32
    %c0_i32_0 = arith.constant 0 : i32
    %c0_i32_1 = arith.constant 0 : i32
    return %c0_i32, %c0_i32_0 : i32, i32
  }
  func.func @transform_4(%arg0: i32) -> (i32, i32) {
    %c0_i32 = arith.constant 0 : i32
    %c0_i32_0 = arith.constant 0 : i32
    %c0_i32_1 = arith.constant 0 : i32
    return %c0_i32, %c0_i32_0 : i32, i32
  }
  func.func @transform_5(%arg0: i32) -> (i32, i32) {
    %c0_i32 = arith.constant 0 : i32
    %c0_i32_0 = arith.constant 0 : i32
    %c0_i32_1 = arith.constant 0 : i32
    return %c0_i32, %c0_i32_0 : i32, i32
  }
  func.func @transform_6(%arg0: i32) -> (i32, i32) {
    %c0_i32 = arith.constant 0 : i32
    %c0_i32_0 = arith.constant 0 : i32
    %c0_i32_1 = arith.constant 0 : i32
    return %c0_i32, %c0_i32_0 : i32, i32
  }
  func.func @transform_7(%arg0: i32) -> (i32, i32) {
    %c0_i32 = arith.constant 0 : i32
    %c0_i32_0 = arith.constant 0 : i32
    return %arg0, %c0_i32 : i32, i32
  }
}

module attributes {stable_mosaic.version = 11 : i64} {
  func.func @_ln_qkv_kernel(%arg0: i32, %arg1: memref<1xf32, #tpu.memory_space<smem>>, %arg2: memref<1xf32, #tpu.memory_space<smem>>, %arg3: memref<32x64xf32, #tpu.memory_space<vmem>>, %arg4: memref<64x192xf32, #tpu.memory_space<vmem>>, %arg5: memref<1x192xf32, #tpu.memory_space<vmem>>, %arg6: memref<32x192xf32, #tpu.memory_space<vmem>>) attributes {dimension_semantics = [#tpu.dimension_semantics<parallel>], iteration_bounds = array<i64: 1>, scalar_prefetch = 0 : i64, scratch_operands = 0 : i64, tpu.core_type = #tpu.core_type<tc>, window_params = [{transform_indices = @transform_0, window_bounds = array<i64: 1>}, {transform_indices = @transform_1, window_bounds = array<i64: 1>}, {transform_indices = @transform_2, window_bounds = array<i64: 32, 64>}, {pipeline_mode = #tpu.pipeline_mode<synchronous>, transform_indices = @transform_3, window_bounds = array<i64: 64, 192>}, {pipeline_mode = #tpu.pipeline_mode<synchronous>, transform_indices = @transform_4, window_bounds = array<i64: 1, 192>}, {transform_indices = @transform_5, window_bounds = array<i64: 32, 192>}]} {
    %c0 = arith.constant 0 : index
    %c0_0 = arith.constant 0 : index
    %0 = vector.load %arg3[%c0, %c0_0] : memref<32x64xf32, #tpu.memory_space<vmem>>, vector<32x64xf32>
    %c0_1 = arith.constant 0 : index
    %1 = memref.load %arg1[%c0_1] : memref<1xf32, #tpu.memory_space<smem>>
    %c0_2 = arith.constant 0 : index
    %2 = memref.load %arg2[%c0_2] : memref<1xf32, #tpu.memory_space<smem>>
    %cst = arith.constant dense<0.000000e+00> : vector<32xf32>
    %3 = vector.multi_reduction <add>, %0, %cst [1] : vector<32x64xf32> to vector<32xf32>
    %4 = vector.shape_cast %3 : vector<32xf32> to vector<32x1xf32>
    %cst_3 = arith.constant 1.562500e-02 : f32
    %5 = vector.broadcast %cst_3 : f32 to vector<32x1xf32>
    %6 = arith.mulf %4, %5 : vector<32x1xf32>
    %7 = vector.broadcast %6 : vector<32x1xf32> to vector<32x64xf32>
    %8 = arith.subf %0, %7 : vector<32x64xf32>
    %9 = arith.mulf %8, %8 : vector<32x64xf32>
    %cst_4 = arith.constant dense<0.000000e+00> : vector<32xf32>
    %10 = vector.multi_reduction <add>, %9, %cst_4 [1] : vector<32x64xf32> to vector<32xf32>
    %11 = vector.shape_cast %10 : vector<32xf32> to vector<32x1xf32>
    %cst_5 = arith.constant 0.0158730168 : f32
    %12 = vector.broadcast %cst_5 : f32 to vector<32x1xf32>
    %13 = arith.mulf %11, %12 : vector<32x1xf32>
    %14 = math.sqrt %13 : vector<32x1xf32>
    %15 = vector.broadcast %1 : f32 to vector<32x64xf32>
    %16 = arith.mulf %15, %8 : vector<32x64xf32>
    %cst_6 = arith.constant 9.99999997E-7 : f32
    %17 = vector.broadcast %cst_6 : f32 to vector<32x1xf32>
    %18 = arith.addf %14, %17 : vector<32x1xf32>
    %19 = vector.broadcast %18 : vector<32x1xf32> to vector<32x64xf32>
    %20 = arith.divf %16, %19 : vector<32x64xf32>
    %21 = vector.broadcast %2 : f32 to vector<32x64xf32>
    %22 = arith.addf %20, %21 : vector<32x64xf32>
    %c0_7 = arith.constant 0 : index
    %c0_8 = arith.constant 0 : index
    %23 = vector.load %arg4[%c0_7, %c0_8] : memref<64x192xf32, #tpu.memory_space<vmem>>, vector<64x192xf32>
    %cst_9 = arith.constant dense<0.000000e+00> : vector<32x192xf32>
    %24 = tpu.matmul %22, %23, %cst_9 {dimension_numbers = #tpu.dot_dimension_numbers<[1], [0], [0], [1], [0, 0, 1, 1], [], []>, precision = #tpu.contract_precision<fp32>} : vector<32x64xf32>, vector<64x192xf32>, vector<32x192xf32> -> vector<32x192xf32>
    %c0_10 = arith.constant 0 : index
    %c0_11 = arith.constant 0 : index
    %25 = vector.load %arg5[%c0_10, %c0_11] : memref<1x192xf32, #tpu.memory_space<vmem>>, vector<1x192xf32>
    %26 = vector.broadcast %25 : vector<1x192xf32> to vector<32x192xf32>
    %27 = arith.addf %24, %26 : vector<32x192xf32>
    %c0_12 = arith.constant 0 : index
    %c0_13 = arith.constant 0 : index
    %28 = vector.load %arg6[%c0_12, %c0_13] : memref<32x192xf32, #tpu.memory_space<vmem>>, vector<32x192xf32>
    tpu.vector_store %arg6[%c0_12, %c0_13], %27 {strides = array<i32>} : memref<32x192xf32, #tpu.memory_space<vmem>>, vector<32x192xf32>,
    return
  }
  func.func @transform_0(%arg0: i32) -> i32 {
    %c0_i32 = arith.constant 0 : i32
    %c0_i32_0 = arith.constant 0 : i32
    return %c0_i32 : i32
  }
  func.func @transform_1(%arg0: i32) -> i32 {
    %c0_i32 = arith.constant 0 : i32
    %c0_i32_0 = arith.constant 0 : i32
    return %c0_i32 : i32
  }
  func.func @transform_2(%arg0: i32) -> (i32, i32) {
    %c0_i32 = arith.constant 0 : i32
    %c0_i32_0 = arith.constant 0 : i32
    return %arg0, %c0_i32 : i32, i32
  }
  func.func @transform_3(%arg0: i32) -> (i32, i32) {
    %c0_i32 = arith.constant 0 : i32
    %c0_i32_0 = arith.constant 0 : i32
    %c0_i32_1 = arith.constant 0 : i32
    return %c0_i32, %c0_i32_0 : i32, i32
  }
  func.func @transform_4(%arg0: i32) -> (i32, i32) {
    %c0_i32 = arith.constant 0 : i32
    %c0_i32_0 = arith.constant 0 : i32
    %c0_i32_1 = arith.constant 0 : i32
    return %c0_i32, %c0_i32_0 : i32, i32
  }
  func.func @transform_5(%arg0: i32) -> (i32, i32) {
    %c0_i32 = arith.constant 0 : i32
    %c0_i32_0 = arith.constant 0 : i32
    return %arg0, %c0_i32 : i32, i32
  }
}

module attributes {stable_mosaic.version = 11 : i64} {
  func.func @_attn_wo_kernel(%arg0: i32, %arg1: memref<1x16x192xf32, #tpu.memory_space<vmem>>, %arg2: memref<1x1x16x16xi32, #tpu.memory_space<vmem>>, %arg3: memref<64x64xf32, #tpu.memory_space<vmem>>, %arg4: memref<1x64xf32, #tpu.memory_space<vmem>>, %arg5: memref<1x16x64xf32, #tpu.memory_space<vmem>>, %arg6: memref<1x16x64xf32, #tpu.memory_space<vmem>>) attributes {dimension_semantics = [#tpu.dimension_semantics<parallel>], iteration_bounds = array<i64: 2>, scalar_prefetch = 0 : i64, scratch_operands = 0 : i64, tpu.core_type = #tpu.core_type<tc>, window_params = [{transform_indices = @transform_0, window_bounds = array<i64: 1, 16, 192>}, {transform_indices = @transform_1, window_bounds = array<i64: 1, 1, 16, 16>}, {pipeline_mode = #tpu.pipeline_mode<synchronous>, transform_indices = @transform_2, window_bounds = array<i64: 64, 64>}, {pipeline_mode = #tpu.pipeline_mode<synchronous>, transform_indices = @transform_3, window_bounds = array<i64: 1, 64>}, {transform_indices = @transform_4, window_bounds = array<i64: 1, 16, 64>}, {transform_indices = @transform_5, window_bounds = array<i64: 1, 16, 64>}]} {
    %c0 = arith.constant 0 : index
    %c0_0 = arith.constant 0 : index
    %c0_1 = arith.constant 0 : index
    %0 = vector.load %arg1[%c0, %c0_0, %c0_1] : memref<1x16x192xf32, #tpu.memory_space<vmem>>, vector<1x16x192xf32>
    %1 = vector.shape_cast %0 : vector<1x16x192xf32> to vector<16x192xf32>
    %c0_2 = arith.constant 0 : index
    %c0_3 = arith.constant 0 : index
    %c0_4 = arith.constant 0 : index
    %c0_5 = arith.constant 0 : index
    %2 = vector.load %arg2[%c0_2, %c0_3, %c0_4, %c0_5] : memref<1x1x16x16xi32, #tpu.memory_space<vmem>>, vector<1x1x16x16xi32>
    %3 = vector.shape_cast %2 : vector<1x1x16x16xi32> to vector<16x16xi32>
    %4 = vector.extract_strided_slice %1 {offsets = [0, 0], sizes = [16, 16], strides = [1, 1]} : vector<16x192xf32> to vector<16x16xf32>
    %5 = vector.extract_strided_slice %1 {offsets = [0, 64], sizes = [16, 16], strides = [1, 1]} : vector<16x192xf32> to vector<16x16xf32>
    %6 = vector.extract_strided_slice %1 {offsets = [0, 128], sizes = [16, 16], strides = [1, 1]} : vector<16x192xf32> to vector<16x16xf32>
    %cst = arith.constant dense<0.000000e+00> : vector<16x16xf32>
    %7 = tpu.matmul %4, %5, %cst {dimension_numbers = #tpu.dot_dimension_numbers<[1], [1], [0], [0], [0, 0, 1, 0], [], []>, precision = #tpu.contract_precision<fp32>} : vector<16x16xf32>, vector<16x16xf32>, vector<16x16xf32> -> vector<16x16xf32>
    %cst_6 = arith.constant 2.500000e-01 : f32
    %8 = vector.broadcast %cst_6 : f32 to vector<16x16xf32>
    %9 = arith.mulf %7, %8 : vector<16x16xf32>
    %c0_i32 = arith.constant 0 : i32
    %10 = vector.broadcast %c0_i32 : i32 to vector<16x16xi32>
    %11 = arith.cmpi eq, %3, %10 : vector<16x16xi32>
    %cst_7 = arith.constant -1.000000e+09 : f32
    %12 = vector.broadcast %cst_7 : f32 to vector<16x16xf32>
    %13 = arith.select %11, %12, %9 : vector<16x16xi1>, vector<16x16xf32>
    %cst_8 = arith.constant dense<0xFF800000> : vector<16xf32>
    %14 = vector.multi_reduction <maximumf>, %13, %cst_8 [1] : vector<16x16xf32> to vector<16xf32>
    %15 = vector.shape_cast %14 : vector<16xf32> to vector<16x1xf32>
    %16 = vector.broadcast %15 : vector<16x1xf32> to vector<16x16xf32>
    %17 = arith.subf %13, %16 : vector<16x16xf32>
    %18 = math.exp %17 : vector<16x16xf32>
    %cst_9 = arith.constant dense<0.000000e+00> : vector<16xf32>
    %19 = vector.multi_reduction <add>, %18, %cst_9 [1] : vector<16x16xf32> to vector<16xf32>
    %20 = vector.shape_cast %19 : vector<16xf32> to vector<16x1xf32>
    %21 = vector.broadcast %20 : vector<16x1xf32> to vector<16x16xf32>
    %22 = arith.divf %18, %21 : vector<16x16xf32>
    %cst_10 = arith.constant dense<0.000000e+00> : vector<16x16xf32>
    %23 = tpu.matmul %22, %6, %cst_10 {dimension_numbers = #tpu.dot_dimension_numbers<[1], [0], [0], [1], [0, 0, 1, 1], [], []>, precision = #tpu.contract_precision<fp32>} : vector<16x16xf32>, vector<16x16xf32>, vector<16x16xf32> -> vector<16x16xf32>
    %24 = vector.extract_strided_slice %1 {offsets = [0, 16], sizes = [16, 16], strides = [1, 1]} : vector<16x192xf32> to vector<16x16xf32>
    %25 = vector.extract_strided_slice %1 {offsets = [0, 80], sizes = [16, 16], strides = [1, 1]} : vector<16x192xf32> to vector<16x16xf32>
    %26 = vector.extract_strided_slice %1 {offsets = [0, 144], sizes = [16, 16], strides = [1, 1]} : vector<16x192xf32> to vector<16x16xf32>
    %cst_11 = arith.constant dense<0.000000e+00> : vector<16x16xf32>
    %27 = tpu.matmul %24, %25, %cst_11 {dimension_numbers = #tpu.dot_dimension_numbers<[1], [1], [0], [0], [0, 0, 1, 0], [], []>, precision = #tpu.contract_precision<fp32>} : vector<16x16xf32>, vector<16x16xf32>, vector<16x16xf32> -> vector<16x16xf32>
    %cst_12 = arith.constant 2.500000e-01 : f32
    %28 = vector.broadcast %cst_12 : f32 to vector<16x16xf32>
    %29 = arith.mulf %27, %28 : vector<16x16xf32>
    %c0_i32_13 = arith.constant 0 : i32
    %30 = vector.broadcast %c0_i32_13 : i32 to vector<16x16xi32>
    %31 = arith.cmpi eq, %3, %30 : vector<16x16xi32>
    %cst_14 = arith.constant -1.000000e+09 : f32
    %32 = vector.broadcast %cst_14 : f32 to vector<16x16xf32>
    %33 = arith.select %31, %32, %29 : vector<16x16xi1>, vector<16x16xf32>
    %cst_15 = arith.constant dense<0xFF800000> : vector<16xf32>
    %34 = vector.multi_reduction <maximumf>, %33, %cst_15 [1] : vector<16x16xf32> to vector<16xf32>
    %35 = vector.shape_cast %34 : vector<16xf32> to vector<16x1xf32>
    %36 = vector.broadcast %35 : vector<16x1xf32> to vector<16x16xf32>
    %37 = arith.subf %33, %36 : vector<16x16xf32>
    %38 = math.exp %37 : vector<16x16xf32>
    %cst_16 = arith.constant dense<0.000000e+00> : vector<16xf32>
    %39 = vector.multi_reduction <add>, %38, %cst_16 [1] : vector<16x16xf32> to vector<16xf32>
    %40 = vector.shape_cast %39 : vector<16xf32> to vector<16x1xf32>
    %41 = vector.broadcast %40 : vector<16x1xf32> to vector<16x16xf32>
    %42 = arith.divf %38, %41 : vector<16x16xf32>
    %cst_17 = arith.constant dense<0.000000e+00> : vector<16x16xf32>
    %43 = tpu.matmul %42, %26, %cst_17 {dimension_numbers = #tpu.dot_dimension_numbers<[1], [0], [0], [1], [0, 0, 1, 1], [], []>, precision = #tpu.contract_precision<fp32>} : vector<16x16xf32>, vector<16x16xf32>, vector<16x16xf32> -> vector<16x16xf32>
    %44 = vector.extract_strided_slice %1 {offsets = [0, 32], sizes = [16, 16], strides = [1, 1]} : vector<16x192xf32> to vector<16x16xf32>
    %45 = vector.extract_strided_slice %1 {offsets = [0, 96], sizes = [16, 16], strides = [1, 1]} : vector<16x192xf32> to vector<16x16xf32>
    %46 = vector.extract_strided_slice %1 {offsets = [0, 160], sizes = [16, 16], strides = [1, 1]} : vector<16x192xf32> to vector<16x16xf32>
    %cst_18 = arith.constant dense<0.000000e+00> : vector<16x16xf32>
    %47 = tpu.matmul %44, %45, %cst_18 {dimension_numbers = #tpu.dot_dimension_numbers<[1], [1], [0], [0], [0, 0, 1, 0], [], []>, precision = #tpu.contract_precision<fp32>} : vector<16x16xf32>, vector<16x16xf32>, vector<16x16xf32> -> vector<16x16xf32>
    %cst_19 = arith.constant 2.500000e-01 : f32
    %48 = vector.broadcast %cst_19 : f32 to vector<16x16xf32>
    %49 = arith.mulf %47, %48 : vector<16x16xf32>
    %c0_i32_20 = arith.constant 0 : i32
    %50 = vector.broadcast %c0_i32_20 : i32 to vector<16x16xi32>
    %51 = arith.cmpi eq, %3, %50 : vector<16x16xi32>
    %cst_21 = arith.constant -1.000000e+09 : f32
    %52 = vector.broadcast %cst_21 : f32 to vector<16x16xf32>
    %53 = arith.select %51, %52, %49 : vector<16x16xi1>, vector<16x16xf32>
    %cst_22 = arith.constant dense<0xFF800000> : vector<16xf32>
    %54 = vector.multi_reduction <maximumf>, %53, %cst_22 [1] : vector<16x16xf32> to vector<16xf32>
    %55 = vector.shape_cast %54 : vector<16xf32> to vector<16x1xf32>
    %56 = vector.broadcast %55 : vector<16x1xf32> to vector<16x16xf32>
    %57 = arith.subf %53, %56 : vector<16x16xf32>
    %58 = math.exp %57 : vector<16x16xf32>
    %cst_23 = arith.constant dense<0.000000e+00> : vector<16xf32>
    %59 = vector.multi_reduction <add>, %58, %cst_23 [1] : vector<16x16xf32> to vector<16xf32>
    %60 = vector.shape_cast %59 : vector<16xf32> to vector<16x1xf32>
    %61 = vector.broadcast %60 : vector<16x1xf32> to vector<16x16xf32>
    %62 = arith.divf %58, %61 : vector<16x16xf32>
    %cst_24 = arith.constant dense<0.000000e+00> : vector<16x16xf32>
    %63 = tpu.matmul %62, %46, %cst_24 {dimension_numbers = #tpu.dot_dimension_numbers<[1], [0], [0], [1], [0, 0, 1, 1], [], []>, precision = #tpu.contract_precision<fp32>} : vector<16x16xf32>, vector<16x16xf32>, vector<16x16xf32> -> vector<16x16xf32>
    %64 = vector.extract_strided_slice %1 {offsets = [0, 48], sizes = [16, 16], strides = [1, 1]} : vector<16x192xf32> to vector<16x16xf32>
    %65 = vector.extract_strided_slice %1 {offsets = [0, 112], sizes = [16, 16], strides = [1, 1]} : vector<16x192xf32> to vector<16x16xf32>
    %66 = vector.extract_strided_slice %1 {offsets = [0, 176], sizes = [16, 16], strides = [1, 1]} : vector<16x192xf32> to vector<16x16xf32>
    %cst_25 = arith.constant dense<0.000000e+00> : vector<16x16xf32>
    %67 = tpu.matmul %64, %65, %cst_25 {dimension_numbers = #tpu.dot_dimension_numbers<[1], [1], [0], [0], [0, 0, 1, 0], [], []>, precision = #tpu.contract_precision<fp32>} : vector<16x16xf32>, vector<16x16xf32>, vector<16x16xf32> -> vector<16x16xf32>
    %cst_26 = arith.constant 2.500000e-01 : f32
    %68 = vector.broadcast %cst_26 : f32 to vector<16x16xf32>
    %69 = arith.mulf %67, %68 : vector<16x16xf32>
    %c0_i32_27 = arith.constant 0 : i32
    %70 = vector.broadcast %c0_i32_27 : i32 to vector<16x16xi32>
    %71 = arith.cmpi eq, %3, %70 : vector<16x16xi32>
    %cst_28 = arith.constant -1.000000e+09 : f32
    %72 = vector.broadcast %cst_28 : f32 to vector<16x16xf32>
    %73 = arith.select %71, %72, %69 : vector<16x16xi1>, vector<16x16xf32>
    %cst_29 = arith.constant dense<0xFF800000> : vector<16xf32>
    %74 = vector.multi_reduction <maximumf>, %73, %cst_29 [1] : vector<16x16xf32> to vector<16xf32>
    %75 = vector.shape_cast %74 : vector<16xf32> to vector<16x1xf32>
    %76 = vector.broadcast %75 : vector<16x1xf32> to vector<16x16xf32>
    %77 = arith.subf %73, %76 : vector<16x16xf32>
    %78 = math.exp %77 : vector<16x16xf32>
    %cst_30 = arith.constant dense<0.000000e+00> : vector<16xf32>
    %79 = vector.multi_reduction <add>, %78, %cst_30 [1] : vector<16x16xf32> to vector<16xf32>
    %80 = vector.shape_cast %79 : vector<16xf32> to vector<16x1xf32>
    %81 = vector.broadcast %80 : vector<16x1xf32> to vector<16x16xf32>
    %82 = arith.divf %78, %81 : vector<16x16xf32>
    %cst_31 = arith.constant dense<0.000000e+00> : vector<16x16xf32>
    %83 = tpu.matmul %82, %66, %cst_31 {dimension_numbers = #tpu.dot_dimension_numbers<[1], [0], [0], [1], [0, 0, 1, 1], [], []>, precision = #tpu.contract_precision<fp32>} : vector<16x16xf32>, vector<16x16xf32>, vector<16x16xf32> -> vector<16x16xf32>
    %84 = tpu.concatenate %23, %43, %63, %83 in 1 : vector<16x16xf32>, vector<16x16xf32>, vector<16x16xf32>, vector<16x16xf32> -> vector<16x64xf32>
    %c0_32 = arith.constant 0 : index
    %c0_33 = arith.constant 0 : index
    %85 = vector.load %arg3[%c0_32, %c0_33] : memref<64x64xf32, #tpu.memory_space<vmem>>, vector<64x64xf32>
    %cst_34 = arith.constant dense<0.000000e+00> : vector<16x64xf32>
    %86 = tpu.matmul %84, %85, %cst_34 {dimension_numbers = #tpu.dot_dimension_numbers<[1], [0], [0], [1], [0, 0, 1, 1], [], []>, precision = #tpu.contract_precision<fp32>} : vector<16x64xf32>, vector<64x64xf32>, vector<16x64xf32> -> vector<16x64xf32>
    %c0_35 = arith.constant 0 : index
    %c0_36 = arith.constant 0 : index
    %87 = vector.load %arg4[%c0_35, %c0_36] : memref<1x64xf32, #tpu.memory_space<vmem>>, vector<1x64xf32>
    %88 = vector.broadcast %87 : vector<1x64xf32> to vector<16x64xf32>
    %89 = arith.addf %86, %88 : vector<16x64xf32>
    %c0_37 = arith.constant 0 : index
    %c0_38 = arith.constant 0 : index
    %c0_39 = arith.constant 0 : index
    %90 = vector.load %arg5[%c0_37, %c0_38, %c0_39] : memref<1x16x64xf32, #tpu.memory_space<vmem>>, vector<1x16x64xf32>
    %91 = vector.shape_cast %90 : vector<1x16x64xf32> to vector<16x64xf32>
    %92 = arith.addf %89, %91 : vector<16x64xf32>
    %c0_40 = arith.constant 0 : index
    %c0_41 = arith.constant 0 : index
    %c0_42 = arith.constant 0 : index
    %93 = vector.load %arg6[%c0_40, %c0_41, %c0_42] : memref<1x16x64xf32, #tpu.memory_space<vmem>>, vector<1x16x64xf32>
    %94 = vector.shape_cast %93 : vector<1x16x64xf32> to vector<16x64xf32>
    %95 = vector.shape_cast %92 : vector<16x64xf32> to vector<1x16x64xf32>
    tpu.vector_store %arg6[%c0_40, %c0_41, %c0_42], %95 {strides = array<i32>} : memref<1x16x64xf32, #tpu.memory_space<vmem>>, vector<1x16x64xf32>,
    return
  }
  func.func @transform_0(%arg0: i32) -> (i32, i32, i32) {
    %c0_i32 = arith.constant 0 : i32
    %c0_i32_0 = arith.constant 0 : i32
    %c0_i32_1 = arith.constant 0 : i32
    return %arg0, %c0_i32, %c0_i32_0 : i32, i32, i32
  }
  func.func @transform_1(%arg0: i32) -> (i32, i32, i32, i32) {
    %c0_i32 = arith.constant 0 : i32
    %c0_i32_0 = arith.constant 0 : i32
    %c0_i32_1 = arith.constant 0 : i32
    %c0_i32_2 = arith.constant 0 : i32
    return %arg0, %c0_i32, %c0_i32_0, %c0_i32_1 : i32, i32, i32, i32
  }
  func.func @transform_2(%arg0: i32) -> (i32, i32) {
    %c0_i32 = arith.constant 0 : i32
    %c0_i32_0 = arith.constant 0 : i32
    %c0_i32_1 = arith.constant 0 : i32
    return %c0_i32, %c0_i32_0 : i32, i32
  }
  func.func @transform_3(%arg0: i32) -> (i32, i32) {
    %c0_i32 = arith.constant 0 : i32
    %c0_i32_0 = arith.constant 0 : i32
    %c0_i32_1 = arith.constant 0 : i32
    return %c0_i32, %c0_i32_0 : i32, i32
  }
  func.func @transform_4(%arg0: i32) -> (i32, i32, i32) {
    %c0_i32 = arith.constant 0 : i32
    %c0_i32_0 = arith.constant 0 : i32
    %c0_i32_1 = arith.constant 0 : i32
    return %arg0, %c0_i32, %c0_i32_0 : i32, i32, i32
  }
  func.func @transform_5(%arg0: i32) -> (i32, i32, i32) {
    %c0_i32 = arith.constant 0 : i32
    %c0_i32_0 = arith.constant 0 : i32
    %c0_i32_1 = arith.constant 0 : i32
    return %arg0, %c0_i32, %c0_i32_0 : i32, i32, i32
  }
}

</mosaic_0001>

<bundles_post_ra>
// kernel: encoder_block_forward.3
= control target key start
LH: loop header
LB: loop body
LE: loop exit
PB: predicated region body
PF: predicated region fallthrough
CT: control target
= control target key end

     0   :  { %12 = vsyncpa [#allocation5], 0  ;;  %s1168_s18 = smov [#allocation4]   ;;  %s1549_s0 = inlined_call_operand.<no memory space> [shape: f32[1], index: 0, kind: input, shape index: {}]   ;;  %s1550_s1 = inlined_call_operand.<no memory space> [shape: f32[1], index: 1, kind: input, shape index: {}]   ;;  %s1551_s2 = inlined_call_operand.vmem [shape: f32[32,64], index: 2, kind: input, shape index: {}]   ;;  %s1552_s3 = inlined_call_operand.hbm [shape: f32[64,192], index: 3, kind: input, shape index: {}]   ;;  %s1553_s4 = inlined_call_operand.vmem [shape: f32[1,192], index: 4, kind: input, shape index: {}]   ;;  %s1554_s5 = inlined_call_operand.vmem [shape: f32[32,192], index: 5, kind: output, shape index: {}]  }
   0x1   :  { %s24_s19 = sshll.u32 %s1168_s18, 4  ;;  %s1144_s22 = scalar_lea.hbm %s1552_s3, 2048  ;;  %s25_s19 = int_to_ptr.vmem [resolvable:$true] %s24_s19 }
   0x2   :  { %p1145_p0 = scmp.ne.s32.totalorder %s1552_s3, %s1144_s22  ;;  %p1148_p1 = scmp.lt.u32.totalorder %s1144_s22, %s1552_s3 }
   0x4   :  { %p1150_p2 = pnand %p1148_p1, %p1145_p0 }
   0x6   :  { %1153 = shalt.err (!%p1150_p2)
}
   0x7   :  { %s1154_s27 = scalar_lea.vmem %s25_s19, 2048  ;;  %p1159_p4 = scmp.lt.s32.totalorder %s25_s19, %s25_s19 }
   0x8   :  { %p1155_p3 = scmp.ne.s32.totalorder %s25_s19, %s1154_s27  ;;  %p1160_p5 = scmp.lt.s32.totalorder %s1154_s27, %s1154_s27 }
   0xa   :  { %p1161_p6 = por %p1160_p5, %p1159_p4 }
   0xc   :  { %p1162_p7 = pnand %p1161_p6, %p1155_p3 }
   0xe   :  { %1165 = shalt.err (!%p1162_p7)
}
   0xf   :  { %s1169_s28 = smov 256   ;;  %s1170_s29 = smov 16  }
  0x10   :  { %30 = dma.hbm_to_vmem [thread:$0]  %s1552_s3, 2048, %s25_s19, [#allocation5], %s1169_s28, %s1169_s28, %s1170_s29  }
  0x11   :  { %1166 = dma.done.wait [#allocation5], 2048  }
  0x12   :  { %1167 = vsyncadd [#allocation5], 4294965248  ;;  %vm42_vm0 = vcmask 523264   ;;  %v36_v0 = vld [vmem:[%s1551_s2] sm:$0xff]  ;;  %v38_v1 = vld [vmem:[%s1551_s2 + $0x10] sm:$0xff] }
  0x13   :  { %v37_v2 = vld [vmem:[%s1551_s2 + $0x8] sm:$0xff]  ;;  %v43_v3 = vsel %vm42_vm0, %v36_v0, 0.0  ;;  %v49_v4 = vsel %vm42_vm0, %v38_v1, 0.0  ;;  %v39_v5 = vld [vmem:[%s1551_s2 + $0x18] sm:$0xff]  ;;  %v133_v32 = vld [vmem:[#allocation4] sm:$0xff] }
  0x14   :  { %44 = vadd.xlane.f32.xlu0 %v43_v3  ;;  %50 = vadd.xlane.f32.xlu1 %v49_v4  ;;  %v46_v6 = vsel %vm42_vm0, %v37_v2, 0.0  ;;  %v52_v7 = vsel %vm42_vm0, %v39_v5, 0.0  ;;  %v134_v28 = vld [vmem:[#allocation4 + $0x8] sm:$0xff]  ;;  %v136_v29 = vld [vmem:[#allocation4 + $0x18] sm:$0xff]  ;;  %v135_v33 = vld [vmem:[#allocation4 + $0x10] sm:$0xff]  ;;  %v175_v34 = vand.u32 4294901760, %v133_v32 }
  0x15   :  { %v173_v30 = vand.u32 4294901760, %v134_v28  ;;  %v177_v31 = vand.u32 4294901760, %v136_v29  ;;  %v179_v35 = vand.u32 4294901760, %v135_v33  ;;  %v138_v38 = vld [vmem:[#allocation4 + $0x28] sm:$0xff]  ;;  %v140_v39 = vld [vmem:[#allocation4 + $0x38] sm:$0xff]  ;;  %v137_v42 = vld [vmem:[#allocation4 + $0x20] sm:$0xff] }
  0x16   :  { %v181_v40 = vand.u32 4294901760, %v138_v38  ;;  %v185_v41 = vand.u32 4294901760, %v140_v39  ;;  %v139_v43 = vld [vmem:[#allocation4 + $0x30] sm:$0xff]  ;;  %v1256_v44 = vsub.f32 %v133_v32, %v175_v34  ;;  %v142_v46 = vld [vmem:[#allocation4 + $0x48] sm:$0xff]  ;;  %v144_v47 = vld [vmem:[#allocation4 + $0x58] sm:$0xff]  ;;  %v183_v52 = vand.u32 4294901760, %v137_v42 }
  0x17   :  { %v1250_v36 = vpack.c.bf16 %v177_v31, %v173_v30  ;;  %v1252_v37 = vpack.c.bf16 %v179_v35, %v175_v34  ;;  %v1258_v45 = vsub.f32 %v135_v33, %v179_v35  ;;  %v141_v48 = vld [vmem:[#allocation4 + $0x40] sm:$0xff]  ;;  %v143_v53 = vld [vmem:[#allocation4 + $0x50] sm:$0xff]  ;;  %v146_v54 = vld [vmem:[#allocation4 + $0x68] sm:$0xff]  ;;  %v187_v56 = vand.u32 4294901760, %v139_v43 }
  0x18   :  { %47 = vadd.xlane.f32.xlu0 %v46_v6  ;;  %53 = vadd.xlane.f32.xlu1 %v52_v7  ;;  %v1262_v49 = vpack.c.bf16 %v185_v41, %v181_v40  ;;  %v1264_v50 = vsub.f32 %v138_v38, %v181_v40  ;;  %v1266_v51 = vsub.f32 %v140_v39, %v185_v41  ;;  %v148_v55 = vld [vmem:[#allocation4 + $0x78] sm:$0xff]  ;;  %v189_v57 = vand.u32 4294901760, %v142_v46 }
  0x19   :  { %1029 = vmatprep.subr.bf16.mxu0 %v1250_v36  ;;  %981 = vmatprep.subr.bf16.mxu1 %v1250_v36  ;;  %v193_v58 = vand.u32 4294901760, %v144_v47  ;;  %v191_v59 = vand.u32 4294901760, %v141_v48  ;;  %v1269_v60 = vsub.f32 %v137_v42, %v183_v52  ;;  %v195_v61 = vand.u32 4294901760, %v143_v53 }
  0x1a   :  { %1031 = vmatpush1.bf16.msra.mxu0 %v1252_v37  ;;  %983 = vmatpush1.bf16.msra.mxu1 %v1252_v37  ;;  %v197_v62 = vand.u32 4294901760, %v146_v54  ;;  %v201_v63 = vand.u32 4294901760, %v148_v55  ;;  %v1278_v4 = vsub.f32 %v142_v46, %v189_v57  ;;  %v1280_v6 = vsub.f32 %v134_v28, %v173_v30 }
  0x1b   :  { %1033 = vmatprep.subr.bf16.mxu0 %v1262_v49  ;;  %985 = vmatprep.subr.bf16.mxu1 %v1262_v49  ;;  %v1276_v3 = vpack.c.bf16 %v193_v58, %v189_v57  ;;  %v1282_v7 = vsub.f32 %v144_v47, %v193_v58  ;;  %v318_v28 = vand.u32 4294901760, %v1258_v45  ;;  %v324_v39 = vand.u32 4294901760, %v1264_v50 }
  0x1c   :  { %v336_v40 = vand.u32 4294901760, %v1266_v51 }
  0x1d   :  { %v319_v34 = vsub.f32 %v1258_v45, %v318_v28 }
  0x1f   :  { %v320_v42 = vand.u32 4294901760, %v319_v34 }
  0xa1   :  { %v45_v8 = vpop.xlane.xlu0 %44  ;;  %v51_v9 = vpop.xlane.xlu1 %50 }
  0xa2   :  { %v55_v10 = vmul.f32 0.015625, %v45_v8  ;;  %v57_v11 = vmul.f32 0.015625, %v51_v9  ;;  %v1284_v8 = vsub.f32 %v141_v48, %v191_v59  ;;  %v1286_v9 = vsub.f32 %v143_v53, %v195_v61 }
  0xa3   :  { %v1330_v48 = vpack.c.bf16 %v336_v40, %v324_v39  ;;  %v337_v53 = vsub.f32 %v1266_v51, %v336_v40 }
  0xa4   :  { %v1230_v12 = vsub.f32 %v36_v0, %v55_v10  ;;  %v1232_v13 = vsub.f32 %v38_v1, %v57_v11  ;;  %v145_v0 = vld [vmem:[#allocation4 + $0x60] sm:$0xff]  ;;  %v1272_v1 = vpack.c.bf16 %v187_v56, %v183_v52  ;;  %v1290_v10 = vpack.c.bf16 %v195_v61, %v191_v59 }
  0xa5   :  { %v48_v14 = vpop.xlane.xlu0 %47  ;;  %v54_v15 = vpop.xlane.xlu1 %53  ;;  %v1292_v11 = vsub.f32 %v146_v54, %v197_v62  ;;  %v325_v52 = vsub.f32 %v1264_v50, %v324_v39  ;;  %v338_v59 = vand.u32 4294901760, %v337_v53  ;;  %v348_v61 = vand.u32 4294901760, %v1278_v4 }
  0xa6   :  { %v56_v16 = vmul.f32 0.015625, %v48_v14  ;;  %v58_v17 = vmul.f32 0.015625, %v54_v15  ;;  %v63_v18 = vmul.f32 %v1230_v12, %v1230_v12  ;;  %v65_v19 = vmul.f32 %v1232_v13, %v1232_v13  ;;  %1035 = vmatpush1.bf16.msra.mxu0 %v1272_v1  ;;  %987 = vmatpush1.bf16.msra.mxu1 %v1272_v1 }
  0xa7   :  { %v1294_v14 = vsub.f32 %v148_v55, %v201_v63  ;;  %v199_v15 = vand.u32 4294901760, %v145_v0  ;;  %1037 = vmatprep.subr.bf16.mxu0 %v1276_v3  ;;  %989 = vmatprep.subr.bf16.mxu1 %v1276_v3  ;;  %v326_v58 = vand.u32 4294901760, %v325_v52 }
  0xa8   :  { %v1238_v20 = vsub.f32 %v37_v2, %v56_v16  ;;  %v1240_v21 = vsub.f32 %v39_v5, %v58_v17  ;;  %v67_v22 = vsel %vm42_vm0, %v63_v18, 0.0  ;;  %v73_v25 = vsel %vm42_vm0, %v65_v19, 0.0  ;;  %v147_v5 = vld [vmem:[#allocation4 + $0x70] sm:$0xff] }
  0xa9   :  { %68 = vadd.xlane.f32.xlu0 %v67_v22  ;;  %v1274_v2 = vsub.f32 %v139_v43, %v187_v56  ;;  %v1296_v16 = vsub.f32 %v136_v29, %v177_v31  ;;  %v1300_v17 = vpack.c.bf16 %v201_v63, %v197_v62  ;;  %v203_v18 = vand.u32 4294901760, %v147_v5 }
  0xaa   :  { %v64_v23 = vmul.f32 %v1238_v20, %v1238_v20  ;;  %v66_v24 = vmul.f32 %v1240_v21, %v1240_v21  ;;  %v1302_v19 = vsub.f32 %v145_v0, %v199_v15  ;;  %v1171_v22 = vmov 0.0   ;;  %1039 = vmatpush1.bf16.msra.mxu0 %v1290_v10  ;;  %991 = vmatpush1.bf16.msra.mxu1 %v1290_v10 }
  0xab   :  { %680 = vmatprep.mubr.f32.mxu0 %v1171_v22  ;;  %253 = vmatprep.mubr.f32.mxu1 %v1171_v22  ;;  %v330_v43 = vand.u32 4294901760, %v1269_v60  ;;  %v342_v46 = vand.u32 4294901760, %v1274_v2  ;;  %v360_v62 = vand.u32 4294901760, %v1282_v7 }
  0xac   :  { %v70_v26 = vsel %vm42_vm0, %v64_v23, 0.0  ;;  %v76_v27 = vsel %vm42_vm0, %v66_v24, 0.0  ;;  %v1306_v23 = vsub.f32 %v147_v5, %v203_v18  ;;  %v1310_v24 = vpack.c.bf16 %v203_v18, %v199_v15  ;;  %1041 = vmatprep.subr.bf16.mxu0 %v1300_v17  ;;  %993 = vmatprep.subr.bf16.mxu1 %v1300_v17 }
  0xad   :  { %71 = vadd.xlane.f32.xlu1 %v70_v26  ;;  %74 = vadd.xlane.f32.xlu0 %v73_v25  ;;  %v300_v25 = vand.u32 4294901760, %v1280_v6  ;;  %v312_v26 = vand.u32 4294901760, %v1296_v16  ;;  %v1336_v55 = vpack.c.bf16 %v342_v46, %v330_v43  ;;  %v331_v56 = vsub.f32 %v1269_v60, %v330_v43 }
  0xae   :  { %1043 = vmatpush1.bf16.msra.mxu0 %v1310_v24  ;;  %995 = vmatpush1.bf16.msra.mxu1 %v1310_v24  ;;  %v343_v57 = vsub.f32 %v1274_v2, %v342_v46  ;;  %v354_v5 = vand.u32 4294901760, %v1284_v8  ;;  %v366_v15 = vand.u32 4294901760, %v1286_v9  ;;  %v1344_v18 = vpack.c.bf16 %v338_v59, %v326_v58 }
  0xaf   :  { %v1044_v29 = vpack.c.bf16 %v312_v26, %v300_v25  ;;  %v301_v30 = vsub.f32 %v1280_v6, %v300_v25  ;;  %v313_v31 = vsub.f32 %v1296_v16, %v312_v26  ;;  %v332_v63 = vand.u32 4294901760, %v331_v56 }
  0xb0   :  { %v344_v0 = vand.u32 4294901760, %v343_v57  ;;  %v1346_v25 = vpack.c.bf16 %v360_v62, %v348_v61  ;;  %v349_v26 = vsub.f32 %v1278_v4, %v348_v61 }
  0xb1   :  { %77 = vadd.xlane.f32.xlu1 %v76_v27  ;;  %v306_v27 = vand.u32 4294901760, %v1256_v44  ;;  %1045 = vmatprep.subr.bf16.mxu0 %v1044_v29  ;;  %v302_v35 = vand.u32 4294901760, %v301_v30  ;;  %v314_v38 = vand.u32 4294901760, %v313_v31  ;;  %v1352_v29 = vpack.c.bf16 %v366_v15, %v354_v5 }
  0xb2   :  { %v355_v30 = vsub.f32 %v1284_v8, %v354_v5  ;;  %v367_v31 = vsub.f32 %v1286_v9, %v366_v15 }
  0xb3   :  { %v1322_v32 = vpack.c.bf16 %v318_v28, %v306_v27  ;;  %v307_v33 = vsub.f32 %v1256_v44, %v306_v27  ;;  %v996_v47 = vpack.c.bf16 %v314_v38, %v302_v35  ;;  %v361_v27 = vsub.f32 %v1282_v7, %v360_v62 }
  0xb4   :  { %v1350_v28 = vpack.c.bf16 %v344_v0, %v332_v63  ;;  %v372_v35 = vand.u32 4294901760, %v1292_v11  ;;  %v384_v38 = vand.u32 4294901760, %v1294_v14  ;;  %v356_v39 = vand.u32 4294901760, %v355_v30 }
  0xb5   :  { %v308_v41 = vand.u32 4294901760, %v307_v33  ;;  %997 = vmatprep.subr.bf16.mxu1 %v996_v47  ;;  %v350_v33 = vand.u32 4294901760, %v349_v26  ;;  %v362_v34 = vand.u32 4294901760, %v361_v27  ;;  %v368_v40 = vand.u32 4294901760, %v367_v31 }
  0xb6   :  { %v1362_v46 = vpack.c.bf16 %v384_v38, %v372_v35  ;;  %v373_v47 = vsub.f32 %v1292_v11, %v372_v35  ;;  %v385_v52 = vsub.f32 %v1294_v14, %v384_v38 }
  0xb7   :  { %v1334_v54 = vpack.c.bf16 %v320_v42, %v308_v41  ;;  %v378_v41 = vand.u32 4294901760, %v1302_v19  ;;  %v390_v42 = vand.u32 4294901760, %v1306_v23  ;;  %v1360_v43 = vpack.c.bf16 %v362_v34, %v350_v33 }
  0xb8   :  { %v1366_v53 = vpack.c.bf16 %v368_v40, %v356_v39  ;;  %v374_v59 = vand.u32 4294901760, %v373_v47  ;;  %v386_v61 = vand.u32 4294901760, %v385_v52 }
  0xb9   :  { %v1368_v56 = vpack.c.bf16 %v390_v42, %v378_v41  ;;  %v379_v57 = vsub.f32 %v1302_v19, %v378_v41  ;;  %v391_v58 = vsub.f32 %v1306_v23, %v390_v42 }
  0xba   :  { %v1372_v0 = vpack.c.bf16 %v386_v61, %v374_v59 }
  0xbb   :  { %v380_v62 = vand.u32 4294901760, %v379_v57  ;;  %v392_v63 = vand.u32 4294901760, %v391_v58 }
  0xbd   :  { %v1374_v5 = vpack.c.bf16 %v392_v63, %v380_v62 }
 0x136   :  { %v69_v38 = vpop.xlane.xlu0 %68 }
 0x137   :  { %v79_v39 = vmul.f32 0.015873017, %v69_v38 }
 0x139   :  { %1128 = vrsqrt.f32 %v79_v39  ;;  %vm85_vm1 = vcmp.eq.f32.partialorder %v79_v39, inf  ;;  %v88_v61 = vand.u32 2147483648, %v79_v39  ;;  %vm87_vm2 = vcmp.eq.f32.partialorder %v79_v39, 0.0 }
 0x13a   :  { %v72_v40 = vpop.xlane.xlu1 %71  ;;  %v75_v42 = vpop.xlane.xlu0 %74 }
 0x13b   :  { %v80_v41 = vmul.f32 0.015873017, %v72_v40  ;;  %v81_v47 = vmul.f32 0.015873017, %v75_v42 }
 0x13d   :  { %1130 = vrsqrt.f32 %v80_v41  ;;  %vm92_vm3 = vcmp.eq.f32.partialorder %v80_v41, inf  ;;  %v95_v40 = vand.u32 2147483648, %v80_v41  ;;  %vm94_vm4 = vcmp.eq.f32.partialorder %v80_v41, 0.0 }
 0x13e   :  { %1132 = vrsqrt.f32 %v81_v47  ;;  %v78_v52 = vpop.xlane.xlu1 %77  ;;  %vm99_vm5 = vcmp.eq.f32.partialorder %v81_v47, inf  ;;  %v102_v30 = vand.u32 2147483648, %v81_v47  ;;  %vm101_vm6 = vcmp.eq.f32.partialorder %v81_v47, 0.0 }
 0x13f   :  { %v82_v57 = vmul.f32 0.015873017, %v78_v52 }
 0x141   :  { %1134 = vrsqrt.f32 %v82_v57  ;;  %vm106_vm7 = vcmp.eq.f32.partialorder %v82_v57, inf  ;;  %vm108_vm8 = vcmp.eq.f32.partialorder %v82_v57, 0.0 }
 0x143   :  { %v1129_v58 = vpop.eup %1128 }
 0x144   :  { %v84_v59 = vmul.f32 %v1129_v58, %v79_v39 }
 0x146   :  { %v86_v63 = vsel %vm85_vm1, %v79_v39, %v84_v59 }
 0x147   :  { %v1131_v62 = vpop.eup %1130  ;;  %v89_v34 = vsel %vm87_vm2, %v88_v61, %v86_v63  ;;  %v109_v61 = vand.u32 2147483648, %v82_v57 }
 0x148   :  { %v1133_v35 = vpop.eup %1132  ;;  %v91_v38 = vmul.f32 %v1131_v62, %v80_v41  ;;  %v116_v33 = vadd.f32 1e-06, %v89_v34 }
 0x149   :  { %v98_v31 = vmul.f32 %v1133_v35, %v81_v47 }
 0x14a   :  { %v93_v42 = vsel %vm92_vm3, %v80_v41, %v91_v38  ;;  %1136 = vrcp.f32 %v116_v33  ;;  %v111_v41 = vstv %s1549_s0 }
 0x14b   :  { %v1135_v52 = vpop.eup %1134  ;;  %v96_v27 = vsel %vm94_vm4, %v95_v40, %v93_v42  ;;  %v100_v58 = vsel %vm99_vm5, %v81_v47, %v98_v31  ;;  %v112_v31 = vmul.f32 %v111_v41, %v1230_v12  ;;  %v114_v47 = vmul.f32 %v111_v41, %v1232_v13 }
 0x14c   :  { %v117_v26 = vadd.f32 1e-06, %v96_v27  ;;  %v103_v15 = vsel %vm101_vm6, %v102_v30, %v100_v58  ;;  %v105_v59 = vmul.f32 %v1135_v52, %v82_v57  ;;  %v115_v52 = vmul.f32 %v111_v41, %v1240_v21 }
 0x14d   :  { %v118_v39 = vadd.f32 1e-06, %v103_v15  ;;  %v128_v15 = vstv %s1550_s1 }
 0x14e   :  { %1138 = vrcp.f32 %v117_v26  ;;  %v107_v34 = vsel %vm106_vm7, %v82_v57, %v105_v59  ;;  %v113_v26 = vmul.f32 %v111_v41, %v1238_v20 }
 0x14f   :  { %1140 = vrcp.f32 %v118_v39  ;;  %v110_v35 = vsel %vm108_vm8, %v109_v61, %v107_v34 }
 0x150   :  { %v119_v62 = vadd.f32 1e-06, %v110_v35 }
 0x152   :  { %1142 = vrcp.f32 %v119_v62 }
 0x154   :  { %v1137_v33 = vpop.eup %1136 }
 0x155   :  { %v121_v27 = vmul.f32 %v1137_v33, %v112_v31 }
 0x157   :  { %v129_v57 = vadd.f32 %v128_v15, %v121_v27 }
 0x158   :  { %v1139_v30 = vpop.eup %1138 }
 0x159   :  { %v1141_v63 = vpop.eup %1140  ;;  %v123_v38 = vmul.f32 %v1139_v30, %v113_v26  ;;  %v162_v40 = vsel %vm42_vm0, %v129_v57, 0 }
 0x15a   :  { %v125_v42 = vmul.f32 %v1141_v63, %v114_v47  ;;  %v1403_v12 = vand.u32 4294901760, %v162_v40 }
 0x15b   :  { %v130_v58 = vadd.f32 %v128_v15, %v123_v38 }
 0x15c   :  { %v1143_v59 = vpop.eup %1142  ;;  %v131_v39 = vadd.f32 %v128_v15, %v125_v42  ;;  %v1406_v61 = vsub.f32 %v162_v40, %v1403_v12 }
 0x15d   :  { %v165_v20 = vsel %vm42_vm0, %v130_v58, 0  ;;  %v127_v34 = vmul.f32 %v1143_v59, %v115_v52 }
 0x15e   :  { %v1409_v13 = vand.u32 4294901760, %v165_v20  ;;  %v168_v35 = vsel %vm42_vm0, %v131_v39, 0  ;;  %v256_v62 = vand.u32 4294901760, %v1406_v61 }
 0x15f   :  { %v1413_v31 = vand.u32 4294901760, %v168_v35  ;;  %v132_v21 = vadd.f32 %v128_v15, %v127_v34 }
 0x160   :  { %v1416_v41 = vsub.f32 %v165_v20, %v1409_v13  ;;  %684 = vmatmul.mubr.f32.vlgmr.msra.gmra.mrb[0].mxu0 %v256_v62  ;;  %v257_v33 = vsub.f32 %v1406_v61, %v256_v62 }
 0x161   :  { %v1420_v27 = vsub.f32 %v168_v35, %v1413_v31  ;;  %v171_v26 = vsel %vm42_vm0, %v132_v21, 0  ;;  %1047 = vmatpush1.bf16.msra.mxu0 %v1322_v32  ;;  %689 = vmatprep.mubr.f32.mxu0 %v1171_v22 }
 0x162   :  { %v267_v30 = vand.u32 4294901760, %v1416_v41  ;;  %v1426_v47 = vand.u32 4294901760, %v171_v26  ;;  %v258_v15 = vand.u32 4294901760, %v257_v33  ;;  %1049 = vmatprep.subr.bf16.mxu0 %v1330_v48 }
 0x163   :  { %v278_v57 = vand.u32 4294901760, %v1420_v27 }
 0x164   :  { %v268_v63 = vsub.f32 %v1416_v41, %v267_v30  ;;  %v1432_v38 = vsub.f32 %v171_v26, %v1426_v47  ;;  %259 = vmatmul.mubr.f32.vlgmr.msra.gmra.mrb[0].mxu1 %v258_v15  ;;  %693 = vmatmul.mubr.f32.gmra.mrb[2].mxu0 %v267_v30 }
 0x165   :  { %999 = vmatpush1.bf16.msra.mxu1 %v1334_v54  ;;  %1051 = vmatpush1.bf16.msra.mxu0 %v1336_v55  ;;  %v279_v48 = vsub.f32 %v1420_v27, %v278_v57 }
 0x166   :  { %v269_v32 = vand.u32 4294901760, %v268_v63  ;;  %264 = vmatprep.mubr.f32.mxu1 %v1171_v22  ;;  %1001 = vmatprep.subr.bf16.mxu1 %v1344_v18  ;;  %v289_v40 = vand.u32 4294901760, %v1432_v38 }
 0x167   :  { %698 = vmatprep.mubr.f32.mxu0 %v1171_v22  ;;  %1053 = vmatprep.subr.bf16.mxu0 %v1346_v25  ;;  %v280_v54 = vand.u32 4294901760, %v279_v48  ;;  %v1555_v25 = vpack.c.bf16 %v1296_v16, %v1280_v6 }
 0x168   :  { %270 = vmatmul.mubr.f32.gmra.mrb[2].mxu1 %v269_v32  ;;  %702 = vmatmul.mubr.f32.gmra.mrb[4].mxu0 %v278_v57  ;;  %v290_v55 = vsub.f32 %v1432_v38, %v289_v40 }
 0x169   :  { %1003 = vmatpush1.bf16.msra.mxu1 %v1350_v28  ;;  %1055 = vmatpush1.bf16.msra.mxu0 %v1352_v29 }
 0x16a   :  { %275 = vmatprep.mubr.f32.mxu1 %v1171_v22  ;;  %1005 = vmatprep.subr.bf16.mxu1 %v1360_v43  ;;  %v291_v18 = vand.u32 4294901760, %v290_v55 }
 0x16b   :  { %707 = vmatprep.mubr.f32.mxu0 %v1171_v22  ;;  %1057 = vmatprep.subr.bf16.mxu0 %v1362_v46 }
 0x16c   :  { %281 = vmatmul.mubr.f32.gmra.mrb[4].mxu1 %v280_v54  ;;  %711 = vmatmul.mubr.f32.gmra.mrb[6].mxu0 %v289_v40 }
 0x16d   :  { %1007 = vmatpush1.bf16.msra.mxu1 %v1366_v53  ;;  %1059 = vmatpush1.bf16.msra.mxu0 %v1368_v56 }
 0x16e   :  { %286 = vmatprep.mubr.f32.mxu1 %v1171_v22  ;;  %1009 = vmatprep.subr.bf16.mxu1 %v1372_v0 }
 0x16f   :  { %829 = vmatprep.mubr.f32.mxu0 %v1171_v22  ;;  %1061 = vmatprep.subr.bf16.mxu0 %v1250_v36  ;;  %v1556_v36 = vpack.c.bf16 %v1258_v45, %v1256_v44  ;;  %v1558_v44 = vpack.c.bf16 %v1274_v2, %v1269_v60  ;;  %v1559_v45 = vpack.c.bf16 %v1282_v7, %v1278_v4  ;;  %v151_v60 = vlaneseq }
 0x170   :  { %292 = vmatmul.mubr.f32.gmra.mrb[6].mxu1 %v291_v18  ;;  %831 = vmatmul.mubr.f32.vlgmr.msra.gmra.mrb[0].mxu0 %v1403_v12 }
 0x171   :  { %1011 = vmatpush1.bf16.msra.mxu1 %v1374_v5  ;;  %1063 = vmatpush1.bf16.msra.mxu0 %v1252_v37  ;;  %v1557_v37 = vpack.c.bf16 %v1266_v51, %v1264_v50  ;;  %v1561_v50 = vpack.c.bf16 %v1294_v14, %v1292_v11  ;;  %v1562_v51 = vpack.c.bf16 %v1306_v23, %v1302_v19 }
 0x172   :  { %442 = vmatprep.mubr.f32.mxu1 %v1171_v22  ;;  %1013 = vmatprep.subr.bf16.mxu1 %v1555_v25 }
 0x173   :  { %836 = vmatprep.mubr.f32.mxu0 %v1171_v22  ;;  %1065 = vmatprep.subr.bf16.mxu0 %v1262_v49  ;;  %v1560_v49 = vpack.c.bf16 %v1286_v9, %v1284_v8 }
 0x174   :  { %444 = vmatmul.mubr.f32.vlgmr.msra.gmra.mrb[0].mxu1 %v1403_v12  ;;  %838 = vmatmul.mubr.f32.gmra.mrb[2].mxu0 %v1409_v13 }
 0x175   :  { %1015 = vmatpush1.bf16.msra.mxu1 %v1556_v36  ;;  %1067 = vmatpush1.bf16.msra.mxu0 %v1272_v1  ;;  %v152_v1 = vshrl.u32 %v151_v60, 7 }
 0x176   :  { %449 = vmatprep.mubr.f32.mxu1 %v1171_v22  ;;  %1017 = vmatprep.subr.bf16.mxu1 %v1557_v37 }
 0x177   :  { %843 = vmatprep.mubr.f32.mxu0 %v1171_v22  ;;  %1069 = vmatprep.subr.bf16.mxu0 %v1276_v3  ;;  %v153_v2 = vsub.s32 0, %v152_v1  ;;  %v149_v3 = vld [vmem:[%s1553_s4] sm:$0x3]  ;;  %v157_v4 = vsub.s32 1, %v152_v1 }
 0x178   :  { %451 = vmatmul.mubr.f32.gmra.mrb[2].mxu1 %v1409_v13  ;;  %845 = vmatmul.mubr.f32.gmra.mrb[4].mxu0 %v1413_v31 }
 0x179   :  { %1019 = vmatpush1.bf16.msra.mxu1 %v1558_v44  ;;  %1071 = vmatpush1.bf16.msra.mxu0 %v1290_v10  ;;  %v154_v8 = vrot.slane %v149_v3, %v153_v2  ;;  %v158_v9 = vrot.slane %v149_v3, %v157_v4 }
 0x17a   :  { %456 = vmatprep.mubr.f32.mxu1 %v1171_v22  ;;  %1021 = vmatprep.subr.bf16.mxu1 %v1559_v45 }
 0x17b   :  { %850 = vmatprep.mubr.f32.mxu0 %v1171_v22  ;;  %1073 = vmatprep.subr.bf16.mxu0 %v1300_v17 }
 0x17c   :  { %458 = vmatmul.mubr.f32.gmra.mrb[4].mxu1 %v1413_v31  ;;  %852 = vmatmul.mubr.f32.gmra.mrb[6].mxu0 %v1426_v47 }
 0x17d   :  { %1023 = vmatpush1.bf16.msra.mxu1 %v1560_v49  ;;  %1075 = vmatpush1.bf16.msra.mxu0 %v1310_v24 }
 0x17e   :  { %463 = vmatprep.mubr.f32.mxu1 %v1171_v22  ;;  %1025 = vmatprep.subr.bf16.mxu1 %v1561_v50 }
 0x17f   :  { %938 = vmatprep.mubr.f32.mxu0 %v1171_v22 }
 0x180   :  { %465 = vmatmul.mubr.f32.gmra.mrb[6].mxu1 %v1426_v47  ;;  %940 = vmatmul.mubr.f32.vlgmr.msra.gmra.mrb[0].mxu0 %v1403_v12 }
 0x181   :  { %1027 = vmatpush1.bf16.msra.mxu1 %v1562_v51  ;;  %567 = vmatprep.mubr.f32.mxu1 %v1171_v22 }
 0x182   :  { %945 = vmatprep.mubr.f32.mxu0 %v1171_v22 }
 0x184   :  { %570 = vmatmul.mubr.f32.vlgmr.msra.gmra.mrb[0].mxu1 %v1406_v61  ;;  %947 = vmatmul.mubr.f32.gmra.mrb[2].mxu0 %v1409_v13 }
 0x185   :  { %575 = vmatprep.mubr.f32.mxu1 %v1171_v22  ;;  %952 = vmatprep.mubr.f32.mxu0 %v1171_v22 }
 0x188   :  { %578 = vmatmul.mubr.f32.gmra.mrb[2].mxu1 %v1416_v41  ;;  %954 = vmatmul.mubr.f32.gmra.mrb[4].mxu0 %v1413_v31 }
 0x189   :  { %583 = vmatprep.mubr.f32.mxu1 %v1171_v22  ;;  %959 = vmatprep.mubr.f32.mxu0 %v1171_v22 }
 0x18c   :  { %586 = vmatmul.mubr.f32.gmra.mrb[4].mxu1 %v1420_v27  ;;  %961 = vmatmul.mubr.f32.gmra.mrb[6].mxu0 %v1426_v47 }
 0x18d   :  { %591 = vmatprep.mubr.f32.mxu1 %v1171_v22 }
 0x190   :  { %594 = vmatmul.mubr.f32.gmra.mrb[6].mxu1 %v1432_v38 }
 0x253   :  { %v941_v6 = vpop.f32.mrb[0].mxu0 }
 0x254   :  { %v943_v7 = vpop.f32.mrb[1].mxu0 }
 0x257   :  { %v571_v10 = vpop.f32.mrb[0].mxu1  ;;  %v948_v11 = vpop.f32.mrb[2].mxu0 }
 0x258   :  { %v1076_v14 = vadd.f32 %v571_v10, %v154_v8  ;;  %v573_v16 = vpop.f32.mrb[1].mxu1  ;;  %v950_v17 = vpop.f32.mrb[3].mxu0 }
 0x259   :  { %v1078_v19 = vadd.f32 %v573_v16, %v158_v9 }
 0x25a   :  { %v1077_v22 = vadd.f32 %v1076_v14, %v941_v6 }
 0x25b   :  { %v1079_v23 = vadd.f32 %v1078_v19, %v943_v7  ;;  %v579_v24 = vpop.f32.mrb[2].mxu1  ;;  %v955_v28 = vpop.f32.mrb[4].mxu0 }
 0x25c   :  { %967 = vst [vmem:[%s1554_s5] sm:$0xff] %v1077_v22  ;;  %v1080_v29 = vadd.f32 %v579_v24, %v154_v8  ;;  %v581_v43 = vpop.f32.mrb[3].mxu1  ;;  %v957_v46 = vpop.f32.mrb[5].mxu0 }
 0x25d   :  { %968 = vst.msk [vmem:[%s1554_s5 + $0x8] sm:$0xff] %vm42_vm0, %v1079_v23  ;;  %v1082_v53 = vadd.f32 %v581_v43, %v158_v9 }
 0x25e   :  { %v1081_v56 = vadd.f32 %v1080_v29, %v948_v11 }
 0x25f   :  { %v1083_v0 = vadd.f32 %v1082_v53, %v950_v17  ;;  %v587_v5 = vpop.f32.mrb[4].mxu1  ;;  %v962_v42 = vpop.f32.mrb[6].mxu0 }
 0x260   :  { %969 = vst [vmem:[%s1554_s5 + $0x10] sm:$0xff] %v1081_v56  ;;  %v1084_v52 = vadd.f32 %v587_v5, %v154_v8  ;;  %v589_v12 = vpop.f32.mrb[5].mxu1  ;;  %v964_v58 = vpop.f32.mrb[7].mxu0 }
 0x261   :  { %970 = vst.msk [vmem:[%s1554_s5 + $0x18] sm:$0xff] %vm42_vm0, %v1083_v0  ;;  %v1086_v59 = vadd.f32 %v589_v12, %v158_v9 }
 0x262   :  { %v1085_v39 = vadd.f32 %v1084_v52, %v955_v28 }
 0x263   :  { %v1087_v61 = vadd.f32 %v1086_v59, %v957_v46  ;;  %v595_v20 = vpop.f32.mrb[6].mxu1 }
 0x264   :  { %971 = vst [vmem:[%s1554_s5 + $0x20] sm:$0xff] %v1085_v39  ;;  %v1088_v34 = vadd.f32 %v595_v20, %v154_v8  ;;  %v597_v13 = vpop.f32.mrb[7].mxu1 }
 0x265   :  { %972 = vst.msk [vmem:[%s1554_s5 + $0x28] sm:$0xff] %vm42_vm0, %v1087_v61  ;;  %v1090_v35 = vadd.f32 %v597_v13, %v158_v9 }
 0x266   :  { %v1089_v62 = vadd.f32 %v1088_v34, %v962_v42 }
 0x267   :  { %v1091_v31 = vadd.f32 %v1090_v35, %v964_v58 }
 0x268   :  { %973 = vst [vmem:[%s1554_s5 + $0x30] sm:$0xff] %v1089_v62 }
 0x269   :  { %974 = vst.msk [vmem:[%s1554_s5 + $0x38] sm:$0xff] %vm42_vm0, %v1091_v31 }
 0x26a   :  { %979 = vsyncpa [#allocation5], 1 }

// kernel: encoder_block_forward.5
= control target key start
LH: loop header
LB: loop body
LE: loop exit
PB: predicated region body
PF: predicated region fallthrough
CT: control target
= control target key end

     0   :  { %vm35_vm0 = vcmask 523264   ;;  %s3244_s0 = inlined_call_operand.<no memory space> [shape: f32[1], index: 0, kind: input, shape index: {}]   ;;  %s3245_s1 = inlined_call_operand.<no memory space> [shape: f32[1], index: 1, kind: input, shape index: {}]   ;;  %s3246_s2 = inlined_call_operand.vmem [shape: f32[32,64], index: 2, kind: input, shape index: {}]   ;;  %s3247_s3 = inlined_call_operand.vmem [shape: f32[64,128], index: 3, kind: input, shape index: {}]   ;;  %s3248_s4 = inlined_call_operand.vmem [shape: f32[1,128], index: 4, kind: input, shape index: {}]   ;;  %s3249_s5 = inlined_call_operand.vmem [shape: f32[128,64], index: 5, kind: input, shape index: {}]   ;;  %s3250_s6 = inlined_call_operand.vmem [shape: f32[1,64], index: 6, kind: input, shape index: {}]   ;;  %s3251_s7 = inlined_call_operand.hbm [shape: f32[32,64], index: 7, kind: output, shape index: {}]  }
   0x1   :  { %v29_v0 = vld [vmem:[%s3246_s2] sm:$0xff]  ;;  %v31_v1 = vld [vmem:[%s3246_s2 + $0x10] sm:$0xff]  ;;  %v30_v2 = vld [vmem:[%s3246_s2 + $0x8] sm:$0xff] }
   0x2   :  { %v36_v3 = vsel %vm35_vm0, %v29_v0, 0.0  ;;  %v42_v4 = vsel %vm35_vm0, %v31_v1, 0.0  ;;  %v32_v5 = vld [vmem:[%s3246_s2 + $0x18] sm:$0xff] }
   0x3   :  { %14 = vsyncpa [#allocation5], 0  ;;  %37 = vadd.xlane.f32.xlu0 %v36_v3  ;;  %43 = vadd.xlane.f32.xlu1 %v42_v4  ;;  %v39_v6 = vsel %vm35_vm0, %v30_v2, 0.0  ;;  %v45_v7 = vsel %vm35_vm0, %v32_v5, 0.0  ;;  %v126_v28 = vld [vmem:[%s3247_s3] sm:$0xff]  ;;  %v127_v29 = vld [vmem:[%s3247_s3 + $0x8] sm:$0xff] }
   0x4   :  { %v128_v30 = vld [vmem:[%s3247_s3 + $0x10] sm:$0xff]  ;;  %v154_v31 = vand.u32 4294901760, %v126_v28  ;;  %v157_v32 = vand.u32 4294901760, %v127_v29  ;;  %v129_v33 = vld [vmem:[%s3247_s3 + $0x18] sm:$0xff]  ;;  %v130_v35 = vld [vmem:[%s3247_s3 + $0x20] sm:$0xff] }
   0x5   :  { %v160_v34 = vand.u32 4294901760, %v128_v30  ;;  %v131_v36 = vld [vmem:[%s3247_s3 + $0x28] sm:$0xff]  ;;  %v163_v37 = vand.u32 4294901760, %v129_v33  ;;  %v166_v39 = vand.u32 4294901760, %v130_v35  ;;  %v132_v42 = vld [vmem:[%s3247_s3 + $0x30] sm:$0xff]  ;;  %v133_v43 = vld [vmem:[%s3247_s3 + $0x38] sm:$0xff] }
   0x6   :  { %v2690_v38 = vpack.c.bf16 %v157_v32, %v154_v31  ;;  %v169_v40 = vand.u32 4294901760, %v131_v36  ;;  %v172_v45 = vand.u32 4294901760, %v132_v42  ;;  %v175_v46 = vand.u32 4294901760, %v133_v43 }
   0x7   :  { %40 = vadd.xlane.f32.xlu0 %v39_v6  ;;  %46 = vadd.xlane.f32.xlu1 %v45_v7  ;;  %v2692_v41 = vpack.c.bf16 %v163_v37, %v160_v34  ;;  %v268_v48 = vsub.f32 %v126_v28, %v154_v31  ;;  %v275_v49 = vsub.f32 %v127_v29, %v157_v32 }
   0x8   :  { %2195 = vmatprep.subr.bf16.mxu0 %v2690_v38  ;;  %v2703_v44 = vpack.c.bf16 %v169_v40, %v166_v39  ;;  %v2707_v47 = vpack.c.bf16 %v175_v46, %v172_v45  ;;  %v282_v54 = vsub.f32 %v128_v30, %v160_v34  ;;  %v289_v55 = vsub.f32 %v129_v33, %v163_v37 }
   0x9   :  { %2197 = vmatpush3.bf16.msra.mxu0 %v2690_v38  ;;  %v269_v50 = vand.u32 4294901760, %v268_v48  ;;  %v276_v51 = vand.u32 4294901760, %v275_v49  ;;  %v296_v63 = vsub.f32 %v130_v35, %v166_v39  ;;  %v310_v7 = vsub.f32 %v132_v42, %v172_v45  ;;  %v823_v39 = vld [vmem:[%s3249_s5] sm:$0xff]  ;;  %v825_v42 = vld [vmem:[%s3249_s5 + $0x10] sm:$0xff] }
   0xa   :  { %2199 = vmatprep.subr.bf16.mxu0 %v2692_v41  ;;  %v283_v58 = vand.u32 4294901760, %v282_v54  ;;  %v290_v59 = vand.u32 4294901760, %v289_v55  ;;  %v827_v45 = vld [vmem:[%s3249_s5 + $0x20] sm:$0xff] }
   0xb   :  { %v270_v52 = vsub.f32 %v268_v48, %v269_v50  ;;  %v277_v53 = vsub.f32 %v275_v49, %v276_v51  ;;  %v297_v3 = vand.u32 4294901760, %v296_v63  ;;  %v2729_v28 = vpack.c.bf16 %v276_v51, %v269_v50  ;;  %v2774_v51 = vld [vmem:[%s3249_s5 + $0x30] sm:$0xff] }
   0xc   :  { %v284_v61 = vsub.f32 %v282_v54, %v283_v58  ;;  %v291_v62 = vsub.f32 %v289_v55, %v290_v59  ;;  %v2731_v29 = vpack.c.bf16 %v290_v59, %v283_v58  ;;  %v859_v58 = vand.u32 4294901760, %v827_v45 }
   0xd   :  { %2201 = vmatpush3.bf16.msra.mxu0 %v2692_v41  ;;  %v271_v56 = vand.u32 4294901760, %v270_v52  ;;  %v278_v57 = vand.u32 4294901760, %v277_v53  ;;  %v298_v6 = vsub.f32 %v296_v63, %v297_v3  ;;  %v847_v53 = vand.u32 4294901760, %v823_v39 }
   0xe   :  { %2203 = vmatprep.subr.bf16.mxu0 %v2703_v44 }
   0xf   :  { %v2712_v60 = vpack.c.bf16 %v278_v57, %v271_v56 }
  0x11   :  { %2205 = vmatpush3.bf16.msra.mxu0 %v2703_v44 }
  0x12   :  { %2207 = vmatprep.subr.bf16.mxu0 %v2707_v47 }
  0x15   :  { %2209 = vmatpush3.bf16.msra.mxu0 %v2707_v47 }
  0x16   :  { %2211 = vmatprep.subr.bf16.mxu0 %v2712_v60 }
  0x90   :  { %v38_v8 = vpop.xlane.xlu0 %37  ;;  %v44_v9 = vpop.xlane.xlu1 %43 }
  0x91   :  { %v48_v10 = vmul.f32 0.015625, %v38_v8  ;;  %v50_v11 = vmul.f32 0.015625, %v44_v9  ;;  %v317_v8 = vsub.f32 %v133_v43, %v175_v46  ;;  %v826_v43 = vld [vmem:[%s3249_s5 + $0x18] sm:$0xff]  ;;  %v828_v46 = vld [vmem:[%s3249_s5 + $0x28] sm:$0xff] }
  0x92   :  { %v856_v57 = vand.u32 4294901760, %v826_v43  ;;  %v862_v59 = vand.u32 4294901760, %v828_v46 }
  0x93   :  { %v2652_v12 = vsub.f32 %v29_v0, %v48_v10  ;;  %v2654_v13 = vsub.f32 %v31_v1, %v50_v11  ;;  %v303_v0 = vsub.f32 %v131_v36, %v169_v40  ;;  %v285_v1 = vand.u32 4294901760, %v284_v61  ;;  %v824_v40 = vld [vmem:[%s3249_s5 + $0x8] sm:$0xff] }
  0x94   :  { %v41_v14 = vpop.xlane.xlu0 %40  ;;  %v47_v15 = vpop.xlane.xlu1 %46  ;;  %v299_v10 = vand.u32 4294901760, %v298_v6  ;;  %v311_v11 = vand.u32 4294901760, %v310_v7 }
  0x95   :  { %v49_v16 = vmul.f32 0.015625, %v41_v14  ;;  %v51_v17 = vmul.f32 0.015625, %v47_v15  ;;  %v56_v18 = vmul.f32 %v2652_v12, %v2652_v12  ;;  %v58_v19 = vmul.f32 %v2654_v13, %v2654_v13 }
  0x96   :  { %v304_v4 = vand.u32 4294901760, %v303_v0  ;;  %v318_v14 = vand.u32 4294901760, %v317_v8 }
  0x97   :  { %v2660_v20 = vsub.f32 %v30_v2, %v49_v16  ;;  %v2662_v21 = vsub.f32 %v32_v5, %v51_v17  ;;  %v60_v22 = vsel %vm35_vm0, %v56_v18, 0.0  ;;  %v66_v25 = vsel %vm35_vm0, %v58_v19, 0.0 }
  0x98   :  { %61 = vadd.xlane.f32.xlu0 %v60_v22  ;;  %v292_v2 = vand.u32 4294901760, %v291_v62  ;;  %v305_v9 = vsub.f32 %v303_v0, %v304_v4  ;;  %v312_v16 = vsub.f32 %v310_v7, %v311_v11  ;;  %v319_v17 = vsub.f32 %v317_v8, %v318_v14 }
  0x99   :  { %v57_v23 = vmul.f32 %v2660_v20, %v2660_v20  ;;  %v59_v24 = vmul.f32 %v2662_v21, %v2662_v21  ;;  %v2733_v30 = vpack.c.bf16 %v304_v4, %v297_v3  ;;  %v2735_v31 = vpack.c.bf16 %v318_v14, %v311_v11 }
  0x9a   :  { %v2715_v5 = vpack.c.bf16 %v292_v2, %v285_v1  ;;  %v306_v15 = vand.u32 4294901760, %v305_v9  ;;  %v313_v19 = vand.u32 4294901760, %v312_v16  ;;  %v320_v22 = vand.u32 4294901760, %v319_v17 }
  0x9b   :  { %v63_v26 = vsel %vm35_vm0, %v57_v23, 0.0  ;;  %v69_v27 = vsel %vm35_vm0, %v59_v24, 0.0  ;;  %v2721_v24 = vpack.c.bf16 %v275_v49, %v268_v48  ;;  %v2766_v48 = vstv %s3244_s0 }
  0x9c   :  { %64 = vadd.xlane.f32.xlu1 %v63_v26  ;;  %67 = vadd.xlane.f32.xlu0 %v66_v25  ;;  %v2717_v18 = vpack.c.bf16 %v306_v15, %v299_v10  ;;  %v2719_v23 = vpack.c.bf16 %v320_v22, %v313_v19  ;;  %v2723_v25 = vpack.c.bf16 %v289_v55, %v282_v54  ;;  %v850_v54 = vand.u32 4294901760, %v824_v40 }
  0x9d   :  { %v2725_v26 = vpack.c.bf16 %v303_v0, %v296_v63  ;;  %v853_v55 = vand.u32 4294901760, %v825_v42  ;;  %v830_v63 = vld [vmem:[%s3249_s5 + $0x38] sm:$0xff]  ;;  %v865_v0 = vand.u32 4294901760, %v2774_v51  ;;  %v2792_v2 = vsub.f32 %v823_v39, %v847_v53 }
  0x9e   :  { %v2790_v1 = vpack.c.bf16 %v850_v54, %v847_v53  ;;  %v2794_v3 = vsub.f32 %v824_v40, %v850_v54  ;;  %v2805_v9 = vsub.f32 %v827_v45, %v859_v58  ;;  %v2809_v15 = vsub.f32 %v828_v46, %v862_v59 }
  0x9f   :  { %v2796_v4 = vpack.c.bf16 %v856_v57, %v853_v55  ;;  %v2799_v6 = vsub.f32 %v825_v42, %v853_v55  ;;  %v3255_v11 = vand.u32 4294901760, %v2792_v2  ;;  %v868_v16 = vand.u32 4294901760, %v830_v63 }
  0xa0   :  { %70 = vadd.xlane.f32.xlu1 %v69_v27  ;;  %v2727_v27 = vpack.c.bf16 %v317_v8, %v310_v7  ;;  %v2801_v7 = vsub.f32 %v826_v43, %v856_v57  ;;  %v2803_v8 = vpack.c.bf16 %v862_v59, %v859_v58  ;;  %v3254_v14 = vand.u32 4294901760, %v2794_v3 }
  0xa1   :  { %v3252_v19 = vand.u32 4294901760, %v2799_v6  ;;  %v1005_v39 = vand.u32 4294901760, %v2809_v15  ;;  %v2824_v40 = vpack.c.bf16 %v868_v16, %v865_v0 }
  0xa2   :  { %v3253_v22 = vand.u32 4294901760, %v2801_v7 }
  0xa3   :  { %v985_v45 = vsub.f32 %v2799_v6, %v3252_v19 }
  0xa4   :  { %v992_v46 = vsub.f32 %v2801_v7, %v3253_v22 }
  0xa6   :  { %v993_v19 = vand.u32 4294901760, %v992_v46 }
 0x125   :  { %v62_v32 = vpop.xlane.xlu0 %61 }
 0x126   :  { %v2737_v33 = vmul.f32 0.015873017, %v62_v32  ;;  %v998_v32 = vand.u32 4294901760, %v2805_v9 }
 0x128   :  { %2549 = vrsqrt.f32 %v2737_v33  ;;  %vm78_vm1 = vcmp.eq.f32.partialorder %v2737_v33, inf  ;;  %v81_v49 = vand.u32 2147483648, %v2737_v33  ;;  %vm80_vm2 = vcmp.eq.f32.partialorder %v2737_v33, 0.0 }
 0x129   :  { %v65_v34 = vpop.xlane.xlu1 %64  ;;  %v68_v36 = vpop.xlane.xlu0 %67 }
 0x12a   :  { %v2740_v35 = vmul.f32 0.015873017, %v65_v34  ;;  %v2742_v37 = vmul.f32 0.015873017, %v68_v36  ;;  %v971_v34 = vsub.f32 %v2792_v2, %v3255_v11  ;;  %v978_v36 = vsub.f32 %v2794_v3, %v3254_v14 }
 0x12c   :  { %2551 = vrsqrt.f32 %v2740_v35  ;;  %v88_v56 = vand.u32 2147483648, %v2740_v35  ;;  %vm85_vm3 = vcmp.eq.f32.partialorder %v2740_v35, inf  ;;  %v95_v61 = vand.u32 2147483648, %v2742_v37 }
 0x12d   :  { %2553 = vrsqrt.f32 %v2742_v37  ;;  %v71_v50 = vpop.xlane.xlu1 %70  ;;  %vm87_vm4 = vcmp.eq.f32.partialorder %v2740_v35, 0.0  ;;  %vm92_vm5 = vcmp.eq.f32.partialorder %v2742_v37, inf  ;;  %vm94_vm6 = vcmp.eq.f32.partialorder %v2742_v37, 0.0 }
 0x12e   :  { %v2777_v52 = vmul.f32 0.015873017, %v71_v50  ;;  %v999_v50 = vsub.f32 %v2805_v9, %v998_v32  ;;  %v972_v57 = vand.u32 4294901760, %v971_v34  ;;  %v979_v58 = vand.u32 4294901760, %v978_v36 }
 0x130   :  { %2555 = vrsqrt.f32 %v2777_v52  ;;  %v102_v62 = vand.u32 2147483648, %v2777_v52  ;;  %vm99_vm7 = vcmp.eq.f32.partialorder %v2777_v52, inf  ;;  %vm101_vm8 = vcmp.eq.f32.partialorder %v2777_v52, 0.0 }
 0x131   :  { %v2322_v14 = vpack.c.bf16 %v979_v58, %v972_v57  ;;  %v1000_v11 = vand.u32 4294901760, %v999_v50  ;;  %v833_v57 = vld [vmem:[%s3249_s5 + $0x50] sm:$0xff] }
 0x132   :  { %v2550_v10 = vpop.eup %2549 }
 0x133   :  { %v77_v17 = vmul.f32 %v2550_v10, %v2737_v33  ;;  %2323 = vmatprep.subr.bf16.mxu1 %v2322_v14 }
 0x134   :  { %2325 = vmatpush3.bf16.msra.mxu1 %v2322_v14 }
 0x135   :  { %v79_v43 = vsel %vm78_vm1, %v2737_v33, %v77_v17  ;;  %v986_v17 = vand.u32 4294901760, %v985_v45  ;;  %v1006_v33 = vsub.f32 %v2809_v15, %v1005_v39  ;;  %v832_v45 = vld [vmem:[%s3249_s5 + $0x48] sm:$0xff] }
 0x136   :  { %v2552_v42 = vpop.eup %2551  ;;  %v82_v54 = vsel %vm80_vm2, %v81_v49, %v79_v43  ;;  %v831_v49 = vld [vmem:[%s3249_s5 + $0x40] sm:$0xff] }
 0x137   :  { %v2554_v53 = vpop.eup %2553  ;;  %v84_v55 = vmul.f32 %v2552_v42, %v2740_v35  ;;  %v109_v59 = vadd.f32 1e-06, %v82_v54  ;;  %v2326_v43 = vpack.c.bf16 %v993_v19, %v986_v17  ;;  %v1007_v54 = vand.u32 4294901760, %v1006_v33 }
 0x138   :  { %v91_v10 = vmul.f32 %v2554_v53, %v2742_v37  ;;  %v871_v19 = vand.u32 4294901760, %v831_v49 }
 0x139   :  { %v86_v22 = vsel %vm85_vm3, %v2740_v35, %v84_v55  ;;  %2557 = vrcp.f32 %v109_v59  ;;  %2327 = vmatprep.subr.bf16.mxu1 %v2326_v43 }
 0x13a   :  { %v2556_v34 = vpop.eup %2555  ;;  %v89_v36 = vsel %vm87_vm4, %v88_v56, %v86_v22  ;;  %v93_v42 = vsel %vm92_vm5, %v2742_v37, %v91_v10  ;;  %v2863_v56 = vsub.f32 %v2774_v51, %v865_v0  ;;  %v2865_v22 = vsub.f32 %v830_v63, %v868_v16  ;;  %v834_v51 = vld [vmem:[%s3249_s5 + $0x58] sm:$0xff]  ;;  %2329 = vmatpush3.bf16.msra.mxu1 %v2326_v43 }
 0x13b   :  { %v110_v46 = vadd.f32 1e-06, %v89_v36  ;;  %v96_v50 = vsel %vm94_vm6, %v95_v61, %v93_v42  ;;  %v98_v53 = vmul.f32 %v2556_v34, %v2777_v52  ;;  %v2330_v37 = vpack.c.bf16 %v1007_v54, %v1000_v11 }
 0x13c   :  { %v111_v35 = vadd.f32 1e-06, %v96_v50  ;;  %v874_v61 = vand.u32 4294901760, %v832_v45  ;;  %v1012_v0 = vand.u32 4294901760, %v2863_v56  ;;  %v1019_v14 = vand.u32 4294901760, %v2865_v22 }
 0x13d   :  { %2559 = vrcp.f32 %v110_v46  ;;  %v100_v55 = vsel %vm99_vm7, %v2777_v52, %v98_v53  ;;  %v2884_v58 = vsub.f32 %v831_v49, %v871_v19  ;;  %v880_v17 = vand.u32 4294901760, %v834_v51  ;;  %2331 = vmatprep.subr.bf16.mxu1 %v2330_v37 }
 0x13e   :  { %2561 = vrcp.f32 %v111_v35  ;;  %v103_v63 = vsel %vm101_vm8, %v102_v62, %v100_v55  ;;  %v2882_v16 = vpack.c.bf16 %v874_v61, %v871_v19  ;;  %v2886_v59 = vsub.f32 %v832_v45, %v874_v61  ;;  %2333 = vmatpush3.bf16.msra.mxu1 %v2330_v37 }
 0x13f   :  { %v112_v11 = vadd.f32 1e-06, %v103_v63  ;;  %v1013_v10 = vsub.f32 %v2863_v56, %v1012_v0  ;;  %v1020_v52 = vsub.f32 %v2865_v22, %v1019_v14  ;;  %v877_v62 = vand.u32 4294901760, %v833_v57 }
 0x140   :  { %v1026_v33 = vand.u32 4294901760, %v2884_v58  ;;  %v1033_v49 = vand.u32 4294901760, %v2886_v59  ;;  %v105_v45 = vmul.f32 %v2766_v48, %v2652_v12  ;;  %v2908_v53 = vsub.f32 %v834_v51, %v880_v17 }
 0x141   :  { %2563 = vrcp.f32 %v112_v11  ;;  %v1014_v34 = vand.u32 4294901760, %v1013_v10  ;;  %v1021_v36 = vand.u32 4294901760, %v1020_v52  ;;  %v2896_v42 = vpack.c.bf16 %v880_v17, %v877_v62 }
 0x142   :  { %v2898_v43 = vsub.f32 %v833_v57, %v877_v62  ;;  %v1027_v46 = vsub.f32 %v2884_v58, %v1026_v33  ;;  %v1034_v50 = vsub.f32 %v2886_v59, %v1033_v49  ;;  %v121_v35 = vstv %s3245_s1 }
 0x143   :  { %v2558_v54 = vpop.eup %2557  ;;  %v2334_v19 = vpack.c.bf16 %v1021_v36, %v1014_v34  ;;  %v3257_v63 = vand.u32 4294901760, %v2908_v53  ;;  %v106_v11 = vmul.f32 %v2766_v48, %v2660_v20  ;;  %v107_v37 = vmul.f32 %v2766_v48, %v2654_v13 }
 0x144   :  { %v3256_v55 = vand.u32 4294901760, %v2898_v43  ;;  %v114_v12 = vmul.f32 %v2558_v54, %v105_v45  ;;  %v1028_v61 = vand.u32 4294901760, %v1027_v46  ;;  %v1035_v57 = vand.u32 4294901760, %v1034_v50 }
 0x145   :  { %2335 = vmatprep.subr.bf16.mxu1 %v2334_v19  ;;  %v1048_v17 = vsub.f32 %v2908_v53, %v3257_v63  ;;  %v108_v54 = vmul.f32 %v2766_v48, %v2662_v21 }
 0x146   :  { %v1041_v51 = vsub.f32 %v2898_v43, %v3256_v55  ;;  %v122_v52 = vadd.f32 %v121_v35, %v114_v12  ;;  %v2338_v62 = vpack.c.bf16 %v1035_v57, %v1028_v61  ;;  %2337 = vmatpush3.bf16.msra.mxu1 %v2334_v19 }
 0x147   :  { %v2560_v10 = vpop.eup %2559  ;;  %v1049_v50 = vand.u32 4294901760, %v1048_v17 }
 0x148   :  { %v2562_v34 = vpop.eup %2561  ;;  %v116_v36 = vmul.f32 %v2560_v10, %v106_v11  ;;  %v1042_v45 = vand.u32 4294901760, %v1041_v51  ;;  %v142_v20 = vsel %vm35_vm0, %v122_v52, 0  ;;  %2339 = vmatprep.subr.bf16.mxu1 %v2338_v62 }
 0x149   :  { %v118_v46 = vmul.f32 %v2562_v34, %v107_v37  ;;  %v2928_v55 = vand.u32 4294901760, %v142_v20 }
 0x14a   :  { %v123_v13 = vadd.f32 %v121_v35, %v116_v36  ;;  %v2342_v57 = vpack.c.bf16 %v1049_v50, %v1042_v45  ;;  %2341 = vmatpush3.bf16.msra.mxu1 %v2338_v62 }
 0x14b   :  { %v2564_v12 = vpop.eup %2563  ;;  %v124_v61 = vadd.f32 %v121_v35, %v118_v46  ;;  %v227_v63 = vsub.f32 %v142_v20, %v2928_v55 }
 0x14c   :  { %v145_v11 = vsel %vm35_vm0, %v123_v13, 0  ;;  %v120_v19 = vmul.f32 %v2564_v12, %v108_v54  ;;  %2343 = vmatprep.subr.bf16.mxu1 %v2342_v57 }
 0x14d   :  { %v2932_v51 = vand.u32 4294901760, %v145_v11  ;;  %v148_v10 = vsel %vm35_vm0, %v124_v61, 0  ;;  %v228_v37 = vand.u32 4294901760, %v227_v63 }
 0x14e   :  { %v2935_v52 = vand.u32 4294901760, %v148_v10  ;;  %v125_v21 = vadd.f32 %v121_v35, %v120_v19  ;;  %2345 = vmatpush3.bf16.msra.mxu1 %v2342_v57 }
 0x14f   :  { %v237_v48 = vsub.f32 %v145_v11, %v2932_v51  ;;  %v229_v17 = vsub.f32 %v227_v63, %v228_v37 }
 0x150   :  { %v247_v34 = vsub.f32 %v148_v10, %v2935_v52  ;;  %v151_v36 = vsel %vm35_vm0, %v125_v21, 0 }
 0x151   :  { %v238_v45 = vand.u32 4294901760, %v237_v48  ;;  %v2940_v20 = vand.u32 4294901760, %v151_v36  ;;  %v230_v62 = vand.u32 4294901760, %v229_v17 }
 0x152   :  { %v248_v46 = vand.u32 4294901760, %v247_v34 }
 0x153   :  { %v239_v50 = vsub.f32 %v237_v48, %v238_v45  ;;  %v257_v54 = vsub.f32 %v151_v36, %v2940_v20  ;;  %1850 = vmatprep.mubr.f32.mxu0 %v230_v62  ;;  %v2354_v36 = vpack.c.bf16 %v2794_v3, %v2792_v2 }
 0x154   :  { %v249_v13 = vsub.f32 %v247_v34, %v248_v46 }
 0x155   :  { %v240_v12 = vand.u32 4294901760, %v239_v50  ;;  %v258_v35 = vand.u32 4294901760, %v257_v54 }
 0x156   :  { %v250_v61 = vand.u32 4294901760, %v249_v13 }
 0x157   :  { %1851 = vmatmul.mubr.f32.vlgmr.msra.gmra.mrb[0].mxu0 %v240_v12  ;;  %v259_v11 = vsub.f32 %v257_v54, %v258_v35 }
 0x158   :  { %2213 = vmatpush3.bf16.msra.mxu0 %v2712_v60  ;;  %1853 = vmatprep.mubr.f32.mxu0 %v250_v61 }
 0x159   :  { %2215 = vmatprep.subr.bf16.mxu0 %v2715_v5  ;;  %v260_v57 = vand.u32 4294901760, %v259_v11 }
 0x15b   :  { %1854 = vmatmul.mubr.f32.gmra.mrb[2].mxu0 %v260_v57 }
 0x15c   :  { %2217 = vmatpush3.bf16.msra.mxu0 %v2715_v5  ;;  %1872 = vmatprep.mubr.f32.mxu0 %v2928_v55 }
 0x15d   :  { %2219 = vmatprep.subr.bf16.mxu0 %v2717_v18 }
 0x160   :  { %2221 = vmatpush3.bf16.msra.mxu0 %v2717_v18  ;;  %v837_v18 = vld [vmem:[%s3249_s5 + $0x70] sm:$0xff] }
 0x161   :  { %2223 = vmatprep.subr.bf16.mxu0 %v2719_v23 }
 0x164   :  { %2225 = vmatpush3.bf16.msra.mxu0 %v2719_v23  ;;  %v838_v23 = vld [vmem:[%s3249_s5 + $0x78] sm:$0xff] }
 0x165   :  { %2227 = vmatprep.subr.bf16.mxu0 %v2721_v24 }
 0x167   :  { %1873 = vmatmul.mubr.f32.vlgmr.msra.gmra.mrb[0].mxu0 %v2932_v51 }
 0x168   :  { %1875 = vmatprep.mubr.f32.mxu0 %v2935_v52  ;;  %2229 = vmatpush3.bf16.msra.mxu0 %v2721_v24 }
 0x169   :  { %2231 = vmatprep.subr.bf16.mxu0 %v2723_v25 }
 0x16b   :  { %1876 = vmatmul.mubr.f32.gmra.mrb[2].mxu0 %v2940_v20 }
 0x16c   :  { %2233 = vmatpush3.bf16.msra.mxu0 %v2723_v25  ;;  %1894 = vmatprep.mubr.f32.mxu0 %v227_v63 }
 0x16d   :  { %2235 = vmatprep.subr.bf16.mxu0 %v2725_v26 }
 0x170   :  { %2237 = vmatpush3.bf16.msra.mxu0 %v2725_v26  ;;  %v889_v26 = vand.u32 4294901760, %v837_v18 }
 0x171   :  { %2239 = vmatprep.subr.bf16.mxu0 %v2727_v27 }
 0x174   :  { %2241 = vmatpush3.bf16.msra.mxu0 %v2727_v27  ;;  %v892_v27 = vand.u32 4294901760, %v838_v23 }
 0x175   :  { %2243 = vmatprep.subr.bf16.mxu0 %v2690_v38 }
 0x177   :  { %1895 = vmatmul.mubr.f32.vlgmr.msra.gmra.mrb[0].mxu0 %v237_v48 }
 0x178   :  { %1897 = vmatprep.mubr.f32.mxu0 %v247_v34  ;;  %2245 = vmatpush3.bf16.msra.mxu0 %v2690_v38 }
 0x179   :  { %2247 = vmatprep.subr.bf16.mxu0 %v2692_v41 }
 0x17b   :  { %1898 = vmatmul.mubr.f32.gmra.mrb[2].mxu0 %v257_v54 }
 0x17c   :  { %2249 = vmatpush3.bf16.msra.mxu0 %v2692_v41  ;;  %1916 = vmatprep.mubr.f32.mxu0 %v228_v37 }
 0x17d   :  { %2251 = vmatprep.subr.bf16.mxu0 %v2703_v44 }
 0x180   :  { %2253 = vmatpush3.bf16.msra.mxu0 %v2703_v44 }
 0x181   :  { %2255 = vmatprep.subr.bf16.mxu0 %v2707_v47 }
 0x184   :  { %2257 = vmatpush3.bf16.msra.mxu0 %v2707_v47 }
 0x185   :  { %2259 = vmatprep.subr.bf16.mxu0 %v2729_v28 }
 0x187   :  { %1917 = vmatmul.mubr.f32.vlgmr.msra.gmra.mrb[0].mxu0 %v238_v45  ;;  %v3048_v45 = vpack.c.bf16 %v892_v27, %v889_v26 }
 0x188   :  { %1919 = vmatprep.mubr.f32.mxu0 %v248_v46  ;;  %2261 = vmatpush3.bf16.msra.mxu0 %v2729_v28  ;;  %v1640_v46 = vld [vmem:[%s3248_s4] ss:$0 sm:$0xff] }
 0x189   :  { %2263 = vmatprep.subr.bf16.mxu0 %v2731_v29 }
 0x18b   :  { %1920 = vmatmul.mubr.f32.gmra.mrb[2].mxu0 %v258_v35 }
 0x18c   :  { %2265 = vmatpush3.bf16.msra.mxu0 %v2731_v29  ;;  %1938 = vmatprep.mubr.f32.mxu0 %v2928_v55 }
 0x18d   :  { %2267 = vmatprep.subr.bf16.mxu0 %v2733_v30 }
 0x190   :  { %2269 = vmatpush3.bf16.msra.mxu0 %v2733_v30  ;;  %v3030_v30 = vsub.f32 %v837_v18, %v889_v26  ;;  %v2358_v26 = vpack.c.bf16 %v2801_v7, %v2799_v6 }
 0x191   :  { %2271 = vmatprep.subr.bf16.mxu0 %v2735_v31 }
 0x192   :  { %v1068_v19 = vand.u32 4294901760, %v3030_v30 }
 0x194   :  { %2273 = vmatpush3.bf16.msra.mxu0 %v2735_v31  ;;  %v3032_v31 = vsub.f32 %v838_v23, %v892_v27  ;;  %v1069_v37 = vsub.f32 %v3030_v30, %v1068_v19 }
 0x195   :  { %2275 = vmatprep.subr.bf16.mxu0 %v2690_v38 }
 0x196   :  { %v1070_v21 = vand.u32 4294901760, %v1069_v37  ;;  %v3059_v62 = vpack.c.bf16 %v3032_v31, %v3030_v30 }
 0x197   :  { %1939 = vmatmul.mubr.f32.vlgmr.msra.gmra.mrb[0].mxu0 %v2932_v51 }
 0x198   :  { %1941 = vmatprep.mubr.f32.mxu0 %v2935_v52  ;;  %2277 = vmatpush3.bf16.msra.mxu0 %v2690_v38  ;;  %v835_v38 = vld [vmem:[%s3249_s5 + $0x60] sm:$0xff] }
 0x199   :  { %2279 = vmatprep.subr.bf16.mxu0 %v2692_v41 }
 0x19b   :  { %1942 = vmatmul.mubr.f32.gmra.mrb[2].mxu0 %v2940_v20 }
 0x19c   :  { %2281 = vmatpush3.bf16.msra.mxu0 %v2692_v41  ;;  %1960 = vmatprep.mubr.f32.mxu0 %v2928_v55  ;;  %v836_v41 = vld [vmem:[%s3249_s5 + $0x68] sm:$0xff] }
 0x19d   :  { %2283 = vmatprep.subr.bf16.mxu0 %v2703_v44 }
 0x1a0   :  { %2285 = vmatpush3.bf16.msra.mxu0 %v2703_v44  ;;  %v883_v44 = vand.u32 4294901760, %v835_v38 }
 0x1a1   :  { %2287 = vmatprep.subr.bf16.mxu0 %v2707_v47 }
 0x1a2   :  { %v3012_v60 = vsub.f32 %v835_v38, %v883_v44 }
 0x1a4   :  { %2289 = vmatpush3.bf16.msra.mxu0 %v2707_v47  ;;  %v886_v47 = vand.u32 4294901760, %v836_v41  ;;  %v1054_v24 = vand.u32 4294901760, %v3012_v60 }
 0x1a5   :  { %2291 = vmatprep.subr.bf16.mxu0 %v2790_v1 }
 0x1a6   :  { %v3014_v5 = vsub.f32 %v836_v41, %v886_v47  ;;  %v1055_v28 = vsub.f32 %v3012_v60, %v1054_v24  ;;  %v3042_v34 = vpack.c.bf16 %v886_v47, %v883_v44 }
 0x1a7   :  { %1961 = vmatmul.mubr.f32.vlgmr.msra.gmra.mrb[0].mxu0 %v2932_v51  ;;  %v1075_v51 = vand.u32 4294901760, %v3032_v31 }
 0x1a8   :  { %1963 = vmatprep.mubr.f32.mxu0 %v2935_v52  ;;  %2293 = vmatpush3.bf16.msra.mxu0 %v2790_v1  ;;  %v1061_v25 = vand.u32 4294901760, %v3014_v5  ;;  %v1056_v55 = vand.u32 4294901760, %v1055_v28 }
 0x1a9   :  { %2295 = vmatprep.subr.bf16.mxu0 %v2796_v4  ;;  %v1076_v52 = vsub.f32 %v3032_v31, %v1075_v51 }
 0x1aa   :  { %v1062_v29 = vsub.f32 %v3014_v5, %v1061_v25 }
 0x1ab   :  { %1964 = vmatmul.mubr.f32.gmra.mrb[2].mxu0 %v2940_v20  ;;  %v1077_v48 = vand.u32 4294901760, %v1076_v52  ;;  %v3055_v20 = vpack.c.bf16 %v3014_v5, %v3012_v60  ;;  %v2566_v5 = vld [vmem:[%s3246_s2] sm:$0xff] }
 0x1ac   :  { %2297 = vmatpush3.bf16.msra.mxu0 %v2796_v4  ;;  %v1063_v63 = vand.u32 4294901760, %v1062_v29 }
 0x1ad   :  { %2299 = vmatprep.subr.bf16.mxu0 %v2803_v8  ;;  %v2350_v17 = vpack.c.bf16 %v1077_v48, %v1070_v21  ;;  %v2362_v21 = vpack.c.bf16 %v2809_v15, %v2805_v9  ;;  %v3263_v9 = vand.u32 4294901760, %v2908_v53 }
 0x1ae   :  { %v2346_v10 = vpack.c.bf16 %v1063_v63, %v1056_v55 }
 0x1b0   :  { %2301 = vmatpush3.bf16.msra.mxu0 %v2803_v8  ;;  %2347 = vmatprep.subr.bf16.mxu1 %v2346_v10 }
 0x1b1   :  { %2303 = vmatprep.subr.bf16.mxu0 %v2824_v40  ;;  %2349 = vmatpush3.bf16.msra.mxu1 %v2346_v10 }
 0x1b2   :  { %2351 = vmatprep.subr.bf16.mxu1 %v2350_v17 }
 0x1b4   :  { %2305 = vmatpush3.bf16.msra.mxu0 %v2824_v40 }
 0x1b5   :  { %2307 = vmatprep.subr.bf16.mxu0 %v2882_v16  ;;  %2353 = vmatpush3.bf16.msra.mxu1 %v2350_v17 }
 0x1b6   :  { %2355 = vmatprep.subr.bf16.mxu1 %v2354_v36 }
 0x1b8   :  { %2309 = vmatpush3.bf16.msra.mxu0 %v2882_v16 }
 0x1b9   :  { %2311 = vmatprep.subr.bf16.mxu0 %v2896_v42 }
 0x1bc   :  { %2313 = vmatpush3.bf16.msra.mxu0 %v2896_v42 }
 0x1bd   :  { %2315 = vmatprep.subr.bf16.mxu0 %v3042_v34 }
 0x1c0   :  { %2317 = vmatpush3.bf16.msra.mxu0 %v3042_v34 }
 0x1c1   :  { %2319 = vmatprep.subr.bf16.mxu0 %v3048_v45 }
 0x1c4   :  { %2321 = vmatpush3.bf16.msra.mxu0 %v3048_v45 }
 0x1c5   :  { %2451 = vmatprep.subr.bf16.mxu0 %v2790_v1 }
 0x27a   :  { %v1962_v50 = vpop.f32.mrb[0].mxu0 }
 0x27b   :  { %v2498_v54 = vadd.f32 %v1962_v50, %v1640_v46  ;;  %v797_v13 = vpop.f32.mrb[1].mxu0 }
 0x27c   :  { %v2499_v12 = vadd.f32 %v1640_v46, %v797_v13  ;;  %v2366_v13 = vpack.c.bf16 %v2865_v22, %v2863_v56 }
 0x27d   :  { %v820_v35 = vmax.f32 %v2498_v54, 0.0 }
 0x27e   :  { %v819_v61 = vmax.f32 %v2499_v12, 0.0  ;;  %v1965_v11 = vpop.f32.mrb[2].mxu0 }
 0x27f   :  { %v3064_v57 = vand.u32 4294901760, %v820_v35  ;;  %v2500_v38 = vadd.f32 %v1965_v11, %v1640_v46  ;;  %v809_v41 = vpop.f32.mrb[3].mxu0 }
 0x280   :  { %v3066_v44 = vand.u32 4294901760, %v819_v61  ;;  %v2501_v47 = vadd.f32 %v1640_v46, %v809_v41  ;;  %v2374_v41 = vpack.c.bf16 %v2908_v53, %v2898_v43  ;;  %v2565_v53 = vld [vmem:[%s3246_s2 + $0x8] sm:$0xff] }
 0x281   :  { %v3069_v18 = vsub.f32 %v820_v35, %v3064_v57  ;;  %v822_v23 = vmax.f32 %v2500_v38, 0.0  ;;  %v2370_v38 = vpack.c.bf16 %v2886_v59, %v2884_v58 }
 0x282   :  { %v3074_v27 = vsub.f32 %v819_v61, %v3066_v44  ;;  %v821_v28 = vmax.f32 %v2501_v47, 0.0  ;;  %2036 = vmatprep.mubr.f32.mxu1 %v3066_v44 }
 0x283   :  { %v939_v29 = vand.u32 4294901760, %v3069_v18  ;;  %v3078_v55 = vand.u32 4294901760, %v822_v23  ;;  %2037 = vmatmul.mubr.f32.vlgmr.msra.gmra.mrb[0].mxu1 %v3064_v57 }
 0x284   :  { %v3081_v63 = vand.u32 4294901760, %v821_v28  ;;  %2357 = vmatpush3.bf16.msra.mxu1 %v2354_v36  ;;  %v929_v10 = vand.u32 4294901760, %v3074_v27 }
 0x285   :  { %v940_v37 = vsub.f32 %v3069_v18, %v939_v29  ;;  %v3088_v52 = vsub.f32 %v822_v23, %v3078_v55  ;;  %2359 = vmatprep.subr.bf16.mxu1 %v2358_v26  ;;  %v3260_v23 = vand.u32 4294901760, %v2799_v6  ;;  %v2434_v6 = vpack.c.bf16 %v1033_v49, %v1026_v33 }
 0x286   :  { %v3093_v48 = vsub.f32 %v821_v28, %v3081_v63  ;;  %2039 = vmatprep.mubr.f32.mxu1 %v3081_v63  ;;  %v930_v17 = vsub.f32 %v3074_v27, %v929_v10 }
 0x287   :  { %2040 = vmatmul.mubr.f32.gmra.mrb[2].mxu1 %v3078_v55  ;;  %v959_v36 = vand.u32 4294901760, %v3088_v52  ;;  %v941_v54 = vand.u32 4294901760, %v940_v37 }
 0x288   :  { %2361 = vmatpush3.bf16.msra.mxu1 %v2358_v26  ;;  %2074 = vmatprep.mubr.f32.mxu1 %v3074_v27  ;;  %v931_v46 = vand.u32 4294901760, %v930_v17  ;;  %v949_v50 = vand.u32 4294901760, %v3093_v48  ;;  %v3261_v26 = vand.u32 4294901760, %v2801_v7  ;;  %v3262_v7 = vand.u32 4294901760, %v2898_v43 }
 0x289   :  { %2363 = vmatprep.subr.bf16.mxu1 %v2362_v21  ;;  %v960_v12 = vsub.f32 %v3088_v52, %v959_v36 }
 0x28a   :  { %1998 = vmatprep.mubr.f32.mxu0 %v931_v46  ;;  %v950_v35 = vsub.f32 %v3093_v48, %v949_v50  ;;  %v2422_v27 = vpack.c.bf16 %v3261_v26, %v3260_v23  ;;  %v2438_v15 = vpack.c.bf16 %v3263_v9, %v3262_v7 }
 0x28b   :  { %1999 = vmatmul.mubr.f32.vlgmr.msra.gmra.mrb[4].mxu0 %v941_v54  ;;  %v961_v11 = vand.u32 4294901760, %v960_v12 }
 0x28c   :  { %2365 = vmatpush3.bf16.msra.mxu1 %v2362_v21  ;;  %2453 = vmatpush3.bf16.msra.mxu0 %v2790_v1  ;;  %v951_v61 = vand.u32 4294901760, %v950_v35 }
 0x28d   :  { %2367 = vmatprep.subr.bf16.mxu1 %v2366_v13  ;;  %2455 = vmatprep.subr.bf16.mxu0 %v2796_v4 }
 0x28e   :  { %2001 = vmatprep.mubr.f32.mxu0 %v951_v61 }
 0x28f   :  { %2002 = vmatmul.mubr.f32.gmra.mrb[6].mxu0 %v961_v11 }
 0x290   :  { %2369 = vmatpush3.bf16.msra.mxu1 %v2366_v13  ;;  %2457 = vmatpush3.bf16.msra.mxu0 %v2796_v4 }
 0x291   :  { %2188 = vmatprep.mubr.f32.mxu0 %v3066_v44  ;;  %2371 = vmatprep.subr.bf16.mxu1 %v2370_v38 }
 0x292   :  { %2459 = vmatprep.subr.bf16.mxu0 %v2803_v8 }
 0x294   :  { %2373 = vmatpush3.bf16.msra.mxu1 %v2370_v38  ;;  %2461 = vmatpush3.bf16.msra.mxu0 %v2803_v8 }
 0x295   :  { %2375 = vmatprep.subr.bf16.mxu1 %v2374_v41  ;;  %2463 = vmatprep.subr.bf16.mxu0 %v2824_v40 }
 0x298   :  { %2377 = vmatpush3.bf16.msra.mxu1 %v2374_v41  ;;  %2465 = vmatpush3.bf16.msra.mxu0 %v2824_v40 }
 0x299   :  { %2379 = vmatprep.subr.bf16.mxu1 %v3055_v20  ;;  %2467 = vmatprep.subr.bf16.mxu0 %v2882_v16 }
 0x29c   :  { %2381 = vmatpush3.bf16.msra.mxu1 %v3055_v20  ;;  %2469 = vmatpush3.bf16.msra.mxu0 %v2882_v16  ;;  %v3258_v20 = vand.u32 4294901760, %v2792_v2  ;;  %v2426_v2 = vpack.c.bf16 %v1005_v39, %v998_v32  ;;  %v2442_v32 = vpack.c.bf16 %v1061_v25, %v1054_v24  ;;  %v2446_v39 = vpack.c.bf16 %v1075_v51, %v1068_v19 }
 0x29d   :  { %2383 = vmatprep.subr.bf16.mxu1 %v3059_v62  ;;  %2471 = vmatprep.subr.bf16.mxu0 %v2896_v42 }
 0x2a0   :  { %2385 = vmatpush3.bf16.msra.mxu1 %v3059_v62  ;;  %2473 = vmatpush3.bf16.msra.mxu0 %v2896_v42  ;;  %v3259_v62 = vand.u32 4294901760, %v2794_v3  ;;  %v2430_v3 = vpack.c.bf16 %v1019_v14, %v1012_v0  ;;  %v1641_v0 = vld [vmem:[%s3250_s6] ss:$0 sm:$0xff]  ;;  %s2593_s6 = smov [#allocation4]  }
 0x2a1   :  { %2387 = vmatprep.subr.bf16.mxu1 %v2790_v1  ;;  %2475 = vmatprep.subr.bf16.mxu0 %v3042_v34  ;;  %s1629_s0 = sshll.u32 %s2593_s6, 4  ;;  %s1630_s0 = int_to_ptr.vmem [resolvable:$true] %s1629_s0 }
 0x2a2   :  { %v2418_v47 = vpack.c.bf16 %v3259_v62, %v3258_v20  ;;  %s2569_s21 = scalar_lea.vmem %s1630_s0, 512  ;;  %p2574_p1 = scmp.lt.s32.totalorder %s1630_s0, %s1630_s0 }
 0x2a3   :  { %2075 = vmatmul.mubr.f32.vlgmr.msra.gmra.mrb[0].mxu1 %v3069_v18  ;;  %p2570_p0 = scmp.ne.s32.totalorder %s1630_s0, %s2569_s21  ;;  %p2575_p2 = scmp.lt.s32.totalorder %s2569_s21, %s2569_s21 }
 0x2a4   :  { %2077 = vmatprep.mubr.f32.mxu1 %v3093_v48  ;;  %2389 = vmatpush3.bf16.msra.mxu1 %v2790_v1 }
 0x2a5   :  { %2477 = vmatpush3.bf16.msra.mxu0 %v3042_v34  ;;  %2391 = vmatprep.subr.bf16.mxu1 %v2796_v4  ;;  %p2576_p3 = por %p2575_p2, %p2574_p1 }
 0x2a6   :  { %2479 = vmatprep.subr.bf16.mxu0 %v3048_v45 }
 0x2a7   :  { %2078 = vmatmul.mubr.f32.gmra.mrb[2].mxu1 %v3088_v52  ;;  %p2577_p4 = pnand %p2576_p3, %p2570_p0 }
 0x2a8   :  { %2393 = vmatpush3.bf16.msra.mxu1 %v2796_v4  ;;  %2112 = vmatprep.mubr.f32.mxu1 %v929_v10 }
 0x2a9   :  { %2481 = vmatpush3.bf16.msra.mxu0 %v3048_v45  ;;  %2395 = vmatprep.subr.bf16.mxu1 %v2803_v8 }
 0x2ac   :  { %2189 = vmatmul.mubr.f32.vlgmr.msra.gmra.mrb[8].mxu0 %v3064_v57  ;;  %2397 = vmatpush3.bf16.msra.mxu1 %v2803_v8 }
 0x2ad   :  { %2399 = vmatprep.subr.bf16.mxu1 %v2824_v40 }
 0x2b0   :  { %2401 = vmatpush3.bf16.msra.mxu1 %v2824_v40 }
 0x2b1   :  { %2403 = vmatprep.subr.bf16.mxu1 %v2882_v16 }
 0x2b4   :  { %2405 = vmatpush3.bf16.msra.mxu1 %v2882_v16 }
 0x2b5   :  { %2407 = vmatprep.subr.bf16.mxu1 %v2896_v42 }
 0x2b8   :  { %2409 = vmatpush3.bf16.msra.mxu1 %v2896_v42 }
 0x2b9   :  { %2411 = vmatprep.subr.bf16.mxu1 %v3042_v34 }
 0x2bc   :  { %2413 = vmatpush3.bf16.msra.mxu1 %v3042_v34 }
 0x2bd   :  { %2415 = vmatprep.subr.bf16.mxu1 %v3048_v45 }
 0x2c0   :  { %2417 = vmatpush3.bf16.msra.mxu1 %v3048_v45 }
 0x2c1   :  { %2419 = vmatprep.subr.bf16.mxu1 %v2418_v47 }
 0x2c3   :  { %2113 = vmatmul.mubr.f32.vlgmr.msra.gmra.mrb[0].mxu1 %v939_v29 }
 0x2c4   :  { %2115 = vmatprep.mubr.f32.mxu1 %v949_v50  ;;  %2421 = vmatpush3.bf16.msra.mxu1 %v2418_v47 }
 0x2c5   :  { %2423 = vmatprep.subr.bf16.mxu1 %v2422_v27 }
 0x2c7   :  { %2116 = vmatmul.mubr.f32.gmra.mrb[2].mxu1 %v959_v36 }
 0x2c8   :  { %2425 = vmatpush3.bf16.msra.mxu1 %v2422_v27  ;;  %2150 = vmatprep.mubr.f32.mxu1 %v3066_v44  ;;  %v2568_v44 = vld [vmem:[%s3246_s2 + $0x10] sm:$0xff] }
 0x2c9   :  { %2427 = vmatprep.subr.bf16.mxu1 %v2426_v2 }
 0x2cc   :  { %2429 = vmatpush3.bf16.msra.mxu1 %v2426_v2 }
 0x2cd   :  { %2431 = vmatprep.subr.bf16.mxu1 %v2430_v3 }
 0x2d0   :  { %2433 = vmatpush3.bf16.msra.mxu1 %v2430_v3 }
 0x2d1   :  { %2435 = vmatprep.subr.bf16.mxu1 %v2434_v6 }
 0x2d4   :  { %2437 = vmatpush3.bf16.msra.mxu1 %v2434_v6 }
 0x2d5   :  { %2439 = vmatprep.subr.bf16.mxu1 %v2438_v15 }
 0x2d8   :  { %2441 = vmatpush3.bf16.msra.mxu1 %v2438_v15 }
 0x2d9   :  { %2443 = vmatprep.subr.bf16.mxu1 %v2442_v32 }
 0x2dc   :  { %2445 = vmatpush3.bf16.msra.mxu1 %v2442_v32 }
 0x2dd   :  { %2447 = vmatprep.subr.bf16.mxu1 %v2446_v39 }
 0x2e0   :  { %2449 = vmatpush3.bf16.msra.mxu1 %v2446_v39 }
 0x2e1   :  { %2482 = vmatprep.subr.bf16.mxu1 %v2790_v1 }
 0x2e3   :  { %2151 = vmatmul.mubr.f32.vlgmr.msra.gmra.mrb[0].mxu1 %v3064_v57 }
 0x2e4   :  { %2153 = vmatprep.mubr.f32.mxu1 %v3081_v63  ;;  %2490 = vmatpush3.bf16.msra.mxu1 %v2790_v1 }
 0x2e5   :  { %2483 = vmatprep.subr.bf16.mxu1 %v2796_v4 }
 0x2e7   :  { %2154 = vmatmul.mubr.f32.gmra.mrb[2].mxu1 %v3078_v55 }
 0x2e8   :  { %2491 = vmatpush3.bf16.msra.mxu1 %v2796_v4  ;;  %2191 = vmatprep.mubr.f32.mxu1 %v3081_v63 }
 0x2e9   :  { %2484 = vmatprep.subr.bf16.mxu1 %v2803_v8 }
 0x2ec   :  { %2492 = vmatpush3.bf16.msra.mxu1 %v2803_v8 }
 0x2ed   :  { %2485 = vmatprep.subr.bf16.mxu1 %v2824_v40 }
 0x2f0   :  { %2493 = vmatpush3.bf16.msra.mxu1 %v2824_v40 }
 0x2f1   :  { %2486 = vmatprep.subr.bf16.mxu1 %v2882_v16 }
 0x2f4   :  { %2494 = vmatpush3.bf16.msra.mxu1 %v2882_v16 }
 0x2f5   :  { %2487 = vmatprep.subr.bf16.mxu1 %v2896_v42 }
 0x2f8   :  { %2495 = vmatpush3.bf16.msra.mxu1 %v2896_v42 }
 0x2f9   :  { %2488 = vmatprep.subr.bf16.mxu1 %v3042_v34 }
 0x2fc   :  { %2496 = vmatpush3.bf16.msra.mxu1 %v3042_v34 }
 0x2fd   :  { %2489 = vmatprep.subr.bf16.mxu1 %v3048_v45 }
 0x300   :  { %2497 = vmatpush3.bf16.msra.mxu1 %v3048_v45  ;;  %v2567_v45 = vld [vmem:[%s3246_s2 + $0x18] sm:$0xff] }
 0x303   :  { %2192 = vmatmul.mubr.f32.vlgmr.msra.gmra.mrb[2].mxu1 %v3078_v55 }
 0x35e   :  { %v2000_v1 = vpop.f32.mrb[4].mxu0 }
 0x35f   :  { %v933_v4 = vpop.f32.mrb[5].mxu0  ;;  %v944_v14 = vadd.f32 %v2000_v1, %v1641_v0 }
 0x360   :  { %v934_v16 = vadd.f32 %v1641_v0, %v933_v4 }
 0x362   :  { %v2003_v8 = vpop.f32.mrb[6].mxu0 }
 0x363   :  { %v953_v40 = vpop.f32.mrb[7].mxu0  ;;  %v964_v25 = vadd.f32 %v2003_v8, %v1641_v0 }
 0x364   :  { %v954_v30 = vadd.f32 %v1641_v0, %v953_v40 }
 0x37f   :  { %v2190_v56 = vpop.f32.mrb[8].mxu0 }
 0x380   :  { %v1594_v22 = vpop.f32.mrb[9].mxu0 }
 0x3b6   :  { %v2152_v58 = vpop.f32.mrb[0].mxu1 }
 0x3b7   :  { %v2503_v59 = vadd.f32 %v2152_v58, %v944_v14  ;;  %v1489_v33 = vpop.f32.mrb[1].mxu1 }
 0x3b8   :  { %v2506_v49 = vadd.f32 %v1489_v33, %v934_v16 }
 0x3b9   :  { %v2504_v42 = vadd.f32 %v2503_v59, %v2190_v56 }
 0x3ba   :  { %v2507_v43 = vadd.f32 %v2506_v49, %v1594_v22 }
 0x3bb   :  { %v1617_v60 = vadd.f32 %v2565_v53, %v2504_v42 }
 0x3bc   :  { %v1616_v24 = vadd.f32 %v2566_v5, %v2507_v43 }
 0x3bd   :  { %1621 = vst.msk [vmem:[#allocation4 + $0x8] sm:$0xff] %vm35_vm0, %v1617_v60 }
 0x3be   :  { %1620 = vst.msk [vmem:[#allocation4] sm:$0xff] %vm35_vm0, %v1616_v24 }
 0x3d6   :  { %v2193_v31 = vpop.f32.mrb[2].mxu1 }
 0x3d7   :  { %v2509_v19 = vadd.f32 %v2193_v31, %v964_v25  ;;  %v1606_v51 = vpop.f32.mrb[3].mxu1 }
 0x3d8   :  { %v2511_v34 = vadd.f32 %v1606_v51, %v954_v30 }
 0x3d9   :  { %v1619_v57 = vadd.f32 %v2567_v45, %v2509_v19 }
 0x3da   :  { %v1618_v18 = vadd.f32 %v2568_v44, %v2511_v34 }
 0x3db   :  { %1623 = vst.msk [vmem:[#allocation4 + $0x18] sm:$0xff] %vm35_vm0, %v1619_v57 }
 0x3dc   :  { %1622 = vst.msk [vmem:[#allocation4 + $0x10] sm:$0xff] %vm35_vm0, %v1618_v18 }
 0x3dd   :  { %2580 = shalt.err (!%p2577_p4)
}
 0x3de   :  { %s2581_s24 = scalar_lea.hbm %s3251_s7, 512 }
 0x3df   :  { %p2582_p5 = scmp.ne.s32.totalorder %s3251_s7, %s2581_s24  ;;  %p2585_p6 = scmp.lt.u32.totalorder %s2581_s24, %s3251_s7 }
 0x3e1   :  { %p2587_p7 = pnand %p2585_p6, %p2582_p5 }
 0x3e3   :  { %2590 = shalt.err (!%p2587_p7)
}
 0x3e4   :  { %s2594_s1 = smov 128   ;;  %s2595_s27 = smov 8  }
 0x3e5   :  { %1635 = dma.vmem_to_hbm [thread:$0]  %s1630_s0, 512, %s3251_s7, [#allocation5], %s2594_s1, %s2594_s1, %s2595_s27  }
 0x3e6   :  { %2591 = dma.done.wait [#allocation5], 512  }
 0x3e7   :  { %2592 = vsyncadd [#allocation5], 4294966784 }
 0x3e8   :  { %1639 = vsyncpa [#allocation5], 1 }

// kernel: encoder_block_forward.4
= control target key start
LH: loop header
LB: loop body
LE: loop exit
PB: predicated region body
PF: predicated region fallthrough
CT: control target
= control target key end

     0   :  { %s6413_s18 = smov 0   ;;  %s6724_s0 = inlined_call_operand.vmem [shape: f32[2,16,192], index: 0, kind: input, shape index: {}]   ;;  %s6725_s1 = inlined_call_operand.vmem [shape: s32[2,1,16,16], index: 1, kind: input, shape index: {}]   ;;  %s6726_s2 = inlined_call_operand.vmem [shape: f32[64,64], index: 2, kind: input, shape index: {}]   ;;  %s6727_s3 = inlined_call_operand.vmem [shape: f32[1,64], index: 3, kind: input, shape index: {}]   ;;  %s6728_s4 = inlined_call_operand.vmem [shape: f32[2,16,64], index: 4, kind: input, shape index: {}]   ;;  %s6729_s5 = inlined_call_operand.vmem [shape: f32[2,16,64], index: 5, kind: output, shape index: {}]  }
   0x1 LB: > { %s5219_s19 = sadd.s32 4294967295, %s6374_s18   ;;  %p5223_p0 = scmp.ge.s32.totalorder %s6374_s18, 1  ;;  %s6374_s18 = sphi %s6413_s18, %s15_s18  }
   0x2   : > { %p207_p1 = scmp.lt.s32.totalorder %s6374_s18, 3 }
   0x4   : > { %p208_p2 = pnand %p5223_p0, %p207_p1 }
   0x5   : > { %p245_p3 = scmp.lt.s32.totalorder (!%p208_p2), %s5219_s19, 1  ;;  %vm277_vm0 = vcmask (!%p208_p2), 130048   ;;  %s6376_s24 = smov (!%p208_p2), 64   ;;  %vm4526_vm3 = vcmask (!%p208_p2), 261120   ;;  %vm4529_vm4 = vcmask (!%p208_p2), 392192   ;;  %vm4547_vm5 = vcmask (!%p208_p2), 523264  }
   0x6   : > { %211 = sbr.rel (%p208_p2) target bundleno = 3266 (0xcc2), region = 40  ;;  %s6377_s29 = smov (!%p208_p2), 48  }
   0x7   : > { %s6378_s30 = smov (!%p208_p2), 112   ;;  %s6379_s6 = smov (!%p208_p2), 32  }
   0x8   : > { %s6380_s7 = smov (!%p208_p2), 96   ;;  %s6381_s8 = smov (!%p208_p2), 16  }
   0x9   : > { %s6382_s9 = smov (!%p208_p2), 80  }
   0xd   : > { %s6731_s19 = smov (!%p245_p3, %s5219_s19), 1 }
   0xe   : > { %s5235_s20 = sshll.u32 %s6731_s19, 5  ;;  %s6444_s25 = sshll.u32 %s6731_s19, 4 }
   0xf   : > { %s6427_s23 = scalar_lea.vmem %s6724_s0, %s5235_s20  ;;  %s254_s28 = scalar_lea.vmem %s6725_s1, %s6444_s25 }
  0x10   : > { %v6430_v0 = vld [vmem:[%s6427_s23] sm:$0xff]  ;;  %v6436_v2 = vld [vmem:[%s6427_s23 + $0x10] sm:$0xff]  ;;  %v6452_v34 = vld [vmem:[%s254_s28 + $0x8] sm:$0xff]  ;;  %s264_s10 = scalar_lea.vmem %s6729_s5, %s6444_s25 }
  0x11   : > { %273 = vrot.lane.b32.xlu0 %v6430_v0, %s6376_s24  ;;  %v278_v1 = vsel %vm277_vm0, %v6430_v0, 0  ;;  %v280_v8 = vsel %vm277_vm0, %v6436_v2, 0  ;;  %v6450_v32 = vld [vmem:[%s254_s28] sm:$0xff]  ;;  %vm791_vm2 = vcmp.eq.s32.totalorder %v6452_v34, 0  ;;  %v6469_v52 = vld [vmem:[%s6427_s23 + $0x8] sm:$0xff]  ;;  %v6472_v53 = vld [vmem:[%s6427_s23 + $0x18] sm:$0xff] }
  0x12   : > { %v353_v3 = vand.u32 4294901760, %v278_v1  ;;  %v363_v9 = vand.u32 4294901760, %v280_v8  ;;  %vm790_vm1 = vcmp.eq.s32.totalorder %v6450_v32, 0  ;;  %v823_v54 = vand.u32 4294901760, %v6469_v52 }
  0x13   : > { %v826_v55 = vand.u32 4294901760, %v6472_v53 }
  0x14   : > { %v354_v4 = vsub.f32 %v278_v1, %v353_v3  ;;  %v364_v13 = vsub.f32 %v280_v8, %v363_v9  ;;  %v911_v57 = vsub.f32 %v6469_v52, %v823_v54 }
  0x15   : > { %275 = vrot.lane.b32.xlu0 %v6436_v2, %s6376_s24  ;;  %v6478_v56 = vpack.c.bf16 %v826_v55, %v823_v54  ;;  %v918_v58 = vsub.f32 %v6472_v53, %v826_v55 }
  0x16   : > { %v355_v5 = vand.u32 4294901760, %v354_v4  ;;  %v365_v19 = vand.u32 4294901760, %v364_v13  ;;  %v912_v59 = vand.u32 4294901760, %v911_v57 }
  0x17   : > { %5966 = vmatprep.subr.bf16.mxu1 %v6478_v56  ;;  %v919_v60 = vand.u32 4294901760, %v918_v58 }
  0x18   : > { %v356_v6 = vsub.f32 %v354_v4, %v355_v5  ;;  %v366_v24 = vsub.f32 %v364_v13, %v365_v19  ;;  %5968 = vmatpush3.bf16.msra.mxu1 %v6478_v56  ;;  %v913_v61 = vsub.f32 %v911_v57, %v912_v59 }
  0x19   : > { %v920_v62 = vsub.f32 %v918_v58, %v919_v60 }
  0x1a   : > { %v357_v7 = vand.u32 4294901760, %v356_v6  ;;  %v367_v26 = vand.u32 4294901760, %v366_v24  ;;  %v914_v63 = vand.u32 4294901760, %v913_v61 }
  0x1b   : > { %v921_v1 = vand.u32 4294901760, %v920_v62 }
  0x1c   : > { %5495 = vmatprep.mubr.f32.mxu0 %v357_v7 }
  0x83   : > { %v274_v10 = vpop.permute.xlu0 %273 }
  0x84   : > { %v282_v11 = vsel %vm277_vm0, %v274_v10, 0 }
  0x85   : > { %v287_v12 = vand.u32 4294901760, %v282_v11 }
  0x87   : > { %v375_v14 = vsub.f32 %v282_v11, %v287_v12  ;;  %v276_v15 = vpop.permute.xlu0 %275 }
  0x88   : > { %v284_v16 = vsel %vm277_vm0, %v276_v15, 0 }
  0x89   : > { %v376_v17 = vand.u32 4294901760, %v375_v14  ;;  %v290_v18 = vand.u32 4294901760, %v284_v16 }
  0x8b   : > { %v5941_v20 = vpack.c.bf16 %v290_v18, %v287_v12  ;;  %v382_v21 = vsub.f32 %v284_v16, %v290_v18  ;;  %v377_v22 = vsub.f32 %v375_v14, %v376_v17 }
  0x8d   : > { %v383_v23 = vand.u32 4294901760, %v382_v21  ;;  %5942 = vmatprep.subr.bf16.mxu0 %v5941_v20  ;;  %v378_v27 = vand.u32 4294901760, %v377_v22  ;;  %v5949_v30 = vpack.c.bf16 %v382_v21, %v375_v14 }
  0x8e   : > { %5944 = vmatpush3.bf16.xpose.msra.mxu0 %v5941_v20 }
  0x8f   : > { %v384_v25 = vsub.f32 %v382_v21, %v383_v23  ;;  %v5957_v31 = vpack.c.bf16 %v383_v23, %v376_v17 }
  0x91   : > { %v385_v28 = vand.u32 4294901760, %v384_v25 }
  0x93   : > { %v5945_v29 = vpack.c.bf16 %v385_v28, %v378_v27 }
  0x95   : > { %5496 = vmatmul.mubr.f32.vlgmr.msra.gmra.mrb[0].mxu0 %v367_v26  ;;  %5946 = vmatprep.subr.bf16.mxu0 %v5945_v29 }
  0x96   : > { %5948 = vmatpush3.bf16.xpose.msra.mxu0 %v5945_v29  ;;  %5502 = vmatprep.mubr.f32.mxu0 %v353_v3 }
  0x97   : > { %5950 = vmatprep.subr.bf16.mxu0 %v5949_v30 }
  0x9d   : > { %5503 = vmatmul.mubr.f32.vlgmr.msra.gmra.mrb[0].mxu0 %v363_v9 }
  0x9e   : > { %5952 = vmatpush3.bf16.xpose.msra.mxu0 %v5949_v30  ;;  %5509 = vmatprep.mubr.f32.mxu0 %v354_v4  ;;  %v5973_v4 = vpack.c.bf16 %v918_v58, %v911_v57 }
  0x9f   : > { %5954 = vmatprep.subr.bf16.mxu0 %v5941_v20 }
  0xa5   : > { %5510 = vmatmul.mubr.f32.vlgmr.msra.gmra.mrb[0].mxu0 %v364_v13 }
  0xa6   : > { %5956 = vmatpush3.bf16.xpose.msra.mxu0 %v5941_v20  ;;  %5516 = vmatprep.mubr.f32.mxu0 %v355_v5  ;;  %v5981_v5 = vpack.c.bf16 %v919_v60, %v912_v59 }
  0xa7   : > { %5958 = vmatprep.subr.bf16.mxu0 %v5957_v31 }
  0xad   : > { %5517 = vmatmul.mubr.f32.vlgmr.msra.gmra.mrb[0].mxu0 %v365_v19 }
  0xae   : > { %5960 = vmatpush3.bf16.xpose.msra.mxu0 %v5957_v31  ;;  %5523 = vmatprep.mubr.f32.mxu0 %v353_v3 }
  0xaf   : > { %5962 = vmatprep.subr.bf16.mxu0 %v5941_v20 }
  0xb5   : > { %5524 = vmatmul.mubr.f32.vlgmr.msra.gmra.mrb[0].mxu0 %v363_v9 }
  0xb6   : > { %5964 = vmatpush3.bf16.xpose.msra.mxu0 %v5941_v20  ;;  %5530 = vmatprep.mubr.f32.mxu0 %v353_v3  ;;  %v5969_v3 = vpack.c.bf16 %v921_v1, %v914_v63 }
  0xb8   : > { %5970 = vmatprep.subr.bf16.mxu1 %v5969_v3 }
  0xbd   : > { %5531 = vmatmul.mubr.f32.vlgmr.msra.gmra.mrb[0].mxu0 %v363_v9 }
 0x190   : > { %v5532_v33 = vpop.f32.mrb[0].mxu0 }
 0x191   : > { %v778_v35 = vpop.f32.mrb[1].mxu0  ;;  %v789_v36 = vmul.f32 0.25, %v5532_v33 }
 0x192   : > { %v788_v37 = vmul.f32 0.25, %v778_v35 }
 0x193   : > { %v793_v40 = vsel %vm791_vm2, -1e+09, %v789_v36 }
 0x194   : > { %v792_v38 = vsel %vm790_vm1, -1e+09, %v788_v37  ;;  %v797_v41 = vsel %vm277_vm0, %v793_v40, -inf }
 0x195   : > { %v794_v39 = vsel %vm277_vm0, %v792_v38, -inf }
 0x196   : > { %795 = vmax.xlane.f32.xlu1 %v794_v39 }
 0x19a   : > { %798 = vmax.xlane.f32.xlu1 %v797_v41 }
 0x223   : > { %v796_v42 = vpop.xlane.xlu1 %795 }
 0x224   : > { %v800_v43 = vsub.f32 %v792_v38, %v796_v42 }
 0x226   : > { %v802_v44 = vmul.f32 1.442695, %v800_v43 }
 0x227   : > { %v799_v45 = vpop.xlane.xlu1 %798 }
 0x228   : > { %6336 = vpow2.f32 %v802_v44  ;;  %v801_v46 = vsub.f32 %v793_v40, %v799_v45 }
 0x22a   : > { %v804_v47 = vmul.f32 1.442695, %v801_v46 }
 0x22c   : > { %6338 = vpow2.f32 %v804_v47 }
 0x232   : > { %v6337_v48 = vpop.eup %6336 }
 0x233   : > { %v806_v49 = vsel %vm277_vm0, %v6337_v48, 0.0 }
 0x234   : > { %807 = vadd.xlane.f32.xlu0 %v806_v49 }
 0x236   : > { %v6339_v50 = vpop.eup %6338 }
 0x237   : > { %v809_v51 = vsel %vm277_vm0, %v6339_v50, 0.0 }
 0x238   : > { %810 = vadd.xlane.f32.xlu1 %v809_v51 }
 0x249   : > { %1328 = vrot.lane.b32.xlu1 %v6430_v0, %s6377_s29 }
 0x24d   : > { %1330 = vrot.lane.b32.xlu1 %v6436_v2, %s6377_s29 }
 0x251   : > { %1324 = vrot.lane.b32.xlu1 %v6430_v0, %s6378_s30 }
 0x255   : > { %1326 = vrot.lane.b32.xlu1 %v6436_v2, %s6378_s30 }
 0x2c1   : > { %v808_v6 = vpop.xlane.xlu0 %807 }
 0x2c2   : > { %6340 = vrcp.f32 %v808_v6 }
 0x2c5   : > { %v811_v7 = vpop.xlane.xlu1 %810 }
 0x2c6   : > { %6342 = vrcp.f32 %v811_v7 }
 0x2c9   : > { %v1329_v24 = vpop.permute.xlu1 %1328 }
 0x2ca   : > { %v1336_v27 = vsel %vm277_vm0, %v1329_v24, 0 }
 0x2cb   : > { %v1341_v30 = vand.u32 4294901760, %v1336_v27 }
 0x2cc   : > { %v6341_v8 = vpop.eup %6340 }
 0x2cd   : > { %v813_v9 = vmul.f32 %v6341_v8, %v6337_v48  ;;  %v1331_v25 = vpop.permute.xlu1 %1330  ;;  %v1429_v35 = vsub.f32 %v1336_v27, %v1341_v30 }
 0x2ce   : > { %v1338_v28 = vsel %vm277_vm0, %v1331_v25, 0 }
 0x2cf   : > { %v817_v10 = vsel %vm277_vm0, %v813_v9, 0  ;;  %v1344_v31 = vand.u32 4294901760, %v1338_v28  ;;  %v1430_v40 = vand.u32 4294901760, %v1429_v35 }
 0x2d0   : > { %v6343_v11 = vpop.eup %6342  ;;  %v889_v12 = vand.u32 4294901760, %v817_v10 }
 0x2d1   : > { %v815_v13 = vmul.f32 %v6343_v11, %v6339_v50  ;;  %v1325_v26 = vpop.permute.xlu1 %1324  ;;  %v1436_v36 = vsub.f32 %v1338_v28, %v1344_v31  ;;  %v5989_v44 = vpack.c.bf16 %v1344_v31, %v1341_v30  ;;  %v1431_v45 = vsub.f32 %v1429_v35, %v1430_v40 }
 0x2d2   : > { %v890_v14 = vsub.f32 %v817_v10, %v889_v12  ;;  %v1332_v29 = vsel %vm277_vm0, %v1325_v26, 0 }
 0x2d3   : > { %v820_v15 = vsel %vm277_vm0, %v815_v13, 0  ;;  %v1407_v33 = vand.u32 4294901760, %v1332_v29  ;;  %v1437_v41 = vand.u32 4294901760, %v1436_v36  ;;  %v1432_v50 = vand.u32 4294901760, %v1431_v45 }
 0x2d4   : > { %v891_v16 = vand.u32 4294901760, %v890_v14  ;;  %v899_v17 = vand.u32 4294901760, %v820_v15  ;;  %v5997_v59 = vpack.c.bf16 %v1436_v36, %v1429_v35 }
 0x2d5   : > { %v1408_v37 = vsub.f32 %v1332_v29, %v1407_v33  ;;  %v1327_v38 = vpop.permute.xlu1 %1326  ;;  %v1438_v46 = vsub.f32 %v1436_v36, %v1437_v41 }
 0x2d6   : > { %v892_v18 = vsub.f32 %v890_v14, %v891_v16  ;;  %v900_v19 = vsub.f32 %v820_v15, %v899_v17  ;;  %v1334_v39 = vsel %vm277_vm0, %v1327_v38, 0 }
 0x2d7   : > { %v1409_v42 = vand.u32 4294901760, %v1408_v37  ;;  %v1417_v43 = vand.u32 4294901760, %v1334_v39  ;;  %v1439_v51 = vand.u32 4294901760, %v1438_v46 }
 0x2d8   : > { %v893_v20 = vand.u32 4294901760, %v892_v18  ;;  %v901_v21 = vand.u32 4294901760, %v900_v19 }
 0x2d9   : > { %v1410_v47 = vsub.f32 %v1408_v37, %v1409_v42  ;;  %v1418_v48 = vsub.f32 %v1334_v39, %v1417_v43  ;;  %v5993_v55 = vpack.c.bf16 %v1439_v51, %v1432_v50 }
 0x2da   : > { %5537 = vmatprep.mubr.f32.mxu1 %v893_v20  ;;  %v902_v22 = vsub.f32 %v900_v19, %v901_v21 }
 0x2db   : > { %v1411_v49 = vand.u32 4294901760, %v1410_v47  ;;  %v1419_v54 = vand.u32 4294901760, %v1418_v48 }
 0x2dc   : > { %v903_v23 = vand.u32 4294901760, %v902_v22 }
 0x2dd   : > { %v1420_v57 = vsub.f32 %v1418_v48, %v1419_v54 }
 0x2de   : > { %5538 = vmatmul.mubr.f32.vlgmr.msra.gmra.mrb[0].mxu1 %v903_v23 }
 0x2df   : > { %5972 = vmatpush3.bf16.msra.mxu1 %v5969_v3  ;;  %5544 = vmatprep.mubr.f32.mxu1 %v889_v12  ;;  %v1421_v58 = vand.u32 4294901760, %v1420_v57 }
 0x2e0   : > { %5974 = vmatprep.subr.bf16.mxu1 %v5973_v4 }
 0x2e6   : > { %5545 = vmatmul.mubr.f32.vlgmr.msra.gmra.mrb[0].mxu1 %v899_v17 }
 0x2e7   : > { %5976 = vmatpush3.bf16.msra.mxu1 %v5973_v4  ;;  %5551 = vmatprep.mubr.f32.mxu1 %v890_v14 }
 0x2e8   : > { %5978 = vmatprep.subr.bf16.mxu1 %v6478_v56 }
 0x2ee   : > { %5552 = vmatmul.mubr.f32.vlgmr.msra.gmra.mrb[0].mxu1 %v900_v19 }
 0x2ef   : > { %5980 = vmatpush3.bf16.msra.mxu1 %v6478_v56  ;;  %5558 = vmatprep.mubr.f32.mxu1 %v891_v16 }
 0x2f0   : > { %5982 = vmatprep.subr.bf16.mxu1 %v5981_v5 }
 0x2f6   : > { %5559 = vmatmul.mubr.f32.vlgmr.msra.gmra.mrb[0].mxu1 %v901_v21 }
 0x2f7   : > { %5984 = vmatpush3.bf16.msra.mxu1 %v5981_v5  ;;  %5565 = vmatprep.mubr.f32.mxu1 %v889_v12 }
 0x2f8   : > { %5986 = vmatprep.subr.bf16.mxu1 %v6478_v56 }
 0x2fe   : > { %5566 = vmatmul.mubr.f32.vlgmr.msra.gmra.mrb[0].mxu1 %v899_v17 }
 0x2ff   : > { %5988 = vmatpush3.bf16.msra.mxu1 %v6478_v56  ;;  %5572 = vmatprep.mubr.f32.mxu1 %v889_v12  ;;  %v6005_v56 = vpack.c.bf16 %v1437_v41, %v1430_v40 }
 0x300   : > { %5990 = vmatprep.subr.bf16.mxu1 %v5989_v44 }
 0x306   : > { %5573 = vmatmul.mubr.f32.vlgmr.msra.gmra.mrb[0].mxu1 %v899_v17 }
 0x307   : > { %5579 = vmatprep.mubr.f32.mxu1 %v1411_v49 }
 0x308   : > { %5992 = vmatpush3.bf16.xpose.msra.mxu1 %v5989_v44 }
 0x309   : > { %5994 = vmatprep.subr.bf16.mxu1 %v5993_v55 }
 0x30f   : > { %5580 = vmatmul.mubr.f32.vlgmr.msra.gmra.mrb[2].mxu1 %v1421_v58 }
 0x310   : > { %5996 = vmatpush3.bf16.xpose.msra.mxu1 %v5993_v55  ;;  %5586 = vmatprep.mubr.f32.mxu1 %v1407_v33 }
 0x311   : > { %5998 = vmatprep.subr.bf16.mxu1 %v5997_v59 }
 0x317   : > { %5587 = vmatmul.mubr.f32.vlgmr.msra.gmra.mrb[2].mxu1 %v1417_v43 }
 0x318   : > { %6000 = vmatpush3.bf16.xpose.msra.mxu1 %v5997_v59  ;;  %5593 = vmatprep.mubr.f32.mxu1 %v1408_v37 }
 0x319   : > { %6002 = vmatprep.subr.bf16.mxu1 %v5989_v44 }
 0x31f   : > { %5594 = vmatmul.mubr.f32.vlgmr.msra.gmra.mrb[2].mxu1 %v1418_v48 }
 0x320   : > { %6004 = vmatpush3.bf16.xpose.msra.mxu1 %v5989_v44  ;;  %5600 = vmatprep.mubr.f32.mxu1 %v1409_v42 }
 0x321   : > { %6006 = vmatprep.subr.bf16.mxu1 %v6005_v56 }
 0x327   : > { %5601 = vmatmul.mubr.f32.vlgmr.msra.gmra.mrb[2].mxu1 %v1419_v54 }
 0x328   : > { %6008 = vmatpush3.bf16.xpose.msra.mxu1 %v6005_v56  ;;  %5607 = vmatprep.mubr.f32.mxu1 %v1407_v33 }
 0x329   : > { %6010 = vmatprep.subr.bf16.mxu1 %v5989_v44 }
 0x32f   : > { %5608 = vmatmul.mubr.f32.vlgmr.msra.gmra.mrb[2].mxu1 %v1417_v43 }
 0x330   : > { %6012 = vmatpush3.bf16.xpose.msra.mxu1 %v5989_v44  ;;  %5614 = vmatprep.mubr.f32.mxu1 %v1407_v33 }
 0x337   : > { %5615 = vmatmul.mubr.f32.vlgmr.msra.gmra.mrb[2].mxu1 %v1417_v43 }
 0x3d9   : > { %v6496_v60 = vpop.f32.mrb[0].mxu1 }
 0x3da   : > { %v6498_v61 = vpop.f32.mrb[1].mxu1 }
 0x40a   : > { %v5616_v62 = vpop.f32.mrb[2].mxu1 }
 0x40b   : > { %v1843_v63 = vmul.f32 0.25, %v5616_v62  ;;  %v1832_v1 = vpop.f32.mrb[3].mxu1 }
 0x40c   : > { %v1842_v3 = vmul.f32 0.25, %v1832_v1 }
 0x40d   : > { %v1845_v4 = vsel %vm791_vm2, -1e+09, %v1843_v63 }
 0x40e   : > { %v1849_v5 = vsel %vm277_vm0, %v1845_v4, -inf  ;;  %v1844_v6 = vsel %vm790_vm1, -1e+09, %v1842_v3 }
 0x40f   : > { %1850 = vmax.xlane.f32.xlu1 %v1849_v5  ;;  %v1846_v7 = vsel %vm277_vm0, %v1844_v6, -inf }
 0x410   : > { %1847 = vmax.xlane.f32.xlu0 %v1846_v7 }
 0x420   : > { %2390 = vrot.lane.b32.xlu1 %v6436_v2, %s6379_s6 }
 0x426   : > { %1870 = vrot.lane.b32.xlu0 %v6469_v52, %s6378_s30 }
 0x49c   : > { %v1851_v8 = vpop.xlane.xlu1 %1850 }
 0x49d   : > { %v1853_v9 = vsub.f32 %v1845_v4, %v1851_v8  ;;  %v1848_v10 = vpop.xlane.xlu0 %1847 }
 0x49e   : > { %v1852_v11 = vsub.f32 %v1844_v6, %v1848_v10 }
 0x49f   : > { %v1856_v12 = vmul.f32 1.442695, %v1853_v9 }
 0x4a0   : > { %v1854_v13 = vmul.f32 1.442695, %v1852_v11  ;;  %v2391_v57 = vpop.permute.xlu1 %2390 }
 0x4a1   : > { %6344 = vpow2.f32 %v1856_v12  ;;  %v1871_v18 = vpop.permute.xlu0 %1870  ;;  %v2398_v56 = vsel %vm277_vm0, %v2391_v57, 0 }
 0x4a2   : > { %6346 = vpow2.f32 %v1854_v13  ;;  %v1883_v20 = vand.u32 4294901760, %v1871_v18  ;;  %v2404_v1 = vand.u32 4294901760, %v2398_v56 }
 0x4a4   : > { %v1971_v22 = vsub.f32 %v1871_v18, %v1883_v20  ;;  %v2496_v5 = vsub.f32 %v2398_v56, %v2404_v1 }
 0x4a6   : > { %v1972_v24 = vand.u32 4294901760, %v1971_v22  ;;  %v2497_v10 = vand.u32 4294901760, %v2496_v5 }
 0x4a8   : > { %v1973_v30 = vsub.f32 %v1971_v22, %v1972_v24 }
 0x4aa   : > { %v1974_v39 = vand.u32 4294901760, %v1973_v30 }
 0x4ab   : > { %v6345_v14 = vpop.eup %6344 }
 0x4ac   : > { %v1861_v15 = vsel %vm277_vm0, %v6345_v14, 0.0  ;;  %v6347_v16 = vpop.eup %6346 }
 0x4ad   : > { %1862 = vadd.xlane.f32.xlu0 %v1861_v15  ;;  %v1858_v17 = vsel %vm277_vm0, %v6347_v16, 0.0  ;;  %v2498_v15 = vsub.f32 %v2496_v5, %v2497_v10 }
 0x4b1   : > { %1859 = vadd.xlane.f32.xlu0 %v1858_v17 }
 0x4c7   : > { %1872 = vrot.lane.b32.xlu0 %v6472_v53, %s6378_s30 }
 0x4cb   : > { %2388 = vrot.lane.b32.xlu0 %v6430_v0, %s6379_s6 }
 0x4cf   : > { %2384 = vrot.lane.b32.xlu0 %v6430_v0, %s6380_s7 }
 0x4d3   : > { %2386 = vrot.lane.b32.xlu0 %v6436_v2, %s6380_s7 }
 0x53a   : > { %v1863_v19 = vpop.xlane.xlu0 %1862 }
 0x53b   : > { %6348 = vrcp.f32 %v1863_v19 }
 0x53e   : > { %v1860_v21 = vpop.xlane.xlu0 %1859 }
 0x53f   : > { %6350 = vrcp.f32 %v1860_v21  ;;  %v2499_v21 = vand.u32 4294901760, %v2498_v15 }
 0x542   : > { %v1873_v23 = vpop.permute.xlu0 %1872 }
 0x543   : > { %v1886_v25 = vand.u32 4294901760, %v1873_v23 }
 0x545   : > { %v6349_v26 = vpop.eup %6348  ;;  %v6520_v27 = vpack.c.bf16 %v1886_v25, %v1883_v20  ;;  %v1978_v28 = vsub.f32 %v1873_v23, %v1886_v25 }
 0x546   : > { %v1867_v29 = vmul.f32 %v6349_v26, %v6345_v14  ;;  %v2389_v55 = vpop.permute.xlu0 %2388 }
 0x547   : > { %v1979_v31 = vand.u32 4294901760, %v1978_v28  ;;  %6014 = vmatprep.subr.bf16.mxu0 %v6520_v27  ;;  %v6021_v54 = vpack.c.bf16 %v1978_v28, %v1971_v22  ;;  %v2396_v62 = vsel %vm277_vm0, %v2389_v55, 0 }
 0x548   : > { %6016 = vmatpush3.bf16.msra.mxu0 %v6520_v27  ;;  %v1880_v33 = vsel %vm277_vm0, %v1867_v29, 0  ;;  %v2401_v3 = vand.u32 4294901760, %v2396_v62 }
 0x549   : > { %v6351_v35 = vpop.eup %6350  ;;  %v1980_v36 = vsub.f32 %v1978_v28, %v1979_v31  ;;  %v6525_v37 = vand.u32 4294901760, %v1880_v33  ;;  %v6029_v59 = vpack.c.bf16 %v1979_v31, %v1972_v24 }
 0x54a   : > { %v1865_v38 = vmul.f32 %v6351_v35, %v6347_v16  ;;  %v2385_v58 = vpop.permute.xlu0 %2384  ;;  %v2489_v6 = vsub.f32 %v2396_v62, %v2401_v3  ;;  %v6037_v13 = vpack.c.bf16 %v2404_v1, %v2401_v3 }
 0x54b   : > { %v1981_v40 = vand.u32 4294901760, %v1980_v36  ;;  %v1960_v41 = vsub.f32 %v1880_v33, %v6525_v37  ;;  %v2392_v63 = vsel %vm277_vm0, %v2385_v58, 0 }
 0x54c   : > { %v1877_v42 = vsel %vm277_vm0, %v1865_v38, 0  ;;  %v2467_v4 = vand.u32 4294901760, %v2392_v63  ;;  %v2490_v11 = vand.u32 4294901760, %v2489_v6  ;;  %v6045_v26 = vpack.c.bf16 %v2496_v5, %v2489_v6 }
 0x54d   : > { %v6017_v43 = vpack.c.bf16 %v1981_v40, %v1974_v39  ;;  %v1949_v44 = vand.u32 4294901760, %v1877_v42  ;;  %v1961_v45 = vand.u32 4294901760, %v1960_v41 }
 0x54e   : > { %v2468_v7 = vsub.f32 %v2392_v63, %v2467_v4  ;;  %v2387_v8 = vpop.permute.xlu0 %2386  ;;  %v2491_v16 = vsub.f32 %v2489_v6, %v2490_v11 }
 0x54f   : > { %6018 = vmatprep.subr.bf16.mxu0 %v6017_v43  ;;  %v1950_v46 = vsub.f32 %v1877_v42, %v1949_v44  ;;  %v1962_v48 = vsub.f32 %v1960_v41, %v1961_v45  ;;  %v2394_v9 = vsel %vm277_vm0, %v2387_v8, 0 }
 0x550   : > { %v2469_v12 = vand.u32 4294901760, %v2468_v7  ;;  %v2477_v14 = vand.u32 4294901760, %v2394_v9  ;;  %v2492_v20 = vand.u32 4294901760, %v2491_v16 }
 0x551   : > { %v1951_v47 = vand.u32 4294901760, %v1950_v46  ;;  %v1963_v51 = vand.u32 4294901760, %v1962_v48 }
 0x552   : > { %v2470_v17 = vsub.f32 %v2468_v7, %v2469_v12  ;;  %v2478_v18 = vsub.f32 %v2394_v9, %v2477_v14  ;;  %v6041_v23 = vpack.c.bf16 %v2499_v21, %v2492_v20 }
 0x553   : > { %v1952_v49 = vsub.f32 %v1950_v46, %v1951_v47 }
 0x554   : > { %v2471_v19 = vand.u32 4294901760, %v2470_v17  ;;  %v2479_v22 = vand.u32 4294901760, %v2478_v18 }
 0x555   : > { %v1953_v50 = vand.u32 4294901760, %v1952_v49 }
 0x556   : > { %v2480_v24 = vsub.f32 %v2478_v18, %v2479_v22 }
 0x557   : > { %5621 = vmatprep.mubr.f32.mxu0 %v1953_v50 }
 0x558   : > { %5622 = vmatmul.mubr.f32.vlgmr.msra.gmra.mrb[2].mxu0 %v1963_v51  ;;  %v2481_v25 = vand.u32 4294901760, %v2480_v24 }
 0x559   : > { %6020 = vmatpush3.bf16.msra.mxu0 %v6017_v43  ;;  %5628 = vmatprep.mubr.f32.mxu0 %v1949_v44 }
 0x55a   : > { %6022 = vmatprep.subr.bf16.mxu0 %v6021_v54 }
 0x560   : > { %5629 = vmatmul.mubr.f32.vlgmr.msra.gmra.mrb[2].mxu0 %v6525_v37 }
 0x561   : > { %6024 = vmatpush3.bf16.msra.mxu0 %v6021_v54  ;;  %5635 = vmatprep.mubr.f32.mxu0 %v1950_v46 }
 0x562   : > { %6026 = vmatprep.subr.bf16.mxu0 %v6520_v27 }
 0x568   : > { %5636 = vmatmul.mubr.f32.vlgmr.msra.gmra.mrb[2].mxu0 %v1960_v41 }
 0x569   : > { %6028 = vmatpush3.bf16.msra.mxu0 %v6520_v27  ;;  %5642 = vmatprep.mubr.f32.mxu0 %v1951_v47 }
 0x56a   : > { %6030 = vmatprep.subr.bf16.mxu0 %v6029_v59 }
 0x570   : > { %5643 = vmatmul.mubr.f32.vlgmr.msra.gmra.mrb[2].mxu0 %v1961_v45 }
 0x571   : > { %6032 = vmatpush3.bf16.msra.mxu0 %v6029_v59  ;;  %5649 = vmatprep.mubr.f32.mxu0 %v1949_v44 }
 0x572   : > { %6034 = vmatprep.subr.bf16.mxu0 %v6520_v27 }
 0x578   : > { %5650 = vmatmul.mubr.f32.vlgmr.msra.gmra.mrb[2].mxu0 %v6525_v37 }
 0x579   : > { %6036 = vmatpush3.bf16.msra.mxu0 %v6520_v27  ;;  %5656 = vmatprep.mubr.f32.mxu0 %v1949_v44  ;;  %v6053_v27 = vpack.c.bf16 %v2497_v10, %v2490_v11 }
 0x57a   : > { %6038 = vmatprep.subr.bf16.mxu0 %v6037_v13 }
 0x580   : > { %5657 = vmatmul.mubr.f32.vlgmr.msra.gmra.mrb[2].mxu0 %v6525_v37 }
 0x581   : > { %5663 = vmatprep.mubr.f32.mxu0 %v2471_v19 }
 0x582   : > { %6040 = vmatpush3.bf16.xpose.msra.mxu0 %v6037_v13 }
 0x583   : > { %6042 = vmatprep.subr.bf16.mxu0 %v6041_v23 }
 0x589   : > { %5664 = vmatmul.mubr.f32.vlgmr.msra.gmra.mrb[4].mxu0 %v2481_v25 }
 0x58a   : > { %6044 = vmatpush3.bf16.xpose.msra.mxu0 %v6041_v23  ;;  %5670 = vmatprep.mubr.f32.mxu0 %v2467_v4 }
 0x58b   : > { %6046 = vmatprep.subr.bf16.mxu0 %v6045_v26 }
 0x591   : > { %5671 = vmatmul.mubr.f32.vlgmr.msra.gmra.mrb[4].mxu0 %v2477_v14 }
 0x592   : > { %6048 = vmatpush3.bf16.xpose.msra.mxu0 %v6045_v26  ;;  %5677 = vmatprep.mubr.f32.mxu0 %v2468_v7 }
 0x593   : > { %6050 = vmatprep.subr.bf16.mxu0 %v6037_v13 }
 0x599   : > { %5678 = vmatmul.mubr.f32.vlgmr.msra.gmra.mrb[4].mxu0 %v2478_v18 }
 0x59a   : > { %6052 = vmatpush3.bf16.xpose.msra.mxu0 %v6037_v13  ;;  %5684 = vmatprep.mubr.f32.mxu0 %v2469_v12 }
 0x59b   : > { %6054 = vmatprep.subr.bf16.mxu0 %v6053_v27 }
 0x5a1   : > { %5685 = vmatmul.mubr.f32.vlgmr.msra.gmra.mrb[4].mxu0 %v2479_v22 }
 0x5a2   : > { %6056 = vmatpush3.bf16.xpose.msra.mxu0 %v6053_v27  ;;  %5691 = vmatprep.mubr.f32.mxu0 %v2467_v4 }
 0x5a3   : > { %6058 = vmatprep.subr.bf16.mxu0 %v6037_v13 }
 0x5a9   : > { %5692 = vmatmul.mubr.f32.vlgmr.msra.gmra.mrb[4].mxu0 %v2477_v14 }
 0x5aa   : > { %6060 = vmatpush3.bf16.xpose.msra.mxu0 %v6037_v13  ;;  %5698 = vmatprep.mubr.f32.mxu0 %v2467_v4 }
 0x5b1   : > { %5699 = vmatmul.mubr.f32.vlgmr.msra.gmra.mrb[4].mxu0 %v2477_v14 }
 0x653   : > { %v6540_v28 = vpop.f32.mrb[2].mxu0 }
 0x654   : > { %v6542_v29 = vpop.f32.mrb[3].mxu0 }
 0x684   : > { %v5700_v30 = vpop.f32.mrb[4].mxu0 }
 0x685   : > { %v2903_v31 = vmul.f32 0.25, %v5700_v30  ;;  %v2892_v33 = vpop.f32.mrb[5].mxu0 }
 0x686   : > { %v2902_v35 = vmul.f32 0.25, %v2892_v33 }
 0x687   : > { %v2905_v36 = vsel %vm791_vm2, -1e+09, %v2903_v31 }
 0x688   : > { %v2909_v37 = vsel %vm277_vm0, %v2905_v36, -inf  ;;  %v2904_v38 = vsel %vm790_vm1, -1e+09, %v2902_v35 }
 0x689   : > { %2910 = vmax.xlane.f32.xlu1 %v2909_v37  ;;  %v2906_v39 = vsel %vm277_vm0, %v2904_v38, -inf }
 0x68a   : > { %2907 = vmax.xlane.f32.xlu0 %v2906_v39 }
 0x69a   : > { %2930 = vrot.lane.b32.xlu1 %v6472_v53, %s6380_s7 }
 0x69e   : > { %3446 = vrot.lane.b32.xlu1 %v6430_v0, %s6381_s8 }
 0x6a2   : > { %3442 = vrot.lane.b32.xlu1 %v6430_v0, %s6382_s9 }
 0x716   : > { %v2911_v40 = vpop.xlane.xlu1 %2910 }
 0x717   : > { %v2913_v41 = vsub.f32 %v2905_v36, %v2911_v40  ;;  %v2908_v42 = vpop.xlane.xlu0 %2907 }
 0x718   : > { %v2912_v43 = vsub.f32 %v2904_v38, %v2908_v42 }
 0x719   : > { %v2916_v44 = vmul.f32 1.442695, %v2913_v41 }
 0x71a   : > { %v2914_v45 = vmul.f32 1.442695, %v2912_v43  ;;  %v2931_v0 = vpop.permute.xlu1 %2930 }
 0x71b   : > { %6352 = vpow2.f32 %v2916_v44  ;;  %v2944_v50 = vand.u32 4294901760, %v2931_v0 }
 0x71c   : > { %6354 = vpow2.f32 %v2914_v45 }
 0x71d   : > { %v3036_v54 = vsub.f32 %v2931_v0, %v2944_v50 }
 0x71e   : > { %v3447_v23 = vpop.permute.xlu1 %3446 }
 0x71f   : > { %v3037_v57 = vand.u32 4294901760, %v3036_v54  ;;  %v3454_v27 = vsel %vm277_vm0, %v3447_v23, 0 }
 0x720   : > { %v3459_v33 = vand.u32 4294901760, %v3454_v27 }
 0x721   : > { %v3038_v62 = vsub.f32 %v3036_v54, %v3037_v57 }
 0x722   : > { %v3443_v25 = vpop.permute.xlu1 %3442  ;;  %v3547_v37 = vsub.f32 %v3454_v27, %v3459_v33 }
 0x723   : > { %v3039_v7 = vand.u32 4294901760, %v3038_v62  ;;  %v3450_v31 = vsel %vm277_vm0, %v3443_v25, 0 }
 0x724   : > { %v3525_v36 = vand.u32 4294901760, %v3450_v31  ;;  %v3548_v41 = vand.u32 4294901760, %v3547_v37 }
 0x725   : > { %v6353_v46 = vpop.eup %6352 }
 0x726   : > { %v2921_v47 = vsel %vm277_vm0, %v6353_v46, 0.0  ;;  %v6355_v48 = vpop.eup %6354  ;;  %v3526_v39 = vsub.f32 %v3450_v31, %v3525_v36 }
 0x727   : > { %2922 = vadd.xlane.f32.xlu0 %v2921_v47  ;;  %v2918_v49 = vsel %vm277_vm0, %v6355_v48, 0.0 }
 0x728   : > { %v3527_v44 = vand.u32 4294901760, %v3526_v39 }
 0x72b   : > { %2919 = vadd.xlane.f32.xlu0 %v2918_v49  ;;  %v3528_v49 = vsub.f32 %v3526_v39, %v3527_v44 }
 0x741   : > { %2928 = vrot.lane.b32.xlu0 %v6469_v52, %s6380_s7  ;;  %s259_s7 = scalar_lea.vmem %s6728_s4, %s6444_s25 }
 0x745   : > { %3448 = vrot.lane.b32.xlu0 %v6436_v2, %s6381_s8 }
 0x749   : > { %3444 = vrot.lane.b32.xlu0 %v6436_v2, %s6382_s9 }
 0x7b4   : > { %v2923_v51 = vpop.xlane.xlu0 %2922 }
 0x7b5   : > { %6356 = vrcp.f32 %v2923_v51 }
 0x7b8   : > { %v2920_v55 = vpop.xlane.xlu0 %2919 }
 0x7b9   : > { %6358 = vrcp.f32 %v2920_v55 }
 0x7bc   : > { %v2929_v58 = vpop.permute.xlu0 %2928 }
 0x7bd   : > { %v2941_v59 = vand.u32 4294901760, %v2929_v58 }
 0x7bf   : > { %v6357_v56 = vpop.eup %6356  ;;  %v6564_v63 = vpack.c.bf16 %v2944_v50, %v2941_v59  ;;  %v3029_v1 = vsub.f32 %v2929_v58, %v2941_v59 }
 0x7c0   : > { %v2927_v3 = vmul.f32 %v6357_v56, %v6353_v46  ;;  %v3449_v24 = vpop.permute.xlu0 %3448  ;;  %v3549_v46 = vsub.f32 %v3547_v37, %v3548_v41 }
 0x7c1   : > { %v3030_v4 = vand.u32 4294901760, %v3029_v1  ;;  %6062 = vmatprep.subr.bf16.mxu1 %v6564_v63  ;;  %v6069_v22 = vpack.c.bf16 %v3036_v54, %v3029_v1  ;;  %v3456_v30 = vsel %vm277_vm0, %v3449_v24, 0  ;;  %v3529_v54 = vand.u32 4294901760, %v3528_v49 }
 0x7c2   : > { %6064 = vmatpush3.bf16.msra.mxu1 %v6564_v63  ;;  %v2938_v2 = vsel %vm277_vm0, %v2927_v3, 0  ;;  %v3462_v35 = vand.u32 4294901760, %v3456_v30  ;;  %v3550_v50 = vand.u32 4294901760, %v3549_v46 }
 0x7c3   : > { %v6359_v5 = vpop.eup %6358  ;;  %v3031_v6 = vsub.f32 %v3029_v1, %v3030_v4  ;;  %v6569_v8 = vand.u32 4294901760, %v2938_v2  ;;  %v6077_v26 = vpack.c.bf16 %v3037_v57, %v3030_v4 }
 0x7c4   : > { %v2925_v9 = vmul.f32 %v6359_v5, %v6355_v48  ;;  %v3554_v38 = vsub.f32 %v3456_v30, %v3462_v35  ;;  %v3445_v40 = vpop.permute.xlu0 %3444  ;;  %v6085_v45 = vpack.c.bf16 %v3462_v35, %v3459_v33 }
 0x7c5   : > { %v3032_v10 = vand.u32 4294901760, %v3031_v6  ;;  %v3018_v11 = vsub.f32 %v2938_v2, %v6569_v8  ;;  %v3452_v43 = vsel %vm277_vm0, %v3445_v40, 0 }
 0x7c6   : > { %v2935_v12 = vsel %vm277_vm0, %v2925_v9, 0  ;;  %v3555_v42 = vand.u32 4294901760, %v3554_v38  ;;  %v3535_v48 = vand.u32 4294901760, %v3452_v43  ;;  %v6093_v56 = vpack.c.bf16 %v3554_v38, %v3547_v37 }
 0x7c7   : > { %v6065_v13 = vpack.c.bf16 %v3039_v7, %v3032_v10  ;;  %v3007_v14 = vand.u32 4294901760, %v2935_v12  ;;  %v3019_v15 = vand.u32 4294901760, %v3018_v11 }
 0x7c8   : > { %v3556_v47 = vsub.f32 %v3554_v38, %v3555_v42  ;;  %v3536_v0 = vsub.f32 %v3452_v43, %v3535_v48  ;;  %v6101_v62 = vpack.c.bf16 %v3555_v42, %v3548_v41 }
 0x7c9   : > { %6066 = vmatprep.subr.bf16.mxu1 %v6065_v13  ;;  %v3008_v16 = vsub.f32 %v2935_v12, %v3007_v14  ;;  %v3020_v18 = vsub.f32 %v3018_v11, %v3019_v15 }
 0x7ca   : > { %v3557_v51 = vand.u32 4294901760, %v3556_v47  ;;  %v3537_v55 = vand.u32 4294901760, %v3536_v0 }
 0x7cb   : > { %v3009_v17 = vand.u32 4294901760, %v3008_v16  ;;  %v3021_v21 = vand.u32 4294901760, %v3020_v18 }
 0x7cc   : > { %v6089_v57 = vpack.c.bf16 %v3557_v51, %v3550_v50  ;;  %v3538_v58 = vsub.f32 %v3536_v0, %v3537_v55  ;;  %v4532_v51 = vld [vmem:[%s6726_s2] sm:$0xff] }
 0x7cd   : > { %v3010_v19 = vsub.f32 %v3008_v16, %v3009_v17 }
 0x7ce   : > { %v3539_v59 = vand.u32 4294901760, %v3538_v58 }
 0x7cf   : > { %v3011_v20 = vand.u32 4294901760, %v3010_v19 }
 0x7d1   : > { %5705 = vmatprep.mubr.f32.mxu1 %v3011_v20 }
 0x7d2   : > { %5706 = vmatmul.mubr.f32.vlgmr.msra.gmra.mrb[4].mxu1 %v3021_v21 }
 0x7d3   : > { %6068 = vmatpush3.bf16.msra.mxu1 %v6065_v13  ;;  %5712 = vmatprep.mubr.f32.mxu1 %v3007_v14 }
 0x7d4   : > { %6070 = vmatprep.subr.bf16.mxu1 %v6069_v22 }
 0x7da   : > { %5713 = vmatmul.mubr.f32.vlgmr.msra.gmra.mrb[4].mxu1 %v6569_v8 }
 0x7db   : > { %6072 = vmatpush3.bf16.msra.mxu1 %v6069_v22  ;;  %5719 = vmatprep.mubr.f32.mxu1 %v3008_v16 }
 0x7dc   : > { %6074 = vmatprep.subr.bf16.mxu1 %v6564_v63 }
 0x7e2   : > { %5720 = vmatmul.mubr.f32.vlgmr.msra.gmra.mrb[4].mxu1 %v3018_v11 }
 0x7e3   : > { %6076 = vmatpush3.bf16.msra.mxu1 %v6564_v63  ;;  %5726 = vmatprep.mubr.f32.mxu1 %v3009_v17 }
 0x7e4   : > { %6078 = vmatprep.subr.bf16.mxu1 %v6077_v26 }
 0x7ea   : > { %5727 = vmatmul.mubr.f32.vlgmr.msra.gmra.mrb[4].mxu1 %v3019_v15 }
 0x7eb   : > { %6080 = vmatpush3.bf16.msra.mxu1 %v6077_v26  ;;  %5733 = vmatprep.mubr.f32.mxu1 %v3007_v14 }
 0x7ec   : > { %6082 = vmatprep.subr.bf16.mxu1 %v6564_v63 }
 0x7f2   : > { %5734 = vmatmul.mubr.f32.vlgmr.msra.gmra.mrb[4].mxu1 %v6569_v8 }
 0x7f3   : > { %6084 = vmatpush3.bf16.msra.mxu1 %v6564_v63  ;;  %5740 = vmatprep.mubr.f32.mxu1 %v3007_v14 }
 0x7f4   : > { %6086 = vmatprep.subr.bf16.mxu1 %v6085_v45 }
 0x7fa   : > { %5741 = vmatmul.mubr.f32.vlgmr.msra.gmra.mrb[4].mxu1 %v6569_v8 }
 0x7fb   : > { %5747 = vmatprep.mubr.f32.mxu1 %v3529_v54  ;;  %v4533_v54 = vld [vmem:[%s6726_s2 + $0x8] sm:$0xff] }
 0x7fc   : > { %6088 = vmatpush3.bf16.xpose.msra.mxu1 %v6085_v45  ;;  %v4558_v58 = vand.u32 4294901760, %v4533_v54 }
 0x7fd   : > { %6090 = vmatprep.subr.bf16.mxu1 %v6089_v57 }
 0x803   : > { %5748 = vmatmul.mubr.f32.vlgmr.msra.gmra.mrb[6].mxu1 %v3539_v59  ;;  %v6618_v59 = vld [vmem:[%s6726_s2 + $0x18] sm:$0xff] }
 0x804   : > { %6092 = vmatpush3.bf16.xpose.msra.mxu1 %v6089_v57  ;;  %5754 = vmatprep.mubr.f32.mxu1 %v3525_v36  ;;  %v4555_v57 = vand.u32 4294901760, %v4532_v51 }
 0x805   : > { %6094 = vmatprep.subr.bf16.mxu1 %v6093_v56 }
 0x80b   : > { %5755 = vmatmul.mubr.f32.vlgmr.msra.gmra.mrb[6].mxu1 %v3535_v48 }
 0x80c   : > { %6096 = vmatpush3.bf16.xpose.msra.mxu1 %v6093_v56  ;;  %5761 = vmatprep.mubr.f32.mxu1 %v3526_v39 }
 0x80d   : > { %6098 = vmatprep.subr.bf16.mxu1 %v6085_v45 }
 0x813   : > { %5762 = vmatmul.mubr.f32.vlgmr.msra.gmra.mrb[6].mxu1 %v3536_v0 }
 0x814   : > { %6100 = vmatpush3.bf16.xpose.msra.mxu1 %v6085_v45  ;;  %5768 = vmatprep.mubr.f32.mxu1 %v3527_v44 }
 0x815   : > { %6102 = vmatprep.subr.bf16.mxu1 %v6101_v62 }
 0x81b   : > { %5769 = vmatmul.mubr.f32.vlgmr.msra.gmra.mrb[6].mxu1 %v3537_v55  ;;  %v6613_v55 = vld [vmem:[%s6726_s2 + $0x10] sm:$0xff] }
 0x81c   : > { %6104 = vmatpush3.bf16.xpose.msra.mxu1 %v6101_v62  ;;  %5775 = vmatprep.mubr.f32.mxu1 %v3525_v36  ;;  %v4561_v56 = vand.u32 4294901760, %v6613_v55  ;;  %v4564_v62 = vand.u32 4294901760, %v6618_v59 }
 0x81d   : > { %6106 = vmatprep.subr.bf16.mxu1 %v6085_v45 }
 0x823   : > { %5776 = vmatmul.mubr.f32.vlgmr.msra.gmra.mrb[6].mxu1 %v3535_v48 }
 0x824   : > { %6108 = vmatpush3.bf16.xpose.msra.mxu1 %v6085_v45  ;;  %5782 = vmatprep.mubr.f32.mxu1 %v3525_v36 }
 0x82b   : > { %5783 = vmatmul.mubr.f32.vlgmr.msra.gmra.mrb[6].mxu1 %v3535_v48 }
 0x8cd   : > { %v5742_v63 = vpop.f32.mrb[4].mxu1 }
 0x8ce   : > { %v3432_v1 = vpop.f32.mrb[5].mxu1 }
 0x8fe   : > { %v5784_v3 = vpop.f32.mrb[6].mxu1 }
 0x8ff   : > { %v3961_v4 = vmul.f32 0.25, %v5784_v3  ;;  %v3950_v2 = vpop.f32.mrb[7].mxu1  ;;  %v4536_v3 = vld [vmem:[%s6726_s2 + $0x20] sm:$0xff] }
 0x900   : > { %v3960_v5 = vmul.f32 0.25, %v3950_v2  ;;  %v4567_v2 = vand.u32 4294901760, %v4536_v3 }
 0x901   : > { %v3963_v6 = vsel %vm791_vm2, -1e+09, %v3961_v4  ;;  %v4537_v4 = vld [vmem:[%s6726_s2 + $0x28] sm:$0xff] }
 0x902   : > { %v3967_v7 = vsel %vm277_vm0, %v3963_v6, -inf  ;;  %v3962_v8 = vsel %vm790_vm1, -1e+09, %v3960_v5  ;;  %v4570_v5 = vand.u32 4294901760, %v4537_v4 }
 0x903   : > { %3968 = vmax.xlane.f32.xlu0 %v3967_v7  ;;  %v3964_v9 = vsel %vm277_vm0, %v3962_v8, -inf  ;;  %v4538_v7 = vld [vmem:[%s6726_s2 + $0x30] sm:$0xff] }
 0x904   : > { %3965 = vmax.xlane.f32.xlu1 %v3964_v9  ;;  %v4573_v9 = vand.u32 4294901760, %v4538_v7 }
 0x990   : > { %v3969_v10 = vpop.xlane.xlu0 %3968 }
 0x991   : > { %v3971_v11 = vsub.f32 %v3963_v6, %v3969_v10  ;;  %v3966_v12 = vpop.xlane.xlu1 %3965  ;;  %v6644_v6 = vpack.c.bf16 %v4570_v5, %v4567_v2 }
 0x992   : > { %v3970_v13 = vsub.f32 %v3962_v8, %v3966_v12  ;;  %v4539_v8 = vld [vmem:[%s6726_s2 + $0x38] sm:$0xff]  ;;  %v4649_v12 = vsub.f32 %v4532_v51, %v4555_v57 }
 0x993   : > { %v3974_v14 = vmul.f32 1.442695, %v3971_v11  ;;  %v4576_v10 = vand.u32 4294901760, %v4539_v8 }
 0x994   : > { %v3972_v15 = vmul.f32 1.442695, %v3970_v13  ;;  %v4656_v13 = vsub.f32 %v4533_v54, %v4558_v58 }
 0x995   : > { %6360 = vpow2.f32 %v3974_v14  ;;  %v6656_v11 = vpack.c.bf16 %v4576_v10, %v4573_v9  ;;  %v4650_v14 = vand.u32 4294901760, %v4649_v12 }
 0x996   : > { %6362 = vpow2.f32 %v3972_v15  ;;  %v4657_v15 = vand.u32 4294901760, %v4656_v13 }
 0x99f   : > { %v6361_v16 = vpop.eup %6360 }
 0x9a0   : > { %v6363_v34 = vpop.eup %6362  ;;  %v3979_v17 = vsel %vm277_vm0, %v6361_v16, 0.0 }
 0x9a1   : > { %3980 = vadd.xlane.f32.xlu1 %v3979_v17  ;;  %v3976_v32 = vsel %vm277_vm0, %v6363_v34, 0.0  ;;  %v4658_v17 = vsub.f32 %v4656_v13, %v4657_v15 }
 0x9a2   : > { %3977 = vadd.xlane.f32.xlu0 %v3976_v32 }
 0x9b2   : > { %3988 = vrot.lane.b32.xlu1 %v6472_v53, %s6382_s9 }
 0x9b6   : > { %4502 = vrot.lane.b32.xlu1 %v6542_v29, %s6381_s8 }
 0x9b8   : > { %3986 = vrot.lane.b32.xlu0 %v6469_v52, %s6382_s9 }
 0x9ba   : > { %4510 = vrot.lane.b32.xlu1 %v3432_v1, %s6379_s6  ;;  %v6628_v1 = vpack.c.bf16 %v4564_v62, %v4561_v56 }
 0x9bc   : > { %4504 = vrot.lane.b32.xlu0 %v6540_v28, %s6381_s8 }
 0x9c0   : > { %4512 = vrot.lane.b32.xlu0 %v5742_v63, %s6379_s6  ;;  %v6622_v63 = vpack.c.bf16 %v4558_v58, %v4555_v57 }
 0x9c2   : > { %6134 = vmatprep.subr.bf16.mxu1 %v6622_v63 }
 0x9c3   : > { %6136 = vmatpush3.bf16.msra.mxu1 %v6622_v63 }
 0x9c4   : > { %6138 = vmatprep.subr.bf16.mxu1 %v6628_v1 }
 0x9c7   : > { %6140 = vmatpush3.bf16.msra.mxu1 %v6628_v1 }
 0x9c8   : > { %6142 = vmatprep.subr.bf16.mxu1 %v6644_v6 }
 0x9cb   : > { %6144 = vmatpush3.bf16.msra.mxu1 %v6644_v6 }
 0x9cc   : > { %6146 = vmatprep.subr.bf16.mxu1 %v6656_v11 }
 0x9cf   : > { %6148 = vmatpush3.bf16.msra.mxu1 %v6656_v11 }
 0xa2e   : > { %v3981_v18 = vpop.xlane.xlu1 %3980 }
 0xa2f   : > { %6364 = vrcp.f32 %v3981_v18  ;;  %v3978_v19 = vpop.xlane.xlu0 %3977  ;;  %v4659_v18 = vand.u32 4294901760, %v4658_v17 }
 0xa30   : > { %6366 = vrcp.f32 %v3978_v19 }
 0xa32   : > { %v3989_v20 = vpop.permute.xlu1 %3988 }
 0xa33   : > { %v4002_v21 = vand.u32 4294901760, %v3989_v20  ;;  %v3987_v53 = vpop.permute.xlu0 %3986 }
 0xa34   : > { %v3999_v22 = vand.u32 4294901760, %v3987_v53 }
 0xa35   : > { %v4094_v23 = vsub.f32 %v3989_v20, %v4002_v21 }
 0xa36   : > { %v6109_v29 = vpack.c.bf16 %v4002_v21, %v3999_v22  ;;  %v4087_v24 = vsub.f32 %v3987_v53, %v3999_v22  ;;  %v4677_v21 = vsub.f32 %v4536_v3, %v4567_v2  ;;  %v4684_v53 = vsub.f32 %v4537_v4, %v4570_v5 }
 0xa37   : > { %v4095_v25 = vand.u32 4294901760, %v4094_v23 }
 0xa38   : > { %v4088_v52 = vand.u32 4294901760, %v4087_v24  ;;  %6110 = vmatprep.subr.bf16.mxu0 %v6109_v29  ;;  %v6117_v0 = vpack.c.bf16 %v4094_v23, %v4087_v24 }
 0xa39   : > { %v6365_v26 = vpop.eup %6364  ;;  %v4096_v27 = vsub.f32 %v4094_v23, %v4095_v25  ;;  %6112 = vmatpush3.bf16.msra.mxu0 %v6109_v29  ;;  %v4678_v23 = vand.u32 4294901760, %v4677_v21 }
 0xa3a   : > { %v6367_v28 = vpop.eup %6366  ;;  %v3985_v30 = vmul.f32 %v6365_v26, %v6361_v16  ;;  %v4089_v31 = vsub.f32 %v4087_v24, %v4088_v52  ;;  %v6125_v50 = vpack.c.bf16 %v4095_v25, %v4088_v52  ;;  %v6662_v16 = vpack.c.bf16 %v4657_v15, %v4650_v14 }
 0xa3b   : > { %v3983_v33 = vmul.f32 %v6367_v28, %v6363_v34  ;;  %v4097_v35 = vand.u32 4294901760, %v4096_v27  ;;  %v4651_v34 = vsub.f32 %v4649_v12, %v4650_v14  ;;  %v4679_v25 = vsub.f32 %v4677_v21, %v4678_v23 }
 0xa3c   : > { %v4090_v36 = vand.u32 4294901760, %v4089_v31  ;;  %v3996_v37 = vsel %vm277_vm0, %v3985_v30, 0  ;;  %v4691_v26 = vsub.f32 %v4538_v7, %v4573_v9  ;;  %v4698_v27 = vsub.f32 %v4539_v8, %v4576_v10 }
 0xa3d   : > { %v3993_v38 = vsel %vm277_vm0, %v3983_v33, 0  ;;  %v4075_v39 = vand.u32 4294901760, %v3996_v37  ;;  %v4652_v32 = vand.u32 4294901760, %v4651_v34  ;;  %v4680_v28 = vand.u32 4294901760, %v4679_v25 }
 0xa3e   : > { %v6113_v40 = vpack.c.bf16 %v4097_v35, %v4090_v36  ;;  %v4065_v41 = vand.u32 4294901760, %v3993_v38  ;;  %v4692_v31 = vand.u32 4294901760, %v4691_v26  ;;  %v4699_v33 = vand.u32 4294901760, %v4698_v27 }
 0xa3f   : > { %v4076_v42 = vsub.f32 %v3996_v37, %v4075_v39  ;;  %v6665_v20 = vpack.c.bf16 %v4659_v18, %v4652_v32 }
 0xa40   : > { %6114 = vmatprep.subr.bf16.mxu0 %v6113_v40  ;;  %v4066_v43 = vsub.f32 %v3993_v38, %v4065_v41  ;;  %v4693_v36 = vsub.f32 %v4691_v26, %v4692_v31  ;;  %v6209_v37 = vpack.c.bf16 %v4699_v33, %v4692_v31  ;;  %v4700_v38 = vsub.f32 %v4698_v27, %v4699_v33 }
 0xa41   : > { %v4077_v44 = vand.u32 4294901760, %v4076_v42  ;;  %6150 = vmatprep.subr.bf16.mxu1 %v6665_v20 }
 0xa42   : > { %v4067_v45 = vand.u32 4294901760, %v4066_v43 }
 0xa43   : > { %v4078_v46 = vsub.f32 %v4076_v42, %v4077_v44 }
 0xa44   : > { %v4068_v47 = vsub.f32 %v4066_v43, %v4067_v45 }
 0xa45   : > { %v4079_v49 = vand.u32 4294901760, %v4078_v46  ;;  %v4503_v46 = vpop.permute.xlu1 %4502 }
 0xa46   : > { %v4069_v48 = vand.u32 4294901760, %v4068_v47  ;;  %v4524_v51 = vsel %vm277_vm0, %v6498_v61, %v4503_v46 }
 0xa48   : > { %5789 = vmatprep.mubr.f32.mxu0 %v4069_v48 }
 0xa49   : > { %5790 = vmatmul.mubr.f32.vlgmr.msra.gmra.mrb[6].mxu0 %v4079_v49  ;;  %v4511_v48 = vpop.permute.xlu1 %4510  ;;  %v4663_v49 = vsub.f32 %v6613_v55, %v4561_v56 }
 0xa4a   : > { %6116 = vmatpush3.bf16.msra.mxu0 %v6113_v40  ;;  %5796 = vmatprep.mubr.f32.mxu0 %v4065_v41  ;;  %v4701_v40 = vand.u32 4294901760, %v4700_v38  ;;  %v4527_v58 = vsel %vm4526_vm3, %v4524_v51, %v4511_v48 }
 0xa4b   : > { %6118 = vmatprep.subr.bf16.mxu0 %v6117_v0  ;;  %v4664_v2 = vand.u32 4294901760, %v4663_v49 }
 0xa51   : > { %5797 = vmatmul.mubr.f32.vlgmr.msra.gmra.mrb[6].mxu0 %v4075_v39 }
 0xa52   : > { %6120 = vmatpush3.bf16.msra.mxu0 %v6117_v0  ;;  %5803 = vmatprep.mubr.f32.mxu0 %v4066_v43  ;;  %v6674_v43 = vpack.c.bf16 %v4684_v53, %v4677_v21  ;;  %v4670_v0 = vsub.f32 %v6618_v59, %v4564_v62 }
 0xa53   : > { %6122 = vmatprep.subr.bf16.mxu0 %v6109_v29 }
 0xa54   : > { %v4671_v5 = vand.u32 4294901760, %v4670_v0 }
 0xa56   : > { %v4672_v9 = vsub.f32 %v4670_v0, %v4671_v5 }
 0xa58   : > { %v4673_v34 = vand.u32 4294901760, %v4672_v9 }
 0xa59   : > { %5804 = vmatmul.mubr.f32.vlgmr.msra.gmra.mrb[6].mxu0 %v4076_v42  ;;  %v6672_v42 = vpack.c.bf16 %v4656_v13, %v4649_v12  ;;  %v6201_v13 = vpack.c.bf16 %v4671_v5, %v4664_v2 }
 0xa5a   : > { %6124 = vmatpush3.bf16.msra.mxu0 %v6109_v29  ;;  %5810 = vmatprep.mubr.f32.mxu0 %v4067_v45  ;;  %v4505_v45 = vpop.permute.xlu0 %4504 }
 0xa5b   : > { %6126 = vmatprep.subr.bf16.mxu0 %v6125_v50 }
 0xa5e   : > { %v4513_v47 = vpop.permute.xlu0 %4512 }
 0xa61   : > { %5811 = vmatmul.mubr.f32.vlgmr.msra.gmra.mrb[6].mxu0 %v4077_v44  ;;  %v6676_v44 = vpack.c.bf16 %v4698_v27, %v4691_v26 }
 0xa62   : > { %6128 = vmatpush3.bf16.msra.mxu0 %v6125_v50  ;;  %5817 = vmatprep.mubr.f32.mxu0 %v4065_v41  ;;  %v4525_v50 = vsel %vm277_vm0, %v6496_v60, %v4505_v45  ;;  %v4665_v60 = vsub.f32 %v4663_v49, %v4664_v2 }
 0xa63   : > { %6130 = vmatprep.subr.bf16.mxu0 %v6109_v29  ;;  %v4528_v54 = vsel %vm4526_vm3, %v4525_v50, %v4513_v47 }
 0xa64   : > { %v4666_v15 = vand.u32 4294901760, %v4665_v60 }
 0xa69   : > { %5818 = vmatmul.mubr.f32.vlgmr.msra.gmra.mrb[6].mxu0 %v4075_v39 }
 0xa6a   : > { %6132 = vmatpush3.bf16.msra.mxu0 %v6109_v29  ;;  %5824 = vmatprep.mubr.f32.mxu0 %v4065_v41  ;;  %v4685_v29 = vand.u32 4294901760, %v4684_v53 }
 0xa6b   : > { %6182 = vmatprep.subr.bf16.mxu0 %v6622_v63 }
 0xa6c   : > { %v6670_v24 = vpack.c.bf16 %v4685_v29, %v4678_v23  ;;  %v4686_v52 = vsub.f32 %v4684_v53, %v4685_v29  ;;  %v5135_v53 = vld [vmem:[%s259_s7 + $0x8] sm:$0xff]  ;;  %v5134_v29 = vld [vmem:[%s259_s7] sm:$0xff] }
 0xa6e   : > { %v4687_v30 = vand.u32 4294901760, %v4686_v52 }
 0xa70   : > { %v6157_v35 = vpack.c.bf16 %v4687_v30, %v4680_v28 }
 0xa71   : > { %5825 = vmatmul.mubr.f32.vlgmr.msra.gmra.mrb[6].mxu0 %v4075_v39  ;;  %v4694_v39 = vand.u32 4294901760, %v4693_v36 }
 0xa72   : > { %6184 = vmatpush3.bf16.msra.mxu0 %v6622_v63 }
 0xa73   : > { %6186 = vmatprep.subr.bf16.mxu0 %v6628_v1  ;;  %v6161_v41 = vpack.c.bf16 %v4701_v40, %v4694_v39 }
 0xa76   : > { %6188 = vmatpush3.bf16.msra.mxu0 %v6628_v1 }
 0xa77   : > { %6190 = vmatprep.subr.bf16.mxu0 %v6644_v6 }
 0xa7a   : > { %6192 = vmatpush3.bf16.msra.mxu0 %v6644_v6 }
 0xa7b   : > { %6194 = vmatprep.subr.bf16.mxu0 %v6656_v11 }
 0xa7e   : > { %6196 = vmatpush3.bf16.msra.mxu0 %v6656_v11 }
 0xa7f   : > { %6198 = vmatprep.subr.bf16.mxu0 %v6662_v16 }
 0xb44   : > { %v5826_v19 = vpop.f32.mrb[6].mxu0 }
 0xb45   : > { %4520 = vrot.lane.b32.xlu0 %v5826_v19, %s6377_s29  ;;  %v4490_v22 = vpop.f32.mrb[7].mxu0  ;;  %v6153_v19 = vpack.c.bf16 %v4673_v34, %v4666_v15 }
 0xb46   : > { %4518 = vrot.lane.b32.xlu1 %v4490_v22, %s6377_s29 }
 0xbb7   : > { %v4521_v57 = vpop.permute.xlu0 %4520 }
 0xbb8   : > { %v4531_v3 = vsel %vm4529_vm4, %v4528_v54, %v4521_v57  ;;  %v4519_v4 = vpop.permute.xlu1 %4518 }
 0xbb9   : > { %v4552_v55 = vsel %vm4547_vm5, %v4531_v3, 0  ;;  %v4530_v56 = vsel %vm4529_vm4, %v4527_v58, %v4519_v4 }
 0xbba   : > { %v4637_v7 = vand.u32 4294901760, %v4552_v55  ;;  %v4549_v59 = vsel %vm4547_vm5, %v4530_v56, 0 }
 0xbbb   : > { %v4627_v62 = vand.u32 4294901760, %v4549_v59 }
 0xbbc   : > { %v4638_v8 = vsub.f32 %v4552_v55, %v4637_v7 }
 0xbbd   : > { %v4628_v10 = vsub.f32 %v4549_v59, %v4627_v62 }
 0xbbe   : > { %v4639_v12 = vand.u32 4294901760, %v4638_v8 }
 0xbbf   : > { %v4629_v61 = vand.u32 4294901760, %v4628_v10 }
 0xbc0   : > { %v4640_v14 = vsub.f32 %v4638_v8, %v4639_v12 }
 0xbc1   : > { %5900 = vmatprep.mubr.f32.mxu0 %v4629_v61  ;;  %v4630_v17 = vsub.f32 %v4628_v10, %v4629_v61 }
 0xbc2   : > { %5901 = vmatmul.mubr.f32.vlgmr.msra.gmra.mrb[8].mxu0 %v4639_v12  ;;  %v4641_v18 = vand.u32 4294901760, %v4640_v14 }
 0xbc3   : > { %6200 = vmatpush3.bf16.msra.mxu0 %v6662_v16  ;;  %5919 = vmatprep.mubr.f32.mxu0 %v4627_v62  ;;  %v4631_v32 = vand.u32 4294901760, %v4630_v17  ;;  %v6169_v16 = vpack.c.bf16 %v4670_v0, %v4663_v49 }
 0xbc4   : > { %6202 = vmatprep.subr.bf16.mxu0 %v6201_v13 }
 0xbc5   : > { %5843 = vmatprep.mubr.f32.mxu1 %v4631_v32 }
 0xbc6   : > { %5844 = vmatmul.mubr.f32.vlgmr.msra.gmra.mrb[8].mxu1 %v4641_v18 }
 0xbc7   : > { %6152 = vmatpush3.bf16.msra.mxu1 %v6665_v20  ;;  %6204 = vmatpush3.bf16.msra.mxu0 %v6201_v13 }
 0xbc8   : > { %5862 = vmatprep.mubr.f32.mxu1 %v4627_v62  ;;  %6154 = vmatprep.subr.bf16.mxu1 %v6153_v19 }
 0xbc9   : > { %6206 = vmatprep.subr.bf16.mxu0 %v6670_v24 }
 0xbcb   : > { %6156 = vmatpush3.bf16.msra.mxu1 %v6153_v19  ;;  %6208 = vmatpush3.bf16.msra.mxu0 %v6670_v24 }
 0xbcc   : > { %6158 = vmatprep.subr.bf16.mxu1 %v6157_v35  ;;  %6210 = vmatprep.subr.bf16.mxu0 %v6209_v37 }
 0xbcf   : > { %6160 = vmatpush3.bf16.msra.mxu1 %v6157_v35  ;;  %6212 = vmatpush3.bf16.msra.mxu0 %v6209_v37 }
 0xbd0   : > { %6162 = vmatprep.subr.bf16.mxu1 %v6161_v41  ;;  %6214 = vmatprep.subr.bf16.mxu0 %v6622_v63 }
 0xbd2   : > { %5920 = vmatmul.mubr.f32.vlgmr.msra.gmra.mrb[8].mxu0 %v4637_v7 }
 0xbd3   : > { %6164 = vmatpush3.bf16.msra.mxu1 %v6161_v41  ;;  %6216 = vmatpush3.bf16.msra.mxu0 %v6622_v63 }
 0xbd4   : > { %5938 = vmatprep.mubr.f32.mxu0 %v4627_v62  ;;  %6166 = vmatprep.subr.bf16.mxu1 %v6672_v42 }
 0xbd5   : > { %6218 = vmatprep.subr.bf16.mxu0 %v6628_v1 }
 0xbd6   : > { %5863 = vmatmul.mubr.f32.vlgmr.msra.gmra.mrb[8].mxu1 %v4637_v7 }
 0xbd7   : > { %6168 = vmatpush3.bf16.msra.mxu1 %v6672_v42  ;;  %5881 = vmatprep.mubr.f32.mxu1 %v4628_v10 }
 0xbd8   : > { %6220 = vmatpush3.bf16.msra.mxu0 %v6628_v1  ;;  %6170 = vmatprep.subr.bf16.mxu1 %v6169_v16 }
 0xbd9   : > { %6222 = vmatprep.subr.bf16.mxu0 %v6644_v6 }
 0xbdb   : > { %6172 = vmatpush3.bf16.msra.mxu1 %v6169_v16 }
 0xbdc   : > { %6224 = vmatpush3.bf16.msra.mxu0 %v6644_v6  ;;  %6174 = vmatprep.subr.bf16.mxu1 %v6674_v43  ;;  %v5232_v6 = vld [vmem:[%s6727_s3] ss:$0 sm:$0xff] }
 0xbdd   : > { %6226 = vmatprep.subr.bf16.mxu0 %v6656_v11 }
 0xbdf   : > { %6176 = vmatpush3.bf16.msra.mxu1 %v6674_v43 }
 0xbe0   : > { %6228 = vmatpush3.bf16.msra.mxu0 %v6656_v11  ;;  %6178 = vmatprep.subr.bf16.mxu1 %v6676_v44 }
 0xbe3   : > { %5939 = vmatmul.mubr.f32.vlgmr.msra.gmra.mrb[8].mxu0 %v4637_v7  ;;  %6180 = vmatpush3.bf16.msra.mxu1 %v6676_v44 }
 0xbe6   : > { %5882 = vmatmul.mubr.f32.vlgmr.msra.gmra.mrb[8].mxu1 %v4638_v8 }
 0xcb6   : > { %v5940_v63 = vpop.f32.mrb[8].mxu0 }
 0xcb7   : > { %v5124_v1 = vpop.f32.mrb[9].mxu0 }
 0xcb9   : > { %v5883_v20 = vpop.f32.mrb[8].mxu1 }
 0xcba   : > { %v6229_v21 = vadd.f32 %v5883_v20, %v5232_v6  ;;  %v4848_v11 = vpop.f32.mrb[9].mxu1 }
 0xcbb   : > { %v6231_v22 = vadd.f32 %v5232_v6, %v4848_v11 }
 0xcbc   : > { %v6230_v23 = vadd.f32 %v6229_v21, %v5940_v63 }
 0xcbd   : > { %v6232_v24 = vadd.f32 %v6231_v22, %v5124_v1 }
 0xcbe   : > { %v5137_v25 = vadd.f32 %v6230_v23, %v5135_v53 }
 0xcbf   : > { %v5136_v52 = vadd.f32 %v6232_v24, %v5134_v29 }
 0xcc0   : > { %5139 = vst.msk [vmem:[%s264_s10 + $0x8] sm:$0xff] %vm4547_vm5, %v5137_v25 }
 0xcc1   : > { %5138 = vst.msk [vmem:[%s264_s10] sm:$0xff] %vm4547_vm5, %v5136_v52 }
 0xcc2 PF: > { %s15_s18 = sadd.s32 1, %s6374_s18  }
 0xcc3   : > { %p12_p4 = scmp.ge.s32.totalorder %s15_s18, 4  }
 0xcc5   :  { %14 = sbr.rel (!%p12_p4) target bundleno = 1 (0x1), region = 76 }

</bundles_post_ra>
